<compile_context>
chip_gen: v5e
topology: v5e:2x2
jax: 0.10.0
libtpu: 0.0.40
codegen_flags: <defaults>
</compile_context>

<pallas_src>
from functools import partial

import jax
import jax.numpy as jnp
from jax.experimental import pallas as pl
from jax.experimental.pallas import tpu as pltpu


# Safe on v5e/v6e (128 MiB physical) and v7x (64 MiB physical); actual usage
# here is well under 2 MiB.
_VMEM_LIMIT_BYTES = 32 * 1024 * 1024


# ----------------------------------------------------------------------------
# Pallas kernel: conv-as-matmul,  out(OC, TM) = relu(W(OC,K) @ P(K,TM) + b)
# ----------------------------------------------------------------------------
def _conv_mm_kernel(w_ref, p_ref, b_ref, o_ref):
    # w_ref: (OC, K) bf16   p_ref: (K, TM) bf16   b_ref: (OC, 1) f32
    acc = jnp.dot(w_ref[...], p_ref[...], preferred_element_type=jnp.float32)
    acc = jnp.maximum(acc + b_ref[...], 0.0)          # bias + ReLU in f32
    o_ref[...] = acc.astype(o_ref.dtype)


def conv2d_relu_cm(x_cm, w_mat, bias, kh, kw, stride, *, tm_max=512):
    """Conv2d + ReLU on a channels-major activation.

    x_cm:  (C, N, H, W)        bf16
    w_mat: (OC, C*KH*KW)       bf16, rows ordered (c, kh, kw) = PyTorch reshape
    bias:  (OC, 1)             f32
    returns (OC, N, OH, OW)    bf16
    """
    c, n, h, w = x_cm.shape
    oc, k = w_mat.shape
    oh = (h - kh) // stride + 1
    ow = (w - kw) // stride + 1

    # im2col in (K, M) layout: K = c*kh*kw (c-major, kh, kw minor),
    # M = n*oh*ow goes on the lane axis.  Reshape below is contiguous
    # (no transpose) because channels are already leading.
    cols = []
    for i in range(kh):
        for j in range(kw):
            cols.append(x_cm[:, :, i:i + stride * oh:stride,
                                   j:j + stride * ow:stride])
    patches = jnp.stack(cols, axis=1).reshape(c * kh * kw, n * oh * ow)
    patches = patches.astype(jnp.bfloat16)
    m = n * oh * ow

    # Lane tile: full M if it fits, else 512 (multiple of 128).  Ragged last
    # block is handled by Pallas (masked stores on the padded lanes).
    tm = m if m <= tm_max else tm_max
    grid = (pl.cdiv(m, tm),)

    out = pl.pallas_call(
        _conv_mm_kernel,
        out_shape=jax.ShapeDtypeStruct((oc, m), jnp.bfloat16),
        grid=grid,
        in_specs=[
            pl.BlockSpec((oc, k), lambda i: (0, 0)),    # weight: resident
            pl.BlockSpec((k, tm), lambda i: (0, i)),    # patches: stream tiles
            pl.BlockSpec((oc, 1), lambda i: (0, 0)),    # bias: resident
        ],
        out_specs=pl.BlockSpec((oc, tm), lambda i: (0, i)),   # lane-dense out
        compiler_params=pltpu.CompilerParams(
            dimension_semantics=("parallel",),
            vmem_limit_bytes=_VMEM_LIMIT_BYTES),
    )(w_mat, patches, bias)

    return out.reshape(oc, n, oh, ow)


# ----------------------------------------------------------------------------
# Pallas kernel: fused fc1 -> ReLU -> out  (hidden activation stays in VMEM)
# ----------------------------------------------------------------------------
def _fc_fused_kernel(x_ref, w1_ref, b1_ref, w2_ref, b2_ref, o_ref):
    # x: (N, 2592) bf16  w1: (2592, 256) bf16  b1: (1, 256) f32
    # w2: (256, 32) bf16 b2: (1, 32) f32       o: (N, 32) f32
    h = jnp.dot(x_ref[...], w1_ref[...], preferred_element_type=jnp.float32)
    h = jnp.maximum(h + b1_ref[...], 0.0)               # fc1 bias + ReLU (f32)
    y = jnp.dot(h.astype(jnp.bfloat16), w2_ref[...],
                preferred_element_type=jnp.float32)
    o_ref[...] = (y + b2_ref[...]).astype(o_ref.dtype)


def fc_head(x, w1, b1, w2, b2):
    n, k1 = x.shape
    _, hdim = w1.shape
    _, nout = w2.shape
    return pl.pallas_call(
        _fc_fused_kernel,
        out_shape=jax.ShapeDtypeStruct((n, nout), jnp.float32),
        grid=(1,),
        in_specs=[
            pl.BlockSpec((n, k1), lambda i: (0, 0)),
            pl.BlockSpec((k1, hdim), lambda i: (0, 0)),
            pl.BlockSpec((1, hdim), lambda i: (0, 0)),
            pl.BlockSpec((hdim, nout), lambda i: (0, 0)),
            pl.BlockSpec((1, nout), lambda i: (0, 0)),
        ],
        out_specs=pl.BlockSpec((n, nout), lambda i: (0, 0)),
        compiler_params=pltpu.CompilerParams(
            dimension_semantics=("arbitrary",),
            vmem_limit_bytes=_VMEM_LIMIT_BYTES),
    )(x, w1, b1, w2, b2)


# ----------------------------------------------------------------------------
# Parameter init: PyTorch-like uniform fan-in, then pre-reshape / pre-transpose
# once and cast matmul operands to bf16 (biases stay f32).
# ----------------------------------------------------------------------------
def init_params(key):
    def uniform(k, shape, fan_in):
        bound = 1.0 / jnp.sqrt(jnp.float32(fan_in))
        return jax.random.uniform(k, shape, jnp.float32, -bound, bound)

    ks = jax.random.split(key, 8)
    conv1_w = uniform(ks[0], (16, 4, 8, 8), 4 * 8 * 8)
    conv2_w = uniform(ks[2], (32, 16, 4, 4), 16 * 4 * 4)
    fc1_w = uniform(ks[4], (256, 32 * 9 * 9), 32 * 9 * 9)
    out_w = uniform(ks[6], (32, 256), 256)

    return {
        # conv weights as (OC, C*KH*KW): exactly PyTorch's weight.reshape(OC,-1)
        "conv1_w": conv1_w.reshape(16, 4 * 8 * 8).astype(jnp.bfloat16),
        "conv1_b": uniform(ks[1], (16, 1), 4 * 8 * 8),
        "conv2_w": conv2_w.reshape(32, 16 * 4 * 4).astype(jnp.bfloat16),
        "conv2_b": uniform(ks[3], (32, 1), 16 * 4 * 4),
        # FC weights pre-transposed: (in_features, out_features)
        "fc1_w": fc1_w.T.astype(jnp.bfloat16),        # (2592, 256)
        "fc1_b": uniform(ks[5], (1, 256), 32 * 9 * 9),
        "out_w": out_w.T.astype(jnp.bfloat16),        # (256, 32)
        "out_b": uniform(ks[7], (1, 32), 256),
    }


# ----------------------------------------------------------------------------
# Forward pass mirroring SimpleCNN.forward (eval mode)
# ----------------------------------------------------------------------------
@jax.jit
def simple_cnn_forward(params, x):
    # x: (N, 4, 84, 84) float32, NCHW (PyTorch layout).
    n = x.shape[0]
    # One cheap layout change to channels-major (C, N, H, W); everything until
    # the flatten stays in this layout (no per-layer NCHW<->NHWC round trips).
    x = jnp.transpose(x, (1, 0, 2, 3)).astype(jnp.bfloat16)
    x = conv2d_relu_cm(x, params["conv1_w"], params["conv1_b"], 8, 8, 4)  # (16, N, 20, 20)
    x = conv2d_relu_cm(x, params["conv2_w"], params["conv2_b"], 4, 4, 2)  # (32, N, 9, 9)
    # Flatten in PyTorch (C, H, W) order; this transpose touches only
    # N*2592 bf16 elements (tiny).
    x = jnp.transpose(x, (1, 0, 2, 3)).reshape(n, 32 * 9 * 9)
    # TODO(synk): F.dropout(p=0.5) is identity in eval mode; training-mode
    # stochastic dropout (pltpu.prng_random_bits) not reproduced here.
    return fc_head(x, params["fc1_w"], params["fc1_b"],
                   params["out_w"], params["out_b"])


if __name__ == "__main__":
    key = jax.random.PRNGKey(0)
    k_param, k_input = jax.random.split(key)

    params = init_params(k_param)
    # Small batch; spatial size 84 is fixed by fc1's 32*9*9 input features.
    x = jax.random.normal(k_input, (2, 4, 84, 84), dtype=jnp.float32)

    out = simple_cnn_forward(params, x)
    out = jax.block_until_ready(out)

    assert out.shape == (2, 32), out.shape
    assert out.dtype == jnp.float32
    print("KERNEL_OK")
</pallas_src>

<mosaic_0001>
module attributes {stable_mosaic.version = 11 : i64} {
  func.func @_conv_mm_kernel(%arg0: i32, %arg1: memref<16x256xbf16, #tpu.memory_space<vmem>>, %arg2: memref<256x512xbf16, #tpu.memory_space<vmem>>, %arg3: memref<16x1xf32, #tpu.memory_space<vmem>>, %arg4: memref<16x512xbf16, #tpu.memory_space<vmem>>) attributes {dimension_semantics = [#tpu.dimension_semantics<parallel>], iteration_bounds = array<i64: 2>, scalar_prefetch = 0 : i64, scratch_operands = 0 : i64, tpu.core_type = #tpu.core_type<tc>, window_params = [{pipeline_mode = #tpu.pipeline_mode<synchronous>, transform_indices = @transform_0, window_bounds = array<i64: 16, 256>}, {transform_indices = @transform_1, window_bounds = array<i64: 256, 512>}, {pipeline_mode = #tpu.pipeline_mode<synchronous>, transform_indices = @transform_2, window_bounds = array<i64: 16, 1>}, {transform_indices = @transform_3, window_bounds = array<i64: 16, 512>}]} {
    %c0 = arith.constant 0 : index
    %c0_0 = arith.constant 0 : index
    %0 = vector.load %arg1[%c0, %c0_0] : memref<16x256xbf16, #tpu.memory_space<vmem>>, vector<16x256xbf16>
    %c0_1 = arith.constant 0 : index
    %c0_2 = arith.constant 0 : index
    %1 = vector.load %arg2[%c0_1, %c0_2] : memref<256x512xbf16, #tpu.memory_space<vmem>>, vector<256x512xbf16>
    %cst = arith.constant dense<0.000000e+00> : vector<16x512xf32>
    %2 = tpu.matmul %0, %1, %cst {dimension_numbers = #tpu.dot_dimension_numbers<[1], [0], [0], [1], [0, 0, 1, 1], [], []>} : vector<16x256xbf16>, vector<256x512xbf16>, vector<16x512xf32> -> vector<16x512xf32>
    %c0_3 = arith.constant 0 : index
    %c0_4 = arith.constant 0 : index
    %3 = vector.load %arg3[%c0_3, %c0_4] : memref<16x1xf32, #tpu.memory_space<vmem>>, vector<16x1xf32>
    %4 = vector.broadcast %3 : vector<16x1xf32> to vector<16x512xf32>
    %5 = arith.addf %2, %4 : vector<16x512xf32>
    %cst_5 = arith.constant 0.000000e+00 : f32
    %6 = vector.broadcast %cst_5 : f32 to vector<16x512xf32>
    %7 = arith.maximumf %5, %6 : vector<16x512xf32>
    %8 = arith.truncf %7 : vector<16x512xf32> to vector<16x512xbf16>
    %c0_6 = arith.constant 0 : index
    %c0_7 = arith.constant 0 : index
    %9 = vector.load %arg4[%c0_6, %c0_7] : memref<16x512xbf16, #tpu.memory_space<vmem>>, vector<16x512xbf16>
    tpu.vector_store %arg4[%c0_6, %c0_7], %8 {strides = array<i32>} : memref<16x512xbf16, #tpu.memory_space<vmem>>, vector<16x512xbf16>,
    return
  }
  func.func @transform_0(%arg0: i32) -> (i32, i32) {
    %c0_i32 = arith.constant 0 : i32
    %c0_i32_0 = arith.constant 0 : i32
    %c0_i32_1 = arith.constant 0 : i32
    return %c0_i32, %c0_i32_0 : i32, i32
  }
  func.func @transform_1(%arg0: i32) -> (i32, i32) {
    %c0_i32 = arith.constant 0 : i32
    %c0_i32_0 = arith.constant 0 : i32
    return %c0_i32, %arg0 : i32, i32
  }
  func.func @transform_2(%arg0: i32) -> (i32, i32) {
    %c0_i32 = arith.constant 0 : i32
    %c0_i32_0 = arith.constant 0 : i32
    %c0_i32_1 = arith.constant 0 : i32
    return %c0_i32, %c0_i32_0 : i32, i32
  }
  func.func @transform_3(%arg0: i32) -> (i32, i32) {
    %c0_i32 = arith.constant 0 : i32
    %c0_i32_0 = arith.constant 0 : i32
    return %c0_i32, %arg0 : i32, i32
  }
}

module attributes {stable_mosaic.version = 11 : i64} {
  func.func @_conv_mm_kernel(%arg0: i32, %arg1: memref<32x256xbf16, #tpu.memory_space<vmem>>, %arg2: memref<256x162xbf16, #tpu.memory_space<vmem>>, %arg3: memref<32x1xf32, #tpu.memory_space<vmem>>, %arg4: memref<32x162xbf16, #tpu.memory_space<vmem>>) attributes {dimension_semantics = [#tpu.dimension_semantics<parallel>], iteration_bounds = array<i64: 1>, scalar_prefetch = 0 : i64, scratch_operands = 0 : i64, tpu.core_type = #tpu.core_type<tc>, window_params = [{pipeline_mode = #tpu.pipeline_mode<synchronous>, transform_indices = @transform_0, window_bounds = array<i64: 32, 256>}, {transform_indices = @transform_1, window_bounds = array<i64: 256, 162>}, {pipeline_mode = #tpu.pipeline_mode<synchronous>, transform_indices = @transform_2, window_bounds = array<i64: 32, 1>}, {transform_indices = @transform_3, window_bounds = array<i64: 32, 162>}]} {
    %c0 = arith.constant 0 : index
    %c0_0 = arith.constant 0 : index
    %0 = vector.load %arg1[%c0, %c0_0] : memref<32x256xbf16, #tpu.memory_space<vmem>>, vector<32x256xbf16>
    %c0_1 = arith.constant 0 : index
    %c0_2 = arith.constant 0 : index
    %1 = vector.load %arg2[%c0_1, %c0_2] : memref<256x162xbf16, #tpu.memory_space<vmem>>, vector<256x162xbf16>
    %cst = arith.constant dense<0.000000e+00> : vector<32x162xf32>
    %2 = tpu.matmul %0, %1, %cst {dimension_numbers = #tpu.dot_dimension_numbers<[1], [0], [0], [1], [0, 0, 1, 1], [], []>} : vector<32x256xbf16>, vector<256x162xbf16>, vector<32x162xf32> -> vector<32x162xf32>
    %c0_3 = arith.constant 0 : index
    %c0_4 = arith.constant 0 : index
    %3 = vector.load %arg3[%c0_3, %c0_4] : memref<32x1xf32, #tpu.memory_space<vmem>>, vector<32x1xf32>
    %4 = vector.broadcast %3 : vector<32x1xf32> to vector<32x162xf32>
    %5 = arith.addf %2, %4 : vector<32x162xf32>
    %cst_5 = arith.constant 0.000000e+00 : f32
    %6 = vector.broadcast %cst_5 : f32 to vector<32x162xf32>
    %7 = arith.maximumf %5, %6 : vector<32x162xf32>
    %8 = arith.truncf %7 : vector<32x162xf32> to vector<32x162xbf16>
    %c0_6 = arith.constant 0 : index
    %c0_7 = arith.constant 0 : index
    %9 = vector.load %arg4[%c0_6, %c0_7] : memref<32x162xbf16, #tpu.memory_space<vmem>>, vector<32x162xbf16>
    tpu.vector_store %arg4[%c0_6, %c0_7], %8 {strides = array<i32>} : memref<32x162xbf16, #tpu.memory_space<vmem>>, vector<32x162xbf16>,
    return
  }
  func.func @transform_0(%arg0: i32) -> (i32, i32) {
    %c0_i32 = arith.constant 0 : i32
    %c0_i32_0 = arith.constant 0 : i32
    %c0_i32_1 = arith.constant 0 : i32
    return %c0_i32, %c0_i32_0 : i32, i32
  }
  func.func @transform_1(%arg0: i32) -> (i32, i32) {
    %c0_i32 = arith.constant 0 : i32
    %c0_i32_0 = arith.constant 0 : i32
    return %c0_i32, %arg0 : i32, i32
  }
  func.func @transform_2(%arg0: i32) -> (i32, i32) {
    %c0_i32 = arith.constant 0 : i32
    %c0_i32_0 = arith.constant 0 : i32
    %c0_i32_1 = arith.constant 0 : i32
    return %c0_i32, %c0_i32_0 : i32, i32
  }
  func.func @transform_3(%arg0: i32) -> (i32, i32) {
    %c0_i32 = arith.constant 0 : i32
    %c0_i32_0 = arith.constant 0 : i32
    return %c0_i32, %arg0 : i32, i32
  }
}

module attributes {stable_mosaic.version = 11 : i64} {
  func.func @_fc_fused_kernel(%arg0: i32, %arg1: memref<2x2592xbf16, #tpu.memory_space<vmem>>, %arg2: memref<2592x256xbf16, #tpu.memory_space<vmem>>, %arg3: memref<1x256xf32, #tpu.memory_space<vmem>>, %arg4: memref<256x32xbf16, #tpu.memory_space<vmem>>, %arg5: memref<1x32xf32, #tpu.memory_space<vmem>>, %arg6: memref<2x32xf32, #tpu.memory_space<vmem>>) attributes {dimension_semantics = [#tpu.dimension_semantics<arbitrary>], iteration_bounds = array<i64: 1>, scalar_prefetch = 0 : i64, scratch_operands = 0 : i64, tpu.core_type = #tpu.core_type<tc>, window_params = [{pipeline_mode = #tpu.pipeline_mode<synchronous>, transform_indices = @transform_0, window_bounds = array<i64: 2, 2592>}, {pipeline_mode = #tpu.pipeline_mode<synchronous>, transform_indices = @transform_1, window_bounds = array<i64: 2592, 256>}, {pipeline_mode = #tpu.pipeline_mode<synchronous>, transform_indices = @transform_2, window_bounds = array<i64: 1, 256>}, {pipeline_mode = #tpu.pipeline_mode<synchronous>, transform_indices = @transform_3, window_bounds = array<i64: 256, 32>}, {pipeline_mode = #tpu.pipeline_mode<synchronous>, transform_indices = @transform_4, window_bounds = array<i64: 1, 32>}, {pipeline_mode = #tpu.pipeline_mode<synchronous>, transform_indices = @transform_5, window_bounds = array<i64: 2, 32>}]} {
    %c0 = arith.constant 0 : index
    %c0_0 = arith.constant 0 : index
    %0 = vector.load %arg1[%c0, %c0_0] : memref<2x2592xbf16, #tpu.memory_space<vmem>>, vector<2x2592xbf16>
    %c0_1 = arith.constant 0 : index
    %c0_2 = arith.constant 0 : index
    %1 = vector.load %arg2[%c0_1, %c0_2] : memref<2592x256xbf16, #tpu.memory_space<vmem>>, vector<2592x256xbf16>
    %cst = arith.constant dense<0.000000e+00> : vector<2x256xf32>
    %2 = tpu.matmul %0, %1, %cst {dimension_numbers = #tpu.dot_dimension_numbers<[1], [0], [0], [1], [0, 0, 1, 1], [], []>} : vector<2x2592xbf16>, vector<2592x256xbf16>, vector<2x256xf32> -> vector<2x256xf32>
    %c0_3 = arith.constant 0 : index
    %c0_4 = arith.constant 0 : index
    %3 = vector.load %arg3[%c0_3, %c0_4] : memref<1x256xf32, #tpu.memory_space<vmem>>, vector<1x256xf32>
    %4 = vector.broadcast %3 : vector<1x256xf32> to vector<2x256xf32>
    %5 = arith.addf %2, %4 : vector<2x256xf32>
    %cst_5 = arith.constant 0.000000e+00 : f32
    %6 = vector.broadcast %cst_5 : f32 to vector<2x256xf32>
    %7 = arith.maximumf %5, %6 : vector<2x256xf32>
    %8 = arith.truncf %7 : vector<2x256xf32> to vector<2x256xbf16>
    %c0_6 = arith.constant 0 : index
    %c0_7 = arith.constant 0 : index
    %9 = vector.load %arg4[%c0_6, %c0_7] : memref<256x32xbf16, #tpu.memory_space<vmem>>, vector<256x32xbf16>
    %cst_8 = arith.constant dense<0.000000e+00> : vector<2x32xf32>
    %10 = tpu.matmul %8, %9, %cst_8 {dimension_numbers = #tpu.dot_dimension_numbers<[1], [0], [0], [1], [0, 0, 1, 1], [], []>} : vector<2x256xbf16>, vector<256x32xbf16>, vector<2x32xf32> -> vector<2x32xf32>
    %c0_9 = arith.constant 0 : index
    %c0_10 = arith.constant 0 : index
    %11 = vector.load %arg5[%c0_9, %c0_10] : memref<1x32xf32, #tpu.memory_space<vmem>>, vector<1x32xf32>
    %12 = vector.broadcast %11 : vector<1x32xf32> to vector<2x32xf32>
    %13 = arith.addf %10, %12 : vector<2x32xf32>
    %c0_11 = arith.constant 0 : index
    %c0_12 = arith.constant 0 : index
    %14 = vector.load %arg6[%c0_11, %c0_12] : memref<2x32xf32, #tpu.memory_space<vmem>>, vector<2x32xf32>
    tpu.vector_store %arg6[%c0_11, %c0_12], %13 {strides = array<i32>} : memref<2x32xf32, #tpu.memory_space<vmem>>, vector<2x32xf32>,
    return
  }
  func.func @transform_0(%arg0: i32) -> (i32, i32) {
    %c0_i32 = arith.constant 0 : i32
    %c0_i32_0 = arith.constant 0 : i32
    %c0_i32_1 = arith.constant 0 : i32
    return %c0_i32, %c0_i32_0 : i32, i32
  }
  func.func @transform_1(%arg0: i32) -> (i32, i32) {
    %c0_i32 = arith.constant 0 : i32
    %c0_i32_0 = arith.constant 0 : i32
    %c0_i32_1 = arith.constant 0 : i32
    return %c0_i32, %c0_i32_0 : i32, i32
  }
  func.func @transform_2(%arg0: i32) -> (i32, i32) {
    %c0_i32 = arith.constant 0 : i32
    %c0_i32_0 = arith.constant 0 : i32
    %c0_i32_1 = arith.constant 0 : i32
    return %c0_i32, %c0_i32_0 : i32, i32
  }
  func.func @transform_3(%arg0: i32) -> (i32, i32) {
    %c0_i32 = arith.constant 0 : i32
    %c0_i32_0 = arith.constant 0 : i32
    %c0_i32_1 = arith.constant 0 : i32
    return %c0_i32, %c0_i32_0 : i32, i32
  }
  func.func @transform_4(%arg0: i32) -> (i32, i32) {
    %c0_i32 = arith.constant 0 : i32
    %c0_i32_0 = arith.constant 0 : i32
    %c0_i32_1 = arith.constant 0 : i32
    return %c0_i32, %c0_i32_0 : i32, i32
  }
  func.func @transform_5(%arg0: i32) -> (i32, i32) {
    %c0_i32 = arith.constant 0 : i32
    %c0_i32_0 = arith.constant 0 : i32
    %c0_i32_1 = arith.constant 0 : i32
    return %c0_i32, %c0_i32_0 : i32, i32
  }
}

</mosaic_0001>

<bundles_post_ra>
// kernel: simple_cnn_forward.3
= control target key start
LH: loop header
LB: loop body
LE: loop exit
PB: predicated region body
PF: predicated region fallthrough
CT: control target
= control target key end

     0   :  { %s2378_s12 = smov 0   ;;  %s2380_s13 = smov 0   ;;  %s3374_s0 = inlined_call_operand.vmem [shape: bf16[16,256], index: 0, kind: input, shape index: {}]   ;;  %s3375_s1 = inlined_call_operand.vmem [shape: bf16[256,800], index: 1, kind: input, shape index: {}]   ;;  %s3376_s2 = inlined_call_operand.vmem [shape: f32[16,1], index: 2, kind: input, shape index: {}]   ;;  %s3377_s3 = inlined_call_operand.vmem [shape: bf16[16,800], index: 3, kind: output, shape index: {}]  }
   0x1   :  { %s2382_s14 = smov 0  }
   0x2 LB: > { %s2394_s15 = sadd.s32 4294967295, %s2255_s14   ;;  %s2397_s16 = sadd.s32 1, %s2255_s14   ;;  %s2255_s14 = sphi %s2382_s14, %s3401_s14   ;;  %s2251_s13 = sphi %s2380_s13, %s3400_s13   ;;  %s2247_s12 = sphi %s2378_s12, %s3399_s12  }
   0x3   : > { %s38_s17 = ssub.s32 %s2255_s14, %s2397_s16  ;;  %s41_s18 = sadd.s32 1, %s2251_s13 }
   0x4   : > { %p39_p0 = scmp.eq.s32.totalorder %s38_s17, 0  ;;  %p48_p1 = scmp.ne.s32.totalorder %s2251_s13, %s2247_s12 }
   0x5   : > { %p49_p2 = scmp.eq.s32.totalorder %s2255_s14, 0  ;;  %p99_p3 = scmp.eq.s32.totalorder %s2394_s15, 1 }
   0x6   : > { %s2407_s19 = scalar_select %p39_p0, %s2251_s13, %s41_s18  }
   0x7   : > { %p50_p4 = por %p49_p2, %p48_p1  ;;  %p2409_p5 = por %p99_p3, %p48_p1 }
   0x8   : > { %p1527_p6 = scmp.ge.s32.totalorder %s2255_s14, 2 }
   0xa   : > { %127 = sbr.rel (%p1527_p6) target bundleno = 196 (0xc4), region = 24 }
   0xf   : > { %130 = sbr.rel (!%p50_p4) target bundleno = 196 (0xc4), region = 28  ;;  %s132_s21 = sand.u32 (%p50_p4), 1, %s2251_s13  }
  0x10   : > { %s1529_s22 = sshll.u32 (%p50_p4), %s2255_s14, 2  ;;  %s1528_s23 = sshll.u32 (%p50_p4), %s132_s21, 9 }
  0x11   : > { %s136_s24 = ssub.s32 (%p50_p4), 7, %s1529_s22  ;;  %s1843_s25 = sshll.u32 (%p50_p4), %s2255_s14, 4 }
  0x12   : > { %p137_p7 = scmp.lt.s32.totalorder (%p50_p4), %s136_s24, 4  ;;  %s2420_s28 = scalar_lea.vmem (%p50_p4), %s3375_s1, %s1843_s25  }
  0x13   : > { %s2424_s4 = scalar_lea.vmem (%p50_p4), [#allocation2], %s1528_s23  }
  0x14   : > { %s3403_s24 = smov (!%p137_p7, %s136_s24), 4 }
  0x15   : > { %s1530_s29 = sshll.u32 %s3403_s24, 7  ;;  %s2422_s30 = sshll.u32 %s3403_s24, 2 }
  0x16   : > { %p1534_p8 = scmp.eq.s32.totalorder %s1530_s29, 0 }
  0x17   : > { %p147_p9 = scmp.lt.u32.totalorder (!%p1534_p8), %s2422_s30, 8 }
  0x18   : > { %146 = sbr.rel (%p1534_p8) target bundleno = 196 (0xc4), region = 32 }
  0x1d   : > { %150 = sbr.rel (%p147_p9) target bundleno = 156 (0x9c), region = 36  ;;  %s2428_s5 = sand.u32 (!%p147_p9), 7, %s2422_s30  }
  0x1e   : > { %p229_p10 = scmp.eq.s32.totalorder (!%p147_p9), %s2428_s5, 0  ;;  %p1535_p11 = scmp.ne.s32.totalorder (!%p147_p9), %s2428_s5, 0 }
  0x22   : > { %232 = sbr.rel (%p1535_p11) target bundleno = 77 (0x4d), region = 51  ;;  %s2433_s6 = sshrl.u32 (!%p1535_p11), %s2422_s30, 3 }
  0x23   : > { %p1536_p12 = scmp.le.s32.totalorder (!%p1535_p11), %s2433_s6, 0 }
  0x27   : > { %1425 = sbr.rel (%p1536_p12) target bundleno = 77 (0x4d), region = 207  ;;  %s3379_s7 = smov (!%p1536_p12), %s2424_s4 }
  0x28   : > { %s3380_s8 = smov (!%p1536_p12), %s2420_s28  ;;  %s2442_s9 = smov (!%p1536_p12), 0  }
  0x29   : > { %s2444_s10 = smov (!%p1536_p12), 0  }
  0x2c LB: >> { %v243_v0 = vld [vmem:[%s2263_s8] sm:$0xff]  ;;  %v247_v2 = vld [vmem:[%s2263_s8 + $0x38] sm:$0xff]  ;;  %s307_s11 = sadd.s32 1, %s2267_s9  ;;  %v251_v4 = vld [vmem:[%s2263_s8 + $0x70] sm:$0xff]  ;;  %s237_s10 = sadd.s32 1, %s2271_s10   ;;  %s2271_s10 = sphi %s2444_s10, %s237_s10   ;;  %s2267_s9 = sphi %s2442_s9, %s3383_s9   ;;  %s2263_s8 = sphi %s3380_s8, %s3382_s8   ;;  %s2259_s7 = sphi %s3379_s7, %s3381_s7  }
  0x2d   : >> { %v245_v1 = vld [vmem:[%s2263_s8 + $0x1c] sm:$0xff]  ;;  %244 = vst [vmem:[%s2259_s7] sm:$0xff] %v243_v0  ;;  %v249_v3 = vld [vmem:[%s2263_s8 + $0x54] sm:$0xff]  ;;  %p308_p13 = scmp.ge.s32.totalorder %s307_s11, %s2433_s6  ;;  %v253_v5 = vld [vmem:[%s2263_s8 + $0x8c] sm:$0xff]  ;;  %p236_p0 = scmp.ge.s32.totalorder %s237_s10, %s2433_s6 }
  0x2e   : >> { %246 = vst [vmem:[%s2259_s7 + $0x10] sm:$0xff] %v245_v1  ;;  %v255_v6 = vld [vmem:[%s2263_s8 + $0xa8] sm:$0xff]  ;;  %v259_v8 = vld [vmem:[%s2263_s8 + $0xe0] sm:$0xff]  ;;  %v263_v10 = vld [vmem:[%s2263_s8 + $0x118] sm:$0xff] }
  0x2f   : >> { %248 = vst [vmem:[%s2259_s7 + $0x20] sm:$0xff] %v247_v2  ;;  %s3405_s11 = smov (%p308_p13, %s307_s11), 0  ;;  %v257_v7 = vld [vmem:[%s2263_s8 + $0xc4] sm:$0xff]  ;;  %v261_v9 = vld [vmem:[%s2263_s8 + $0xfc] sm:$0xff]  ;;  %v265_v11 = vld [vmem:[%s2263_s8 + $0x134] sm:$0xff] }
  0x30   : >> { %250 = vst [vmem:[%s2259_s7 + $0x30] sm:$0xff] %v249_v3  ;;  %s1537_s17 = sshll.u32 %s3405_s11, 3  ;;  %v267_v12 = vld [vmem:[%s2263_s8 + $0x150] sm:$0xff]  ;;  %v271_v14 = vld [vmem:[%s2263_s8 + $0x188] sm:$0xff]  ;;  %v275_v16 = vld [vmem:[%s2263_s8 + $0x1c0] sm:$0xff]  ;;  %s3383_s9 = smov %s3405_s11 }
  0x31   : >> { %252 = vst [vmem:[%s2259_s7 + $0x40] sm:$0xff] %v251_v4  ;;  %s2476_s18 = scalar_lea.vmem %s2420_s28, %s1537_s17   ;;  %s2479_s21 = scalar_lea.vmem %s2424_s4, %s1537_s17 [#allocation2]   ;;  %v269_v13 = vld [vmem:[%s2263_s8 + $0x16c] sm:$0xff]  ;;  %v273_v15 = vld [vmem:[%s2263_s8 + $0x1a4] sm:$0xff]  ;;  %v277_v17 = vld [vmem:[%s2263_s8 + $0x1dc] sm:$0xff] }
  0x32   : >> { %254 = vst [vmem:[%s2259_s7 + $0x50] sm:$0xff] %v253_v5  ;;  %v279_v18 = vld [vmem:[%s2263_s8 + $0x1f8] sm:$0xff]  ;;  %v283_v20 = vld [vmem:[%s2263_s8 + $0x230] sm:$0xff]  ;;  %v287_v22 = vld [vmem:[%s2263_s8 + $0x268] sm:$0xff] }
  0x33   : >> { %256 = vst [vmem:[%s2259_s7 + $0x60] sm:$0xff] %v255_v6  ;;  %v281_v19 = vld [vmem:[%s2263_s8 + $0x214] sm:$0xff]  ;;  %v285_v21 = vld [vmem:[%s2263_s8 + $0x24c] sm:$0xff]  ;;  %v289_v23 = vld [vmem:[%s2263_s8 + $0x284] sm:$0xff] }
  0x34   : >> { %258 = vst [vmem:[%s2259_s7 + $0x70] sm:$0xff] %v257_v7  ;;  %v291_v24 = vld [vmem:[%s2263_s8 + $0x2a0] sm:$0xff]  ;;  %v295_v26 = vld [vmem:[%s2263_s8 + $0x2d8] sm:$0xff]  ;;  %v299_v28 = vld [vmem:[%s2263_s8 + $0x310] sm:$0xff] }
  0x35   : >> { %260 = vst [vmem:[%s2259_s7 + $0x80] sm:$0xff] %v259_v8  ;;  %v293_v25 = vld [vmem:[%s2263_s8 + $0x2bc] sm:$0xff]  ;;  %v297_v27 = vld [vmem:[%s2263_s8 + $0x2f4] sm:$0xff]  ;;  %v301_v29 = vld [vmem:[%s2263_s8 + $0x32c] sm:$0xff] }
  0x36   : >> { %262 = vst [vmem:[%s2259_s7 + $0x90] sm:$0xff] %v261_v9  ;;  %v303_v30 = vld [vmem:[%s2263_s8 + $0x348] sm:$0xff] }
  0x37   : >> { %264 = vst [vmem:[%s2259_s7 + $0xa0] sm:$0xff] %v263_v10  ;;  %v305_v31 = vld [vmem:[%s2263_s8 + $0x364] sm:$0xff]  ;;  %s3382_s8 = smov %s2476_s18 }
  0x38   : >> { %266 = vst [vmem:[%s2259_s7 + $0xb0] sm:$0xff] %v265_v11 }
  0x39   : >> { %268 = vst [vmem:[%s2259_s7 + $0xc0] sm:$0xff] %v267_v12 }
  0x3a   : >> { %270 = vst [vmem:[%s2259_s7 + $0xd0] sm:$0xff] %v269_v13 }
  0x3b   : >> { %272 = vst [vmem:[%s2259_s7 + $0xe0] sm:$0xff] %v271_v14 }
  0x3c   : >> { %274 = vst [vmem:[%s2259_s7 + $0xf0] sm:$0xff] %v273_v15 }
  0x3d   : >> { %276 = vst [vmem:[%s2259_s7 + $0x100] sm:$0xff] %v275_v16 }
  0x3e   : >> { %278 = vst [vmem:[%s2259_s7 + $0x110] sm:$0xff] %v277_v17 }
  0x3f   : >> { %280 = vst [vmem:[%s2259_s7 + $0x120] sm:$0xff] %v279_v18 }
  0x40   : >> { %282 = vst [vmem:[%s2259_s7 + $0x130] sm:$0xff] %v281_v19 }
  0x41   : >> { %284 = vst [vmem:[%s2259_s7 + $0x140] sm:$0xff] %v283_v20 }
  0x42   : >> { %286 = vst [vmem:[%s2259_s7 + $0x150] sm:$0xff] %v285_v21 }
  0x43   : >> { %288 = vst [vmem:[%s2259_s7 + $0x160] sm:$0xff] %v287_v22 }
  0x44   : >> { %290 = vst [vmem:[%s2259_s7 + $0x170] sm:$0xff] %v289_v23 }
  0x45   : >> { %292 = vst [vmem:[%s2259_s7 + $0x180] sm:$0xff] %v291_v24 }
  0x46   : >> { %294 = vst [vmem:[%s2259_s7 + $0x190] sm:$0xff] %v293_v25 }
  0x47   : >> { %296 = vst [vmem:[%s2259_s7 + $0x1a0] sm:$0xff] %v295_v26 }
  0x48   : >> { %298 = vst [vmem:[%s2259_s7 + $0x1b0] sm:$0xff] %v297_v27  ;;  %239 = sbr.rel (!%p236_p0) target bundleno = 44 (0x2c), region = 213 }
  0x49   : >> { %300 = vst [vmem:[%s2259_s7 + $0x1c0] sm:$0xff] %v299_v28 }
  0x4a   : >> { %302 = vst [vmem:[%s2259_s7 + $0x1d0] sm:$0xff] %v301_v29 }
  0x4b   : >> { %304 = vst [vmem:[%s2259_s7 + $0x1e0] sm:$0xff] %v303_v30 }
  0x4c   : >> { %306 = vst [vmem:[%s2259_s7 + $0x1f0] sm:$0xff] %v305_v31  ;;  %s3381_s7 = smov %s2479_s21 }
  0x4d PF: > { %316 = sbr.rel (%p229_p10) target bundleno = 156 (0x9c), region = 62  ;;  %s318_s22 = ssub.s32 (!%p229_p10), %s2422_s30, %s2428_s5 }
  0x4e   : > { %s2548_s23 = sshrl.u32 (!%p229_p10), %s2422_s30, 3  ;;  %s2551_s24 = scalar_lea.vmem (!%p229_p10), %s2420_s28, %s318_s22 }
  0x4f   : > { %s2554_s25 = scalar_lea.vmem (!%p229_p10), %s2424_s4, %s318_s22 [#allocation2]  ;;  %p1539_p1 = scmp.le.s32.totalorder (!%p229_p10), %s2548_s23, 0 }
  0x52   : > { %1439 = sbr.rel (%p1539_p1) target bundleno = 120 (0x78), region = 218  ;;  %s3384_s26 = smov (!%p1539_p1), %s2424_s4 }
  0x53   : > { %s3385_s27 = smov (!%p1539_p1), %s2420_s28  ;;  %s2563_s29 = smov (!%p1539_p1), 0  }
  0x54   : > { %s2565_s6 = smov (!%p1539_p1), 0  }
  0x57 LB: >> { %v332_v32 = vld [vmem:[%s2279_s27] sm:$0xff]  ;;  %v336_v34 = vld [vmem:[%s2279_s27 + $0x38] sm:$0xff]  ;;  %s396_s7 = sadd.s32 1, %s2283_s29  ;;  %v340_v36 = vld [vmem:[%s2279_s27 + $0x70] sm:$0xff]  ;;  %s326_s6 = sadd.s32 1, %s2287_s6   ;;  %s2287_s6 = sphi %s2565_s6, %s326_s6   ;;  %s2283_s29 = sphi %s2563_s29, %s3388_s29   ;;  %s2279_s27 = sphi %s3385_s27, %s3387_s27   ;;  %s2275_s26 = sphi %s3384_s26, %s3386_s26  }
  0x58   : >> { %v334_v33 = vld [vmem:[%s2279_s27 + $0x1c] sm:$0xff]  ;;  %333 = vst [vmem:[%s2275_s26] sm:$0xff] %v332_v32  ;;  %v338_v35 = vld [vmem:[%s2279_s27 + $0x54] sm:$0xff]  ;;  %p397_p2 = scmp.ge.s32.totalorder %s396_s7, %s2548_s23  ;;  %v342_v37 = vld [vmem:[%s2279_s27 + $0x8c] sm:$0xff]  ;;  %p325_p3 = scmp.ge.s32.totalorder %s326_s6, %s2548_s23 }
  0x59   : >> { %335 = vst [vmem:[%s2275_s26 + $0x10] sm:$0xff] %v334_v33  ;;  %v344_v38 = vld [vmem:[%s2279_s27 + $0xa8] sm:$0xff]  ;;  %v348_v40 = vld [vmem:[%s2279_s27 + $0xe0] sm:$0xff]  ;;  %v352_v42 = vld [vmem:[%s2279_s27 + $0x118] sm:$0xff] }
  0x5a   : >> { %337 = vst [vmem:[%s2275_s26 + $0x20] sm:$0xff] %v336_v34  ;;  %s3407_s7 = smov (%p397_p2, %s396_s7), 0  ;;  %v346_v39 = vld [vmem:[%s2279_s27 + $0xc4] sm:$0xff]  ;;  %v350_v41 = vld [vmem:[%s2279_s27 + $0xfc] sm:$0xff]  ;;  %v354_v43 = vld [vmem:[%s2279_s27 + $0x134] sm:$0xff] }
  0x5b   : >> { %339 = vst [vmem:[%s2275_s26 + $0x30] sm:$0xff] %v338_v35  ;;  %s1540_s8 = sshll.u32 %s3407_s7, 3  ;;  %v356_v44 = vld [vmem:[%s2279_s27 + $0x150] sm:$0xff]  ;;  %v360_v46 = vld [vmem:[%s2279_s27 + $0x188] sm:$0xff]  ;;  %v364_v48 = vld [vmem:[%s2279_s27 + $0x1c0] sm:$0xff]  ;;  %s3388_s29 = smov %s3407_s7 }
  0x5c   : >> { %341 = vst [vmem:[%s2275_s26 + $0x40] sm:$0xff] %v340_v36  ;;  %s2597_s9 = scalar_lea.vmem %s2420_s28, %s1540_s8   ;;  %s2600_s10 = scalar_lea.vmem %s2424_s4, %s1540_s8 [#allocation2]   ;;  %v358_v45 = vld [vmem:[%s2279_s27 + $0x16c] sm:$0xff]  ;;  %v362_v47 = vld [vmem:[%s2279_s27 + $0x1a4] sm:$0xff]  ;;  %v366_v49 = vld [vmem:[%s2279_s27 + $0x1dc] sm:$0xff] }
  0x5d   : >> { %343 = vst [vmem:[%s2275_s26 + $0x50] sm:$0xff] %v342_v37  ;;  %v368_v50 = vld [vmem:[%s2279_s27 + $0x1f8] sm:$0xff]  ;;  %v372_v52 = vld [vmem:[%s2279_s27 + $0x230] sm:$0xff]  ;;  %v376_v54 = vld [vmem:[%s2279_s27 + $0x268] sm:$0xff] }
  0x5e   : >> { %345 = vst [vmem:[%s2275_s26 + $0x60] sm:$0xff] %v344_v38  ;;  %v370_v51 = vld [vmem:[%s2279_s27 + $0x214] sm:$0xff]  ;;  %v374_v53 = vld [vmem:[%s2279_s27 + $0x24c] sm:$0xff]  ;;  %v378_v55 = vld [vmem:[%s2279_s27 + $0x284] sm:$0xff] }
  0x5f   : >> { %347 = vst [vmem:[%s2275_s26 + $0x70] sm:$0xff] %v346_v39  ;;  %v380_v56 = vld [vmem:[%s2279_s27 + $0x2a0] sm:$0xff]  ;;  %v384_v58 = vld [vmem:[%s2279_s27 + $0x2d8] sm:$0xff]  ;;  %v388_v60 = vld [vmem:[%s2279_s27 + $0x310] sm:$0xff] }
  0x60   : >> { %349 = vst [vmem:[%s2275_s26 + $0x80] sm:$0xff] %v348_v40  ;;  %v382_v57 = vld [vmem:[%s2279_s27 + $0x2bc] sm:$0xff]  ;;  %v386_v59 = vld [vmem:[%s2279_s27 + $0x2f4] sm:$0xff]  ;;  %v390_v61 = vld [vmem:[%s2279_s27 + $0x32c] sm:$0xff] }
  0x61   : >> { %351 = vst [vmem:[%s2275_s26 + $0x90] sm:$0xff] %v350_v41  ;;  %v392_v62 = vld [vmem:[%s2279_s27 + $0x348] sm:$0xff] }
  0x62   : >> { %353 = vst [vmem:[%s2275_s26 + $0xa0] sm:$0xff] %v352_v42  ;;  %v394_v63 = vld [vmem:[%s2279_s27 + $0x364] sm:$0xff]  ;;  %s3387_s27 = smov %s2597_s9 }
  0x63   : >> { %355 = vst [vmem:[%s2275_s26 + $0xb0] sm:$0xff] %v354_v43 }
  0x64   : >> { %357 = vst [vmem:[%s2275_s26 + $0xc0] sm:$0xff] %v356_v44 }
  0x65   : >> { %359 = vst [vmem:[%s2275_s26 + $0xd0] sm:$0xff] %v358_v45 }
  0x66   : >> { %361 = vst [vmem:[%s2275_s26 + $0xe0] sm:$0xff] %v360_v46 }
  0x67   : >> { %363 = vst [vmem:[%s2275_s26 + $0xf0] sm:$0xff] %v362_v47 }
  0x68   : >> { %365 = vst [vmem:[%s2275_s26 + $0x100] sm:$0xff] %v364_v48 }
  0x69   : >> { %367 = vst [vmem:[%s2275_s26 + $0x110] sm:$0xff] %v366_v49 }
  0x6a   : >> { %369 = vst [vmem:[%s2275_s26 + $0x120] sm:$0xff] %v368_v50 }
  0x6b   : >> { %371 = vst [vmem:[%s2275_s26 + $0x130] sm:$0xff] %v370_v51 }
  0x6c   : >> { %373 = vst [vmem:[%s2275_s26 + $0x140] sm:$0xff] %v372_v52 }
  0x6d   : >> { %375 = vst [vmem:[%s2275_s26 + $0x150] sm:$0xff] %v374_v53 }
  0x6e   : >> { %377 = vst [vmem:[%s2275_s26 + $0x160] sm:$0xff] %v376_v54 }
  0x6f   : >> { %379 = vst [vmem:[%s2275_s26 + $0x170] sm:$0xff] %v378_v55 }
  0x70   : >> { %381 = vst [vmem:[%s2275_s26 + $0x180] sm:$0xff] %v380_v56 }
  0x71   : >> { %383 = vst [vmem:[%s2275_s26 + $0x190] sm:$0xff] %v382_v57 }
  0x72   : >> { %385 = vst [vmem:[%s2275_s26 + $0x1a0] sm:$0xff] %v384_v58 }
  0x73   : >> { %387 = vst [vmem:[%s2275_s26 + $0x1b0] sm:$0xff] %v386_v59  ;;  %328 = sbr.rel (!%p325_p3) target bundleno = 87 (0x57), region = 224 }
  0x74   : >> { %389 = vst [vmem:[%s2275_s26 + $0x1c0] sm:$0xff] %v388_v60 }
  0x75   : >> { %391 = vst [vmem:[%s2275_s26 + $0x1d0] sm:$0xff] %v390_v61 }
  0x76   : >> { %393 = vst [vmem:[%s2275_s26 + $0x1e0] sm:$0xff] %v392_v62 }
  0x77   : >> { %395 = vst [vmem:[%s2275_s26 + $0x1f0] sm:$0xff] %v394_v63  ;;  %s3386_s26 = smov %s2600_s10 }
  0x78 PF: > { %s2353_s11 = smov 1  }
  0x79   : > { %s403_s17 = sshll.u32 %s2353_s11, %s2428_s5 }
  0x7a   : > { %s2665_s18 = sadd.s32 4294967295, %s403_s17 }
  0x7b   : > { %v413_v0 = vld [vmem:[%s2551_s24] sm:%s2665_s18]  ;;  %v417_v2 = vld [vmem:[%s2551_s24 + $0x38] sm:%s2665_s18] }
  0x7c   : > { %v415_v1 = vld [vmem:[%s2551_s24 + $0x1c] sm:%s2665_s18]  ;;  %414 = vst [vmem:[%s2554_s25] sm:%s2665_s18] %v413_v0 }
  0x7d   : > { %416 = vst [vmem:[%s2554_s25 + $0x10] sm:%s2665_s18] %v415_v1  ;;  %v419_v3 = vld [vmem:[%s2551_s24 + $0x54] sm:%s2665_s18] }
  0x7e   : > { %418 = vst [vmem:[%s2554_s25 + $0x20] sm:%s2665_s18] %v417_v2  ;;  %v421_v4 = vld [vmem:[%s2551_s24 + $0x70] sm:%s2665_s18] }
  0x7f   : > { %420 = vst [vmem:[%s2554_s25 + $0x30] sm:%s2665_s18] %v419_v3  ;;  %v423_v5 = vld [vmem:[%s2551_s24 + $0x8c] sm:%s2665_s18] }
  0x80   : > { %422 = vst [vmem:[%s2554_s25 + $0x40] sm:%s2665_s18] %v421_v4  ;;  %v425_v6 = vld [vmem:[%s2551_s24 + $0xa8] sm:%s2665_s18] }
  0x81   : > { %424 = vst [vmem:[%s2554_s25 + $0x50] sm:%s2665_s18] %v423_v5  ;;  %v427_v7 = vld [vmem:[%s2551_s24 + $0xc4] sm:%s2665_s18] }
  0x82   : > { %426 = vst [vmem:[%s2554_s25 + $0x60] sm:%s2665_s18] %v425_v6  ;;  %v429_v8 = vld [vmem:[%s2551_s24 + $0xe0] sm:%s2665_s18] }
  0x83   : > { %428 = vst [vmem:[%s2554_s25 + $0x70] sm:%s2665_s18] %v427_v7  ;;  %v431_v9 = vld [vmem:[%s2551_s24 + $0xfc] sm:%s2665_s18] }
  0x84   : > { %430 = vst [vmem:[%s2554_s25 + $0x80] sm:%s2665_s18] %v429_v8  ;;  %v433_v10 = vld [vmem:[%s2551_s24 + $0x118] sm:%s2665_s18] }
  0x85   : > { %432 = vst [vmem:[%s2554_s25 + $0x90] sm:%s2665_s18] %v431_v9  ;;  %v435_v11 = vld [vmem:[%s2551_s24 + $0x134] sm:%s2665_s18] }
  0x86   : > { %434 = vst [vmem:[%s2554_s25 + $0xa0] sm:%s2665_s18] %v433_v10  ;;  %v437_v12 = vld [vmem:[%s2551_s24 + $0x150] sm:%s2665_s18] }
  0x87   : > { %436 = vst [vmem:[%s2554_s25 + $0xb0] sm:%s2665_s18] %v435_v11  ;;  %v439_v13 = vld [vmem:[%s2551_s24 + $0x16c] sm:%s2665_s18] }
  0x88   : > { %438 = vst [vmem:[%s2554_s25 + $0xc0] sm:%s2665_s18] %v437_v12  ;;  %v441_v14 = vld [vmem:[%s2551_s24 + $0x188] sm:%s2665_s18] }
  0x89   : > { %440 = vst [vmem:[%s2554_s25 + $0xd0] sm:%s2665_s18] %v439_v13  ;;  %v443_v15 = vld [vmem:[%s2551_s24 + $0x1a4] sm:%s2665_s18] }
  0x8a   : > { %442 = vst [vmem:[%s2554_s25 + $0xe0] sm:%s2665_s18] %v441_v14  ;;  %v445_v16 = vld [vmem:[%s2551_s24 + $0x1c0] sm:%s2665_s18] }
  0x8b   : > { %444 = vst [vmem:[%s2554_s25 + $0xf0] sm:%s2665_s18] %v443_v15  ;;  %v447_v17 = vld [vmem:[%s2551_s24 + $0x1dc] sm:%s2665_s18] }
  0x8c   : > { %446 = vst [vmem:[%s2554_s25 + $0x100] sm:%s2665_s18] %v445_v16  ;;  %v449_v18 = vld [vmem:[%s2551_s24 + $0x1f8] sm:%s2665_s18] }
  0x8d   : > { %448 = vst [vmem:[%s2554_s25 + $0x110] sm:%s2665_s18] %v447_v17  ;;  %v451_v19 = vld [vmem:[%s2551_s24 + $0x214] sm:%s2665_s18] }
  0x8e   : > { %450 = vst [vmem:[%s2554_s25 + $0x120] sm:%s2665_s18] %v449_v18  ;;  %v453_v20 = vld [vmem:[%s2551_s24 + $0x230] sm:%s2665_s18] }
  0x8f   : > { %452 = vst [vmem:[%s2554_s25 + $0x130] sm:%s2665_s18] %v451_v19  ;;  %v455_v21 = vld [vmem:[%s2551_s24 + $0x24c] sm:%s2665_s18] }
  0x90   : > { %454 = vst [vmem:[%s2554_s25 + $0x140] sm:%s2665_s18] %v453_v20  ;;  %v457_v22 = vld [vmem:[%s2551_s24 + $0x268] sm:%s2665_s18] }
  0x91   : > { %456 = vst [vmem:[%s2554_s25 + $0x150] sm:%s2665_s18] %v455_v21  ;;  %v459_v23 = vld [vmem:[%s2551_s24 + $0x284] sm:%s2665_s18] }
  0x92   : > { %458 = vst [vmem:[%s2554_s25 + $0x160] sm:%s2665_s18] %v457_v22  ;;  %v461_v24 = vld [vmem:[%s2551_s24 + $0x2a0] sm:%s2665_s18] }
  0x93   : > { %460 = vst [vmem:[%s2554_s25 + $0x170] sm:%s2665_s18] %v459_v23  ;;  %v463_v25 = vld [vmem:[%s2551_s24 + $0x2bc] sm:%s2665_s18] }
  0x94   : > { %462 = vst [vmem:[%s2554_s25 + $0x180] sm:%s2665_s18] %v461_v24  ;;  %v465_v26 = vld [vmem:[%s2551_s24 + $0x2d8] sm:%s2665_s18] }
  0x95   : > { %464 = vst [vmem:[%s2554_s25 + $0x190] sm:%s2665_s18] %v463_v25  ;;  %v467_v27 = vld [vmem:[%s2551_s24 + $0x2f4] sm:%s2665_s18] }
  0x96   : > { %466 = vst [vmem:[%s2554_s25 + $0x1a0] sm:%s2665_s18] %v465_v26  ;;  %v469_v28 = vld [vmem:[%s2551_s24 + $0x310] sm:%s2665_s18] }
  0x97   : > { %468 = vst [vmem:[%s2554_s25 + $0x1b0] sm:%s2665_s18] %v467_v27  ;;  %v471_v29 = vld [vmem:[%s2551_s24 + $0x32c] sm:%s2665_s18] }
  0x98   : > { %470 = vst [vmem:[%s2554_s25 + $0x1c0] sm:%s2665_s18] %v469_v28  ;;  %v473_v30 = vld [vmem:[%s2551_s24 + $0x348] sm:%s2665_s18] }
  0x99   : > { %472 = vst [vmem:[%s2554_s25 + $0x1d0] sm:%s2665_s18] %v471_v29  ;;  %v475_v31 = vld [vmem:[%s2551_s24 + $0x364] sm:%s2665_s18] }
  0x9a   : > { %474 = vst [vmem:[%s2554_s25 + $0x1e0] sm:%s2665_s18] %v473_v30 }
  0x9b   : > { %476 = vst [vmem:[%s2554_s25 + $0x1f0] sm:%s2665_s18] %v475_v31 }
  0x9c PF: > { %p1543_p4 = scmp.ge.u32.totalorder %s2422_s30, 8 }
  0x9d   : > { %s2354_s5 = smov (!%p1543_p4), 1  }
  0x9e   : > { %153 = sbr.rel (%p1543_p4) target bundleno = 196 (0xc4), region = 40  ;;  %s154_s21 = sshll.u32 (!%p1543_p4), %s2354_s5, %s2422_s30 }
  0x9f   : > { %s2797_s22 = sadd.s32 (!%p1543_p4), 4294967295, %s154_s21 }
  0xa3   : > { %v164_v32 = vld [vmem:[%s2420_s28] sm:%s2797_s22]  ;;  %v168_v34 = vld [vmem:[%s2420_s28 + $0x38] sm:%s2797_s22] }
  0xa4   : > { %v166_v33 = vld [vmem:[%s2420_s28 + $0x1c] sm:%s2797_s22]  ;;  %165 = vst [vmem:[%s2424_s4] sm:%s2797_s22] %v164_v32 }
  0xa5   : > { %167 = vst [vmem:[%s2424_s4 + $0x10] sm:%s2797_s22] %v166_v33  ;;  %v170_v35 = vld [vmem:[%s2420_s28 + $0x54] sm:%s2797_s22] }
  0xa6   : > { %169 = vst [vmem:[%s2424_s4 + $0x20] sm:%s2797_s22] %v168_v34  ;;  %v172_v36 = vld [vmem:[%s2420_s28 + $0x70] sm:%s2797_s22] }
  0xa7   : > { %171 = vst [vmem:[%s2424_s4 + $0x30] sm:%s2797_s22] %v170_v35  ;;  %v174_v37 = vld [vmem:[%s2420_s28 + $0x8c] sm:%s2797_s22] }
  0xa8   : > { %173 = vst [vmem:[%s2424_s4 + $0x40] sm:%s2797_s22] %v172_v36  ;;  %v176_v38 = vld [vmem:[%s2420_s28 + $0xa8] sm:%s2797_s22] }
  0xa9   : > { %175 = vst [vmem:[%s2424_s4 + $0x50] sm:%s2797_s22] %v174_v37  ;;  %v178_v39 = vld [vmem:[%s2420_s28 + $0xc4] sm:%s2797_s22] }
  0xaa   : > { %177 = vst [vmem:[%s2424_s4 + $0x60] sm:%s2797_s22] %v176_v38  ;;  %v180_v40 = vld [vmem:[%s2420_s28 + $0xe0] sm:%s2797_s22] }
  0xab   : > { %179 = vst [vmem:[%s2424_s4 + $0x70] sm:%s2797_s22] %v178_v39  ;;  %v182_v41 = vld [vmem:[%s2420_s28 + $0xfc] sm:%s2797_s22] }
  0xac   : > { %181 = vst [vmem:[%s2424_s4 + $0x80] sm:%s2797_s22] %v180_v40  ;;  %v184_v42 = vld [vmem:[%s2420_s28 + $0x118] sm:%s2797_s22] }
  0xad   : > { %183 = vst [vmem:[%s2424_s4 + $0x90] sm:%s2797_s22] %v182_v41  ;;  %v186_v43 = vld [vmem:[%s2420_s28 + $0x134] sm:%s2797_s22] }
  0xae   : > { %185 = vst [vmem:[%s2424_s4 + $0xa0] sm:%s2797_s22] %v184_v42  ;;  %v188_v44 = vld [vmem:[%s2420_s28 + $0x150] sm:%s2797_s22] }
  0xaf   : > { %187 = vst [vmem:[%s2424_s4 + $0xb0] sm:%s2797_s22] %v186_v43  ;;  %v190_v45 = vld [vmem:[%s2420_s28 + $0x16c] sm:%s2797_s22] }
  0xb0   : > { %189 = vst [vmem:[%s2424_s4 + $0xc0] sm:%s2797_s22] %v188_v44  ;;  %v192_v46 = vld [vmem:[%s2420_s28 + $0x188] sm:%s2797_s22] }
  0xb1   : > { %191 = vst [vmem:[%s2424_s4 + $0xd0] sm:%s2797_s22] %v190_v45  ;;  %v194_v47 = vld [vmem:[%s2420_s28 + $0x1a4] sm:%s2797_s22] }
  0xb2   : > { %193 = vst [vmem:[%s2424_s4 + $0xe0] sm:%s2797_s22] %v192_v46  ;;  %v196_v48 = vld [vmem:[%s2420_s28 + $0x1c0] sm:%s2797_s22] }
  0xb3   : > { %195 = vst [vmem:[%s2424_s4 + $0xf0] sm:%s2797_s22] %v194_v47  ;;  %v198_v49 = vld [vmem:[%s2420_s28 + $0x1dc] sm:%s2797_s22] }
  0xb4   : > { %197 = vst [vmem:[%s2424_s4 + $0x100] sm:%s2797_s22] %v196_v48  ;;  %v200_v50 = vld [vmem:[%s2420_s28 + $0x1f8] sm:%s2797_s22] }
  0xb5   : > { %199 = vst [vmem:[%s2424_s4 + $0x110] sm:%s2797_s22] %v198_v49  ;;  %v202_v51 = vld [vmem:[%s2420_s28 + $0x214] sm:%s2797_s22] }
  0xb6   : > { %201 = vst [vmem:[%s2424_s4 + $0x120] sm:%s2797_s22] %v200_v50  ;;  %v204_v52 = vld [vmem:[%s2420_s28 + $0x230] sm:%s2797_s22] }
  0xb7   : > { %203 = vst [vmem:[%s2424_s4 + $0x130] sm:%s2797_s22] %v202_v51  ;;  %v206_v53 = vld [vmem:[%s2420_s28 + $0x24c] sm:%s2797_s22] }
  0xb8   : > { %205 = vst [vmem:[%s2424_s4 + $0x140] sm:%s2797_s22] %v204_v52  ;;  %v208_v54 = vld [vmem:[%s2420_s28 + $0x268] sm:%s2797_s22] }
  0xb9   : > { %207 = vst [vmem:[%s2424_s4 + $0x150] sm:%s2797_s22] %v206_v53  ;;  %v210_v55 = vld [vmem:[%s2420_s28 + $0x284] sm:%s2797_s22] }
  0xba   : > { %209 = vst [vmem:[%s2424_s4 + $0x160] sm:%s2797_s22] %v208_v54  ;;  %v212_v56 = vld [vmem:[%s2420_s28 + $0x2a0] sm:%s2797_s22] }
  0xbb   : > { %211 = vst [vmem:[%s2424_s4 + $0x170] sm:%s2797_s22] %v210_v55  ;;  %v214_v57 = vld [vmem:[%s2420_s28 + $0x2bc] sm:%s2797_s22] }
  0xbc   : > { %213 = vst [vmem:[%s2424_s4 + $0x180] sm:%s2797_s22] %v212_v56  ;;  %v216_v58 = vld [vmem:[%s2420_s28 + $0x2d8] sm:%s2797_s22] }
  0xbd   : > { %215 = vst [vmem:[%s2424_s4 + $0x190] sm:%s2797_s22] %v214_v57  ;;  %v218_v59 = vld [vmem:[%s2420_s28 + $0x2f4] sm:%s2797_s22] }
  0xbe   : > { %217 = vst [vmem:[%s2424_s4 + $0x1a0] sm:%s2797_s22] %v216_v58  ;;  %v220_v60 = vld [vmem:[%s2420_s28 + $0x310] sm:%s2797_s22] }
  0xbf   : > { %219 = vst [vmem:[%s2424_s4 + $0x1b0] sm:%s2797_s22] %v218_v59  ;;  %v222_v61 = vld [vmem:[%s2420_s28 + $0x32c] sm:%s2797_s22] }
  0xc0   : > { %221 = vst [vmem:[%s2424_s4 + $0x1c0] sm:%s2797_s22] %v220_v60  ;;  %v224_v62 = vld [vmem:[%s2420_s28 + $0x348] sm:%s2797_s22] }
  0xc1   : > { %223 = vst [vmem:[%s2424_s4 + $0x1d0] sm:%s2797_s22] %v222_v61  ;;  %v226_v63 = vld [vmem:[%s2420_s28 + $0x364] sm:%s2797_s22] }
  0xc2   : > { %225 = vst [vmem:[%s2424_s4 + $0x1e0] sm:%s2797_s22] %v224_v62 }
  0xc3   : > { %227 = vst [vmem:[%s2424_s4 + $0x1f0] sm:%s2797_s22] %v226_v63 }
  0xc4 PF: > { %p1545_p6 = scmp.ge.s32.totalorder %s2255_s14, 1  ;;  %p479_p7 = scmp.lt.s32.totalorder %s2255_s14, 3 }
  0xc6   : > { %p480_p8 = pnand %p1545_p6, %p479_p7 }
  0xc7   : > { %s486_s30 = sand.u32 (!%p480_p8), 1, %s2247_s12  }
  0xc8   : > { %483 = sbr.rel (%p480_p8) target bundleno = 571 (0x23b), region = 80  ;;  %s1546_s23 = sshll.u32 (!%p480_p8), %s486_s30, 9 }
  0xc9   : > { %s2932_s24 = scalar_lea.vmem (!%p480_p8), [#allocation2], %s1546_s23  ;;  %s1547_s11 = sshll.u32 (!%p480_p8), %s486_s30, 5 }
  0xca   : > { %s3094_s17 = scalar_lea.vmem (!%p480_p8), [#allocation3], %s1547_s11  }
  0xcd   : > { %v1670_v0 = vld [vmem:[%s2932_s24 + $0xe0] sm:$0xf]  ;;  %v1876_v1 = vld [vmem:[%s2932_s24 + $0xec] sm:$0xf0]  ;;  %v1874_v5 = vld [vmem:[%s2932_s24 + $0xe4] sm:$0xf] }
  0xce   : > { %v1798_v2 = vld [vmem:[%s2932_s24 + $0x1e0] sm:$0xf]  ;;  %v1671_v3 = vor.u32 %v1876_v1, %v1670_v0  ;;  %v1908_v4 = vld [vmem:[%s2932_s24 + $0x1ec] sm:$0xf0]  ;;  %v1672_v6 = vld [vmem:[%s2932_s24 + $0xf0] sm:$0xf0] }
  0xcf   : > { %v1799_v7 = vor.u32 %v1908_v4, %v1798_v2  ;;  %v1675_v8 = vor.u32 %v1874_v5, %v1672_v6  ;;  %v1906_v9 = vld [vmem:[%s2932_s24 + $0x1e4] sm:$0xf]  ;;  %v1800_v10 = vld [vmem:[%s2932_s24 + $0x1f0] sm:$0xf0]  ;;  %v1654_v11 = vld [vmem:[%s2932_s24 + $0xc0] sm:$0xf] }
  0xd0   : > { %926 = vmatpush.bf16.msra.mxu0 %v1671_v3  ;;  %v1803_v12 = vor.u32 %v1906_v9, %v1800_v10  ;;  %v1872_v13 = vld [vmem:[%s2932_s24 + $0xcc] sm:$0xf0]  ;;  %v1782_v14 = vld [vmem:[%s2932_s24 + $0x1c0] sm:$0xf]  ;;  %v1870_v18 = vld [vmem:[%s2932_s24 + $0xc4] sm:$0xf] }
  0xd1   : > { %v1904_v15 = vld [vmem:[%s2932_s24 + $0x1cc] sm:$0xf0]  ;;  %940 = vmatpush.bf16.msra.mxu1 %v1799_v7  ;;  %954 = vmatpush.bf16.msra.mxu2 %v1675_v8  ;;  %v1655_v16 = vor.u32 %v1872_v13, %v1654_v11  ;;  %v1656_v19 = vld [vmem:[%s2932_s24 + $0xd0] sm:$0xf0]  ;;  %v1902_v20 = vld [vmem:[%s2932_s24 + $0x1c4] sm:$0xf] }
  0xd2   : > { %v1783_v17 = vor.u32 %v1904_v15, %v1782_v14  ;;  %968 = vmatpush.bf16.msra.mxu3 %v1803_v12  ;;  %v1659_v21 = vor.u32 %v1870_v18, %v1656_v19  ;;  %v1784_v22 = vld [vmem:[%s2932_s24 + $0x1d0] sm:$0xf0]  ;;  %v1638_v23 = vld [vmem:[%s2932_s24 + $0xa0] sm:$0xf]  ;;  %v1868_v24 = vld [vmem:[%s2932_s24 + $0xac] sm:$0xf0] }
  0xd3   : > { %v1787_v25 = vor.u32 %v1902_v20, %v1784_v22  ;;  %v1766_v26 = vld [vmem:[%s2932_s24 + $0x1a0] sm:$0xf]  ;;  %v1900_v27 = vld [vmem:[%s2932_s24 + $0x1ac] sm:$0xf0]  ;;  %v1866_v28 = vld [vmem:[%s2932_s24 + $0xa4] sm:$0xf]  ;;  %v1639_v29 = vor.u32 %v1868_v24, %v1638_v23 }
  0xd4   : > { %927 = vmatpush.bf16.msra.mxu0 %v1655_v16  ;;  %v1640_v30 = vld [vmem:[%s2932_s24 + $0xb0] sm:$0xf0]  ;;  %v1898_v31 = vld [vmem:[%s2932_s24 + $0x1a4] sm:$0xf]  ;;  %v1767_v33 = vor.u32 %v1900_v27, %v1766_v26  ;;  %v1622_v35 = vld [vmem:[%s2932_s24 + $0x80] sm:$0xf] }
  0xd5   : > { %v1768_v32 = vld [vmem:[%s2932_s24 + $0x1b0] sm:$0xf0]  ;;  %941 = vmatpush.bf16.msra.mxu1 %v1783_v17  ;;  %955 = vmatpush.bf16.msra.mxu2 %v1659_v21  ;;  %v1643_v34 = vor.u32 %v1866_v28, %v1640_v30  ;;  %v1864_v36 = vld [vmem:[%s2932_s24 + $0x8c] sm:$0xf0]  ;;  %v1750_v37 = vld [vmem:[%s2932_s24 + $0x180] sm:$0xf] }
  0xd6   : > { %969 = vmatpush.bf16.msra.mxu3 %v1787_v25  ;;  %v1771_v38 = vor.u32 %v1898_v31, %v1768_v32  ;;  %v1896_v39 = vld [vmem:[%s2932_s24 + $0x18c] sm:$0xf0]  ;;  %v1862_v40 = vld [vmem:[%s2932_s24 + $0x84] sm:$0xf]  ;;  %v1624_v41 = vld [vmem:[%s2932_s24 + $0x90] sm:$0xf0]  ;;  %v1623_v44 = vor.u32 %v1864_v36, %v1622_v35 }
  0xd7   : > { %v1894_v42 = vld [vmem:[%s2932_s24 + $0x184] sm:$0xf]  ;;  %v1752_v43 = vld [vmem:[%s2932_s24 + $0x190] sm:$0xf0]  ;;  %v1751_v45 = vor.u32 %v1896_v39, %v1750_v37  ;;  %v1627_v46 = vor.u32 %v1862_v40, %v1624_v41  ;;  %v1606_v47 = vld [vmem:[%s2932_s24 + $0x60] sm:$0xf] }
  0xd8   : > { %928 = vmatpush.bf16.msra.mxu0 %v1639_v29  ;;  %v1860_v48 = vld [vmem:[%s2932_s24 + $0x6c] sm:$0xf0]  ;;  %v1734_v49 = vld [vmem:[%s2932_s24 + $0x160] sm:$0xf]  ;;  %v1755_v50 = vor.u32 %v1894_v42, %v1752_v43  ;;  %v1858_v52 = vld [vmem:[%s2932_s24 + $0x64] sm:$0xf] }
  0xd9   : > { %942 = vmatpush.bf16.msra.mxu1 %v1767_v33  ;;  %956 = vmatpush.bf16.msra.mxu2 %v1643_v34  ;;  %v1892_v51 = vld [vmem:[%s2932_s24 + $0x16c] sm:$0xf0]  ;;  %v1608_v53 = vld [vmem:[%s2932_s24 + $0x70] sm:$0xf0]  ;;  %v1890_v54 = vld [vmem:[%s2932_s24 + $0x164] sm:$0xf]  ;;  %v1607_v56 = vor.u32 %v1860_v48, %v1606_v47 }
  0xda   : > { %970 = vmatpush.bf16.msra.mxu3 %v1771_v38  ;;  %v1736_v55 = vld [vmem:[%s2932_s24 + $0x170] sm:$0xf0]  ;;  %v1735_v57 = vor.u32 %v1892_v51, %v1734_v49  ;;  %v1611_v58 = vor.u32 %v1858_v52, %v1608_v53  ;;  %v1590_v59 = vld [vmem:[%s2932_s24 + $0x40] sm:$0xf]  ;;  %v1856_v60 = vld [vmem:[%s2932_s24 + $0x4c] sm:$0xf0] }
  0xdb   : > { %v1718_v61 = vld [vmem:[%s2932_s24 + $0x140] sm:$0xf]  ;;  %v1739_v62 = vor.u32 %v1890_v54, %v1736_v55  ;;  %v1888_v63 = vld [vmem:[%s2932_s24 + $0x14c] sm:$0xf0]  ;;  %v1854_v0 = vld [vmem:[%s2932_s24 + $0x44] sm:$0xf]  ;;  %v1591_v4 = vor.u32 %v1856_v60, %v1590_v59 }
  0xdc   : > { %929 = vmatpush.bf16.msra.mxu0 %v1623_v44  ;;  %v1592_v1 = vld [vmem:[%s2932_s24 + $0x50] sm:$0xf0]  ;;  %v1886_v2 = vld [vmem:[%s2932_s24 + $0x144] sm:$0xf]  ;;  %v1719_v5 = vor.u32 %v1888_v63, %v1718_v61  ;;  %v1574_v7 = vld [vmem:[%s2932_s24 + $0x20] sm:$0xf] }
  0xdd   : > { %943 = vmatpush.bf16.msra.mxu1 %v1751_v45  ;;  %957 = vmatpush.bf16.msra.mxu2 %v1627_v46  ;;  %v1720_v3 = vld [vmem:[%s2932_s24 + $0x150] sm:$0xf0]  ;;  %v1595_v6 = vor.u32 %v1854_v0, %v1592_v1  ;;  %v1852_v8 = vld [vmem:[%s2932_s24 + $0x2c] sm:$0xf0]  ;;  %v1702_v9 = vld [vmem:[%s2932_s24 + $0x120] sm:$0xf] }
  0xde   : > { %971 = vmatpush.bf16.msra.mxu3 %v1755_v50  ;;  %v1723_v10 = vor.u32 %v1886_v2, %v1720_v3  ;;  %v1884_v11 = vld [vmem:[%s2932_s24 + $0x12c] sm:$0xf0]  ;;  %v1850_v12 = vld [vmem:[%s2932_s24 + $0x24] sm:$0xf]  ;;  %v1576_v13 = vld [vmem:[%s2932_s24 + $0x30] sm:$0xf0]  ;;  %v1575_v16 = vor.u32 %v1852_v8, %v1574_v7 }
  0xdf   : > { %v1882_v14 = vld [vmem:[%s2932_s24 + $0x124] sm:$0xf]  ;;  %v1704_v15 = vld [vmem:[%s2932_s24 + $0x130] sm:$0xf0]  ;;  %v1558_v17 = vld [vmem:[%s2932_s24] sm:$0xf]  ;;  %v1703_v20 = vor.u32 %v1884_v11, %v1702_v9  ;;  %v1579_v21 = vor.u32 %v1850_v12, %v1576_v13 }
  0xe0   : > { %930 = vmatpush.bf16.msra.mxu0 %v1607_v56  ;;  %v1848_v18 = vld [vmem:[%s2932_s24 + $0xc] sm:$0xf0]  ;;  %v1686_v19 = vld [vmem:[%s2932_s24 + $0x100] sm:$0xf]  ;;  %v1846_v23 = vld [vmem:[%s2932_s24 + $0x4] sm:$0xf]  ;;  %v1707_v25 = vor.u32 %v1882_v14, %v1704_v15 }
  0xe1   : > { %944 = vmatpush.bf16.msra.mxu1 %v1735_v57  ;;  %958 = vmatpush.bf16.msra.mxu2 %v1611_v58  ;;  %v1880_v22 = vld [vmem:[%s2932_s24 + $0x10c] sm:$0xf0]  ;;  %v1560_v24 = vld [vmem:[%s2932_s24 + $0x10] sm:$0xf0]  ;;  %v1878_v26 = vld [vmem:[%s2932_s24 + $0x104] sm:$0xf]  ;;  %v1559_v32 = vor.u32 %v1848_v18, %v1558_v17 }
  0xe2   : > { %972 = vmatpush.bf16.msra.mxu3 %v1739_v62  ;;  %v1688_v27 = vld [vmem:[%s2932_s24 + $0x110] sm:$0xf0]  ;;  %v1678_v28 = vld [vmem:[%s2932_s24 + $0xe8] sm:$0xf]  ;;  %v1877_v29 = vld [vmem:[%s2932_s24 + $0xf4] sm:$0xf0]  ;;  %v1687_v36 = vor.u32 %v1880_v22, %v1686_v19  ;;  %v1563_v37 = vor.u32 %v1846_v23, %v1560_v24 }
  0xe3   : > { %v1806_v30 = vld [vmem:[%s2932_s24 + $0x1e8] sm:$0xf]  ;;  %v1909_v31 = vld [vmem:[%s2932_s24 + $0x1f4] sm:$0xf0]  ;;  %v1875_v33 = vld [vmem:[%s2932_s24 + $0xec] sm:$0xf]  ;;  %v1691_v41 = vor.u32 %v1878_v26, %v1688_v27  ;;  %v1679_v42 = vor.u32 %v1877_v29, %v1678_v28 }
  0xe4   : > { %931 = vmatpush.bf16.msra.mxu0 %v1591_v4  ;;  %v1680_v34 = vld [vmem:[%s2932_s24 + $0xf8] sm:$0xf0]  ;;  %v1907_v35 = vld [vmem:[%s2932_s24 + $0x1ec] sm:$0xf]  ;;  %v1550_v39 = vld [vmem:[%s3374_s0] sm:$0xf]  ;;  %v1807_v45 = vor.u32 %v1909_v31, %v1806_v30 }
  0xe5   : > { %945 = vmatpush.bf16.msra.mxu1 %v1719_v5  ;;  %959 = vmatpush.bf16.msra.mxu2 %v1595_v6  ;;  %v1808_v38 = vld [vmem:[%s2932_s24 + $0x1f8] sm:$0xf0]  ;;  %v1845_v40 = vld [vmem:[%s3374_s0 + $0x4] sm:$0xf0]  ;;  %v1873_v44 = vld [vmem:[%s2932_s24 + $0xd4] sm:$0xf0]  ;;  %v1683_v46 = vor.u32 %v1875_v33, %v1680_v34 }
  0xe6   : > { %973 = vmatpush.bf16.msra.mxu3 %v1723_v10  ;;  %v1662_v43 = vld [vmem:[%s2932_s24 + $0xc8] sm:$0xf]  ;;  %v1844_v48 = vld [vmem:[%s3374_s0 + $0x4] sm:$0xf]  ;;  %v1552_v49 = vld [vmem:[%s3374_s0 + $0x8] sm:$0xf0]  ;;  %v1811_v50 = vor.u32 %v1907_v35, %v1808_v38  ;;  %v3024_v54 = vor.u32 %v1845_v40, %v1550_v39 }
  0xe7   : > { %v1790_v47 = vld [vmem:[%s2932_s24 + $0x1c8] sm:$0xf]  ;;  %v1905_v51 = vld [vmem:[%s2932_s24 + $0x1d4] sm:$0xf0]  ;;  %v1871_v52 = vld [vmem:[%s2932_s24 + $0xcc] sm:$0xf]  ;;  %v3028_v57 = vor.u32 %v1844_v48, %v1552_v49  ;;  %v1663_v58 = vor.u32 %v1873_v44, %v1662_v43 }
  0xe8   : > { %932 = vmatpush.bf16.msra.mxu0 %v1575_v16  ;;  %v1664_v53 = vld [vmem:[%s2932_s24 + $0xd8] sm:$0xf0]  ;;  %v1903_v55 = vld [vmem:[%s2932_s24 + $0x1cc] sm:$0xf]  ;;  %v1791_v59 = vor.u32 %v1905_v51, %v1790_v47  ;;  %v1646_v61 = vld [vmem:[%s2932_s24 + $0xa8] sm:$0xf] }
  0xe9   : > { %946 = vmatpush.bf16.msra.mxu1 %v1703_v20  ;;  %960 = vmatpush.bf16.msra.mxu2 %v1579_v21  ;;  %v1792_v56 = vld [vmem:[%s2932_s24 + $0x1d8] sm:$0xf0]  ;;  %v1667_v60 = vor.u32 %v1871_v52, %v1664_v53  ;;  %v1869_v62 = vld [vmem:[%s2932_s24 + $0xb4] sm:$0xf0]  ;;  %v1774_v63 = vld [vmem:[%s2932_s24 + $0x1a8] sm:$0xf] }
  0xea   : > { %974 = vmatpush.bf16.msra.mxu3 %v1707_v25  ;;  %v1795_v0 = vor.u32 %v1903_v55, %v1792_v56  ;;  %v1901_v1 = vld [vmem:[%s2932_s24 + $0x1b4] sm:$0xf0]  ;;  %v1867_v2 = vld [vmem:[%s2932_s24 + $0xac] sm:$0xf]  ;;  %v1648_v3 = vld [vmem:[%s2932_s24 + $0xb8] sm:$0xf0]  ;;  %v1647_v6 = vor.u32 %v1869_v62, %v1646_v61 }
  0xeb   : > { %v1899_v4 = vld [vmem:[%s2932_s24 + $0x1ac] sm:$0xf]  ;;  %v1776_v5 = vld [vmem:[%s2932_s24 + $0x1b8] sm:$0xf0]  ;;  %v1630_v7 = vld [vmem:[%s2932_s24 + $0x88] sm:$0xf]  ;;  %v1775_v8 = vor.u32 %v1901_v1, %v1774_v63  ;;  %v1651_v9 = vor.u32 %v1867_v2, %v1648_v3 }
  0xec   : > { %933 = vmatpush.bf16.msra.mxu0 %v1559_v32  ;;  %v1865_v10 = vld [vmem:[%s2932_s24 + $0x94] sm:$0xf0]  ;;  %v1758_v11 = vld [vmem:[%s2932_s24 + $0x188] sm:$0xf]  ;;  %v584_v12 = vld [vmem:[%s3376_s2] sm:$0xff]  ;;  %v1779_v13 = vor.u32 %v1899_v4, %v1776_v5  ;;  %v2355_v17 = vmov 0  }
  0xed   : > { %947 = vmatpush.bf16.msra.mxu1 %v1687_v36  ;;  %961 = vmatpush.bf16.msra.mxu2 %v1563_v37  ;;  %v1897_v14 = vld [vmem:[%s2932_s24 + $0x194] sm:$0xf0]  ;;  %v1863_v15 = vld [vmem:[%s2932_s24 + $0x8c] sm:$0xf]  ;;  %v1632_v16 = vld [vmem:[%s2932_s24 + $0x98] sm:$0xf0]  ;;  %v1631_v20 = vor.u32 %v1865_v10, %v1630_v7 }
  0xee   : > { %975 = vmatpush.bf16.msra.mxu3 %v1691_v41  ;;  %2136 = vset.pattern.permute.xlu0 %v2355_v17  ;;  %v1895_v18 = vld [vmem:[%s2932_s24 + $0x18c] sm:$0xf]  ;;  %v1760_v19 = vld [vmem:[%s2932_s24 + $0x198] sm:$0xf0]  ;;  %v1759_v21 = vor.u32 %v1897_v14, %v1758_v11  ;;  %v1635_v22 = vor.u32 %v1863_v15, %v1632_v16  ;;  %v1614_v23 = vld [vmem:[%s2932_s24 + $0x68] sm:$0xf] }
  0xef   : > { %934 = vmatmul.bf16.vlgmr.msra.gmra.mxu0 %v3024_v54  ;;  %588 = vperm.xlu0 %2136, %v584_v12   ;;  %v1861_v24 = vld [vmem:[%s2932_s24 + $0x74] sm:$0xf0]  ;;  %v1742_v25 = vld [vmem:[%s2932_s24 + $0x168] sm:$0xf]  ;;  %v1763_v26 = vor.u32 %v1895_v18, %v1760_v19  ;;  %v1859_v28 = vld [vmem:[%s2932_s24 + $0x6c] sm:$0xf] }
  0xf0   : > { %982 = vmatpush.bf16.msrb.mxu0 %v1679_v42  ;;  %962 = vmatmul.bf16.vlgmr.msra.gmra.mxu2 %v3024_v54  ;;  %v1893_v27 = vld [vmem:[%s2932_s24 + $0x174] sm:$0xf0]  ;;  %v1616_v29 = vld [vmem:[%s2932_s24 + $0x78] sm:$0xf0]  ;;  %v1891_v30 = vld [vmem:[%s2932_s24 + $0x16c] sm:$0xf]  ;;  %v1615_v32 = vor.u32 %v1861_v24, %v1614_v23 }
  0xf1   : > { %996 = vmatpush.bf16.msrb.mxu1 %v1807_v45  ;;  %1010 = vmatpush.bf16.msrb.mxu2 %v1683_v46  ;;  %v1744_v31 = vld [vmem:[%s2932_s24 + $0x178] sm:$0xf0]  ;;  %v585_v33 = vld [vmem:[%s3376_s2 + $0x8] sm:$0xff]  ;;  %v1743_v34 = vor.u32 %v1893_v27, %v1742_v25  ;;  %v1619_v35 = vor.u32 %v1859_v28, %v1616_v29  ;;  %v1857_v37 = vld [vmem:[%s2932_s24 + $0x54] sm:$0xf0]  ;;  %s1813_s12 = sshll.u32 (%p2409_p5), %s2394_s15, 2 }
  0xf2   : > { %1024 = vmatpush.bf16.msrb.mxu3 %v1811_v50  ;;  %948 = vmatmul.bf16.vlgmr.msra.gmra.mxu1 %v3028_v57  ;;  %v1598_v36 = vld [vmem:[%s2932_s24 + $0x48] sm:$0xf]  ;;  %v1747_v39 = vor.u32 %v1891_v30, %v1744_v31  ;;  %v1889_v40 = vld [vmem:[%s2932_s24 + $0x154] sm:$0xf0]  ;;  %v1855_v41 = vld [vmem:[%s2932_s24 + $0x4c] sm:$0xf] }
  0xf3   : > { %976 = vmatmul.bf16.vlgmr.msra.gmra.mxu3 %v3028_v57  ;;  %v1726_v38 = vld [vmem:[%s2932_s24 + $0x148] sm:$0xf]  ;;  %v1600_v42 = vld [vmem:[%s2932_s24 + $0x58] sm:$0xf0]  ;;  %v1887_v43 = vld [vmem:[%s2932_s24 + $0x14c] sm:$0xf]  ;;  %v1599_v45 = vor.u32 %v1857_v37, %v1598_v36 }
  0xf4   : > { %983 = vmatpush.bf16.msrb.mxu0 %v1663_v58  ;;  %v1728_v44 = vld [vmem:[%s2932_s24 + $0x158] sm:$0xf0]  ;;  %v1727_v46 = vor.u32 %v1889_v40, %v1726_v38  ;;  %v1603_v47 = vor.u32 %v1855_v41, %v1600_v42  ;;  %v1582_v48 = vld [vmem:[%s2932_s24 + $0x28] sm:$0xf]  ;;  %v1853_v49 = vld [vmem:[%s2932_s24 + $0x34] sm:$0xf0] }
  0xf5   : > { %997 = vmatpush.bf16.msrb.mxu1 %v1791_v59  ;;  %1011 = vmatpush.bf16.msrb.mxu2 %v1667_v60  ;;  %v1710_v50 = vld [vmem:[%s2932_s24 + $0x128] sm:$0xf]  ;;  %v1731_v51 = vor.u32 %v1887_v43, %v1728_v44  ;;  %v1885_v52 = vld [vmem:[%s2932_s24 + $0x134] sm:$0xf0]  ;;  %v1851_v53 = vld [vmem:[%s2932_s24 + $0x2c] sm:$0xf]  ;;  %v1583_v59 = vor.u32 %v1853_v49, %v1582_v48 }
  0xf6   : > { %1025 = vmatpush.bf16.msrb.mxu3 %v1795_v0  ;;  %v1584_v55 = vld [vmem:[%s2932_s24 + $0x38] sm:$0xf0]  ;;  %v1883_v56 = vld [vmem:[%s2932_s24 + $0x12c] sm:$0xf]  ;;  %v1711_v60 = vor.u32 %v1885_v52, %v1710_v50  ;;  %v1566_v62 = vld [vmem:[%s2932_s24 + $0x8] sm:$0xf] }
  0xf7   : > { %593 = vperm.xlu0 %2136, %v585_v33   ;;  %v1712_v58 = vld [vmem:[%s2932_s24 + $0x138] sm:$0xf0]  ;;  %v1587_v61 = vor.u32 %v1851_v53, %v1584_v55  ;;  %v1849_v63 = vld [vmem:[%s2932_s24 + $0x14] sm:$0xf0]  ;;  %v1694_v0 = vld [vmem:[%s2932_s24 + $0x108] sm:$0xf] }
  0xf8   : > { %984 = vmatpush.bf16.msrb.mxu0 %v1647_v6  ;;  %v1715_v1 = vor.u32 %v1883_v56, %v1712_v58  ;;  %v1881_v2 = vld [vmem:[%s2932_s24 + $0x114] sm:$0xf0]  ;;  %v1847_v3 = vld [vmem:[%s2932_s24 + $0xc] sm:$0xf]  ;;  %v1568_v4 = vld [vmem:[%s2932_s24 + $0x18] sm:$0xf0]  ;;  %v1567_v7 = vor.u32 %v1849_v63, %v1566_v62 }
  0xf9   : > { %998 = vmatpush.bf16.msrb.mxu1 %v1775_v8  ;;  %1012 = vmatpush.bf16.msrb.mxu2 %v1651_v9  ;;  %v1879_v5 = vld [vmem:[%s2932_s24 + $0x10c] sm:$0xf]  ;;  %v1696_v6 = vld [vmem:[%s2932_s24 + $0x118] sm:$0xf0]  ;;  %v1695_v8 = vor.u32 %v1881_v2, %v1694_v0  ;;  %v1571_v9 = vor.u32 %v1847_v3, %v1568_v4  ;;  %s1910_s18 = sshll.u32 (%p2409_p5), %s2394_s15, 4  ;;  %s1062_s5 = ssub.s32 (%p2409_p5), 7, %s1813_s12 }
  0xfa   : > { %1026 = vmatpush.bf16.msrb.mxu3 %v1779_v13  ;;  %v1699_v10 = vor.u32 %v1879_v5, %v1696_v6  ;;  %s3107_s30 = scalar_lea.vmem (%p2409_p5), %s3377_s3, %s1910_s18   ;;  %p1063_p9 = scmp.lt.s32.totalorder (%p2409_p5), %s1062_s5, 4 }
  0xfc   : > { %985 = vmatpush.bf16.msrb.mxu0 %v1631_v20 }
  0xfd   : > { %999 = vmatpush.bf16.msrb.mxu1 %v1759_v21  ;;  %1013 = vmatpush.bf16.msrb.mxu2 %v1635_v22 }
  0xfe   : > { %1027 = vmatpush.bf16.msrb.mxu3 %v1763_v26 }
 0x100   : > { %986 = vmatpush.bf16.msrb.mxu0 %v1615_v32 }
 0x101   : > { %1000 = vmatpush.bf16.msrb.mxu1 %v1743_v34  ;;  %1014 = vmatpush.bf16.msrb.mxu2 %v1619_v35 }
 0x102   : > { %1028 = vmatpush.bf16.msrb.mxu3 %v1747_v39 }
 0x104   : > { %987 = vmatpush.bf16.msrb.mxu0 %v1599_v45 }
 0x105   : > { %1001 = vmatpush.bf16.msrb.mxu1 %v1727_v46  ;;  %1015 = vmatpush.bf16.msrb.mxu2 %v1603_v47 }
 0x106   : > { %1029 = vmatpush.bf16.msrb.mxu3 %v1731_v51 }
 0x108   : > { %988 = vmatpush.bf16.msrb.mxu0 %v1583_v59 }
 0x109   : > { %1002 = vmatpush.bf16.msrb.mxu1 %v1711_v60  ;;  %1016 = vmatpush.bf16.msrb.mxu2 %v1587_v61 }
 0x10a   : > { %1030 = vmatpush.bf16.msrb.mxu3 %v1715_v1 }
 0x10c   : > { %989 = vmatpush.bf16.msrb.mxu0 %v1567_v7 }
 0x10d   : > { %1003 = vmatpush.bf16.msrb.mxu1 %v1695_v8  ;;  %1017 = vmatpush.bf16.msrb.mxu2 %v1571_v9 }
 0x10e   : > { %1031 = vmatpush.bf16.msrb.mxu3 %v1699_v10 }
 0x10f   : > { %990 = vmatmul.bf16.vlgmr.msrb.gmra.mxu0 %v3024_v54 }
 0x110   : > { %1004 = vmatmul.bf16.vlgmr.msrb.gmra.mxu1 %v3028_v57  ;;  %1018 = vmatmul.bf16.vlgmr.msrb.gmra.mxu2 %v3024_v54 }
 0x111   : > { %1032 = vmatmul.bf16.vlgmr.msrb.gmra.mxu3 %v3028_v57 }
 0x161   : > { %v589_v11 = vpop.permute.xlu0 %588 }
 0x169   : > { %v594_v19 = vpop.permute.xlu0 %593 }
 0x16c   : > { %v935_v12 = vpop.f32.mrf.mxu0 }
 0x16d   : > { %v936_v13 = vadd.f32 %v935_v12, %v589_v11 }
 0x16f   : > { %v949_v14 = vpop.f32.mrf.mxu1 }
 0x170   : > { %v950_v15 = vadd.f32 %v949_v14, %v936_v13 }
 0x172   : > { %v1038_v20 = vmax.f32 %v950_v15, 0.0 }
 0x173   : > { %v963_v16 = vpop.f32.mrf.mxu2 }
 0x174   : > { %v964_v17 = vadd.f32 %v963_v16, %v589_v11  ;;  %v937_v22 = vpop.f32.mrf.mxu0 }
 0x175   : > { %v938_v23 = vadd.f32 %v937_v22, %v594_v19 }
 0x176   : > { %v977_v18 = vpop.f32.mrf.mxu3 }
 0x177   : > { %v978_v21 = vadd.f32 %v977_v18, %v964_v17  ;;  %v951_v24 = vpop.f32.mrf.mxu1 }
 0x178   : > { %v952_v26 = vadd.f32 %v951_v24, %v938_v23 }
 0x179   : > { %v1039_v25 = vmax.f32 %v978_v21, 0.0 }
 0x17a   : > { %v1042_v29 = vmax.f32 %v952_v26, 0.0 }
 0x17b   : > { %v1046_v54 = vpack.c.bf16 %v1039_v25, %v1038_v20  ;;  %v965_v57 = vpop.f32.mrf.mxu2 }
 0x17c   : > { %v966_v27 = vadd.f32 %v965_v57, %v594_v19 }
 0x17d   : > { %1050 = vst [vmem:[%s3094_s17] sm:$0xff] %v1046_v54 }
 0x17e   : > { %v979_v28 = vpop.f32.mrf.mxu3 }
 0x17f   : > { %v980_v30 = vadd.f32 %v979_v28, %v966_v27 }
 0x181   : > { %v1043_v31 = vmax.f32 %v980_v30, 0.0 }
 0x183   : > { %v1048_v32 = vpack.c.bf16 %v1043_v31, %v1042_v29 }
 0x185   : > { %1052 = vst [vmem:[%s3094_s17 + $0x10] sm:$0xff] %v1048_v32 }
 0x18c   : > { %v991_v33 = vpop.f32.mrf.mxu0 }
 0x18d   : > { %v992_v34 = vadd.f32 %v991_v33, %v589_v11  ;;  %v1005_v35 = vpop.f32.mrf.mxu1 }
 0x18f   : > { %v1006_v36 = vadd.f32 %v1005_v35, %v992_v34 }
 0x191   : > { %v1040_v41 = vmax.f32 %v1006_v36, 0.0 }
 0x193   : > { %v1019_v37 = vpop.f32.mrf.mxu2 }
 0x194   : > { %v1020_v38 = vadd.f32 %v1019_v37, %v589_v11  ;;  %v1033_v39 = vpop.f32.mrf.mxu3  ;;  %v993_v40 = vpop.f32.mrf.mxu0 }
 0x195   : > { %v994_v44 = vadd.f32 %v993_v40, %v594_v19  ;;  %v1007_v46 = vpop.f32.mrf.mxu1 }
 0x196   : > { %v1034_v42 = vadd.f32 %v1033_v39, %v1020_v38 }
 0x197   : > { %v1008_v48 = vadd.f32 %v1007_v46, %v994_v44 }
 0x198   : > { %v1041_v43 = vmax.f32 %v1034_v42, 0.0 }
 0x199   : > { %v1044_v52 = vmax.f32 %v1008_v48, 0.0 }
 0x19a   : > { %v1047_v45 = vpack.c.bf16 %v1041_v43, %v1040_v41 }
 0x19b   : > { %v1021_v47 = vpop.f32.mrf.mxu2 }
 0x19c   : > { %1051 = vst [vmem:[%s3094_s17 + $0x8] sm:$0xff] %v1047_v45  ;;  %v1022_v49 = vadd.f32 %v1021_v47, %v594_v19  ;;  %v1035_v50 = vpop.f32.mrf.mxu3 }
 0x19e   : > { %v1036_v51 = vadd.f32 %v1035_v50, %v1022_v49 }
 0x1a0   : > { %v1045_v53 = vmax.f32 %v1036_v51, 0.0  ;;  %1060 = sbr.rel (!%p2409_p5) target bundleno = 571 (0x23b), region = 88 }
 0x1a2   : > { %v1049_v55 = vpack.c.bf16 %v1045_v53, %v1044_v52 }
 0x1a4   : > { %1053 = vst [vmem:[%s3094_s17 + $0x18] sm:$0xff] %v1049_v55 }
 0x1a5   : > { %s3409_s5 = smov (!%p1063_p9, %s1062_s5), 4 }
 0x1a6   : > { %s1814_s23 = sshll.u32 %s3409_s5, 3  ;;  %s3109_s24 = sshll.u32 %s3409_s5, 2 }
 0x1a7   : > { %p1818_p10 = scmp.eq.s32.totalorder %s1814_s23, 0 }
 0x1a8   : > { %p1073_p11 = scmp.lt.u32.totalorder (!%p1818_p10), %s3109_s24, 8 }
 0x1a9   : > { %1072 = sbr.rel (%p1818_p10) target bundleno = 571 (0x23b), region = 92 }
 0x1ae   : > { %1076 = sbr.rel (%p1073_p11) target bundleno = 561 (0x231), region = 96  ;;  %s3113_s20 = sand.u32 (!%p1073_p11), 7, %s3109_s24  }
 0x1af   : > { %p1095_p5 = scmp.eq.s32.totalorder (!%p1073_p11), %s3113_s20, 0  ;;  %p1819_p12 = scmp.ne.s32.totalorder (!%p1073_p11), %s3113_s20, 0 }
 0x1b3   : > { %1098 = sbr.rel (%p1819_p12) target bundleno = 495 (0x1ef), region = 111  ;;  %s1099_s15 = sshrl.u32 (!%p1819_p12), %s3109_s24, 3 }
 0x1b4   : > { %s3120_s14 = sshrl.u32 (!%p1819_p12), %s1099_s15, 4 }
 0x1b5   : > { %p1820_p13 = scmp.le.s32.totalorder (!%p1819_p12), %s3120_s14, 0 }
 0x1b8   : > { %1453 = sbr.rel (%p1820_p13) target bundleno = 478 (0x1de), region = 229  ;;  %s3389_s28 = smov (!%p1820_p13), %s3107_s30 }
 0x1b9   : > { %s3390_s4 = smov (!%p1820_p13), %s3094_s17  ;;  %s3129_s25 = smov (!%p1820_p13), 0  }
 0x1ba   : > { %s3131_s26 = smov (!%p1820_p13), 0  }
 0x1bd LB: >> { %v1116_v56 = vld [vmem:[%s2295_s4 + $0x18] sm:$0xff]  ;;  %v1118_v58 = vld [vmem:[%s2295_s4 + $0x20] sm:$0xff]  ;;  %v1120_v59 = vld [vmem:[%s2295_s4 + $0x28] sm:$0xff]  ;;  %s1174_s27 = sadd.s32 1, %s2299_s25  ;;  %s1104_s26 = sadd.s32 1, %s2303_s26   ;;  %s2303_s26 = sphi %s3131_s26, %s1104_s26   ;;  %s2299_s25 = sphi %s3129_s25, %s3393_s25   ;;  %s2295_s4 = sphi %s3390_s4, %s3392_s4   ;;  %s2291_s28 = sphi %s3389_s28, %s3391_s28  }
 0x1be   : >> { %1117 = vst [vmem:[%s2291_s28 + $0x18] sm:$0xff] %v1116_v56  ;;  %v1122_v60 = vld [vmem:[%s2295_s4 + $0x30] sm:$0xff]  ;;  %v1124_v61 = vld [vmem:[%s2295_s4 + $0x38] sm:$0xff]  ;;  %v1126_v62 = vld [vmem:[%s2295_s4 + $0x40] sm:$0xff]  ;;  %p1175_p0 = scmp.ge.s32.totalorder %s1174_s27, %s3120_s14  ;;  %p1103_p1 = scmp.ge.s32.totalorder %s1104_s26, %s3120_s14 }
 0x1bf   : >> { %1119 = vst [vmem:[%s2291_s28 + $0x20] sm:$0xff] %v1118_v58  ;;  %v1128_v63 = vld [vmem:[%s2295_s4 + $0x48] sm:$0xff]  ;;  %v1130_v0 = vld [vmem:[%s2295_s4 + $0x50] sm:$0xff]  ;;  %v1132_v1 = vld [vmem:[%s2295_s4 + $0x58] sm:$0xff] }
 0x1c0   : >> { %1121 = vst [vmem:[%s2291_s28 + $0x28] sm:$0xff] %v1120_v59  ;;  %s3411_s27 = smov (%p1175_p0, %s1174_s27), 0  ;;  %v1134_v2 = vld [vmem:[%s2295_s4 + $0x60] sm:$0xff]  ;;  %v1136_v3 = vld [vmem:[%s2295_s4 + $0x68] sm:$0xff]  ;;  %v1138_v4 = vld [vmem:[%s2295_s4 + $0x70] sm:$0xff] }
 0x1c1   : >> { %1123 = vst [vmem:[%s2291_s28 + $0x30] sm:$0xff] %v1122_v60  ;;  %s1821_s29 = sshll.u32 %s3411_s27, 7  ;;  %v1140_v5 = vld [vmem:[%s2295_s4 + $0x78] sm:$0xff]  ;;  %v1110_v6 = vld [vmem:[%s2295_s4] sm:$0xff]  ;;  %v1112_v7 = vld [vmem:[%s2295_s4 + $0x8] sm:$0xff]  ;;  %s3393_s25 = smov %s3411_s27 }
 0x1c2   : >> { %1125 = vst [vmem:[%s2291_s28 + $0x38] sm:$0xff] %v1124_v61  ;;  %s3167_s6 = scalar_lea.vmem %s3094_s17, %s1821_s29 [#allocation3]   ;;  %s3170_s7 = scalar_lea.vmem %s3107_s30, %s1821_s29   ;;  %v1114_v8 = vld [vmem:[%s2295_s4 + $0x10] sm:$0xff]  ;;  %v1170_v9 = vld [vmem:[%s2295_s4 + $0x80] sm:$0xff]  ;;  %v1172_v10 = vld [vmem:[%s2295_s4 + $0x88] sm:$0xff] }
 0x1c3   : >> { %1127 = vst [vmem:[%s2291_s28 + $0x40] sm:$0xff] %v1126_v62  ;;  %s3392_s4 = smov %s3167_s6 }
 0x1c4   : >> { %1129 = vst [vmem:[%s2291_s28 + $0x48] sm:$0xff] %v1128_v63 }
 0x1c5   : >> { %1131 = vst [vmem:[%s2291_s28 + $0x50] sm:$0xff] %v1130_v0 }
 0x1c6   : >> { %1133 = vst [vmem:[%s2291_s28 + $0x58] sm:$0xff] %v1132_v1 }
 0x1c7   : >> { %1135 = vst [vmem:[%s2291_s28 + $0x60] sm:$0xff] %v1134_v2 }
 0x1c8   : >> { %1137 = vst [vmem:[%s2291_s28 + $0x68] sm:$0xff] %v1136_v3 }
 0x1c9   : >> { %1139 = vst [vmem:[%s2291_s28 + $0x70] sm:$0xff] %v1138_v4 }
 0x1ca   : >> { %1141 = vst [vmem:[%s2291_s28 + $0x78] sm:$0xff] %v1140_v5 }
 0x1cb   : >> { %1111 = vst [vmem:[%s2291_s28] sm:$0xff] %v1110_v6 }
 0x1cc   : >> { %1113 = vst [vmem:[%s2291_s28 + $0x8] sm:$0xff] %v1112_v7 }
 0x1cd   : >> { %1115 = vst [vmem:[%s2291_s28 + $0x10] sm:$0xff] %v1114_v8 }
 0x1ce   : >> { %1143 = vst [vmem:[%s2291_s28 + $0x1c] sm:$0xff] %v1114_v8 }
 0x1cf   : >> { %1145 = vst [vmem:[%s2291_s28 + $0x24] sm:$0xff] %v1116_v56 }
 0x1d0   : >> { %1147 = vst [vmem:[%s2291_s28 + $0x2c] sm:$0xff] %v1118_v58 }
 0x1d1   : >> { %1149 = vst [vmem:[%s2291_s28 + $0x34] sm:$0xff] %v1120_v59 }
 0x1d2   : >> { %1151 = vst [vmem:[%s2291_s28 + $0x3c] sm:$0xff] %v1122_v60 }
 0x1d3   : >> { %1153 = vst [vmem:[%s2291_s28 + $0x44] sm:$0xff] %v1124_v61 }
 0x1d4   : >> { %1155 = vst [vmem:[%s2291_s28 + $0x4c] sm:$0xff] %v1126_v62 }
 0x1d5   : >> { %1157 = vst [vmem:[%s2291_s28 + $0x54] sm:$0xff] %v1128_v63 }
 0x1d6   : >> { %1159 = vst [vmem:[%s2291_s28 + $0x5c] sm:$0xff] %v1130_v0 }
 0x1d7   : >> { %1161 = vst [vmem:[%s2291_s28 + $0x64] sm:$0xff] %v1132_v1 }
 0x1d8   : >> { %1163 = vst [vmem:[%s2291_s28 + $0x6c] sm:$0xff] %v1134_v2 }
 0x1d9   : >> { %1165 = vst [vmem:[%s2291_s28 + $0x74] sm:$0xff] %v1136_v3  ;;  %1106 = sbr.rel (!%p1103_p1) target bundleno = 445 (0x1bd), region = 235 }
 0x1da   : >> { %1167 = vst [vmem:[%s2291_s28 + $0x7c] sm:$0xff] %v1138_v4 }
 0x1db   : >> { %1169 = vst [vmem:[%s2291_s28 + $0x84] sm:$0xff] %v1140_v5 }
 0x1dc   : >> { %1171 = vst [vmem:[%s2291_s28 + $0x8c] sm:$0xff] %v1170_v9 }
 0x1dd   : >> { %1173 = vst [vmem:[%s2291_s28 + $0x94] sm:$0xff] %v1172_v10  ;;  %s3391_s28 = smov %s3170_s7 }
 0x1de PF: > { %s3218_s8 = sand.u32 15, %s1099_s15   ;;  %s1911_s9 = sshll.u32 %s3120_s14, 7 }
 0x1df   : > { %s3222_s10 = scalar_lea.vmem %s3094_s17, %s1911_s9 [#allocation3]   ;;  %s1187_s11 = scalar_lea.vmem %s3107_s30, %s1911_s9  }
 0x1e0   : > { %p1826_p2 = scmp.le.s32.totalorder %s3218_s8, 0 }
 0x1e1   : > { %s2305_s12 = smov (!%p1826_p2), %s1187_s11   ;;  %s2309_s18 = smov (!%p1826_p2), %s3222_s10  }
 0x1e2   : > { %1467 = sbr.rel (%p1826_p2) target bundleno = 495 (0x1ef), region = 240  ;;  %s2313_s5 = smov (!%p1826_p2), 0  }
 0x1e3   : > { %s2317_s21 = smov (!%p1826_p2), 0  }
 0x1e7 LB: >> { %v1197_v11 = vld [vmem:[%s2311_s18] sm:$0xff]  ;;  %v1199_v12 = vld [vmem:[%s2311_s18 + $0x10] sm:$0xff]  ;;  %s1201_s22 = sadd.s32 1, %s2315_s5  ;;  %s1191_s21 = sadd.s32 1, %s2319_s21   ;;  %s2319_s21 = sphi %s2317_s21, %s1191_s21   ;;  %s2315_s5 = sphi %s2313_s5, %s2314_s5   ;;  %s2311_s18 = sphi %s2309_s18, %s1206_s18   ;;  %s2307_s12 = sphi %s2305_s12, %s1207_s12  }
 0x1e8   : >> { %1198 = vst [vmem:[%s2307_s12] sm:$0xff] %v1197_v11  ;;  %p1202_p3 = scmp.ge.s32.totalorder %s1201_s22, %s3218_s8  ;;  %p1190_p4 = scmp.ge.s32.totalorder %s1191_s21, %s3218_s8 }
 0x1e9   : >> { %1200 = vst [vmem:[%s2307_s12 + $0x1c] sm:$0xff] %v1199_v12 }
 0x1ea   : >> { %s3413_s22 = smov (%p1202_p3, %s1201_s22), 0  ;;  %1193 = sbr.rel (!%p1190_p4) target bundleno = 487 (0x1e7), region = 246 }
 0x1eb   : >> { %s1827_s23 = sshll.u32 %s3413_s22, 3  ;;  %s2314_s5 = smov %s3413_s22  }
 0x1ec   : >> { %s1206_s18 = scalar_lea.vmem %s3222_s10, %s1827_s23 [#allocation3]   ;;  %s1207_s12 = scalar_lea.vmem %s1187_s11, %s1827_s23  }
 0x1ef PF: > { %1210 = sbr.rel (%p1095_p5) target bundleno = 561 (0x231), region = 129  ;;  %s1212_s15 = ssub.s32 (!%p1095_p5), %s3109_s24, %s3113_s20 }
 0x1f0   : > { %s1216_s14 = sshrl.u32 (!%p1095_p5), %s3109_s24, 3  ;;  %s3236_s28 = scalar_lea.vmem (!%p1095_p5), %s3094_s17, %s1212_s15 [#allocation3] }
 0x1f1   : > { %s3239_s4 = scalar_lea.vmem (!%p1095_p5), %s3107_s30, %s1212_s15  ;;  %s3243_s25 = sshrl.u32 (!%p1095_p5), %s1216_s14, 4 }
 0x1f2   : > { %p1829_p6 = scmp.le.s32.totalorder (!%p1095_p5), %s3243_s25, 0 }
 0x1f4   : > { %1481 = sbr.rel (%p1829_p6) target bundleno = 538 (0x21a), region = 251  ;;  %s3394_s26 = smov (!%p1829_p6), %s3107_s30 }
 0x1f5   : > { %s3395_s27 = smov (!%p1829_p6), %s3094_s17  ;;  %s3252_s29 = smov (!%p1829_p6), 0  }
 0x1f6   : > { %s3254_s6 = smov (!%p1829_p6), 0  }
 0x1f9 LB: >> { %v1233_v13 = vld [vmem:[%s2327_s27 + $0x18] sm:$0xff]  ;;  %v1235_v14 = vld [vmem:[%s2327_s27 + $0x20] sm:$0xff]  ;;  %v1237_v15 = vld [vmem:[%s2327_s27 + $0x28] sm:$0xff]  ;;  %s1291_s7 = sadd.s32 1, %s2331_s29  ;;  %s1221_s6 = sadd.s32 1, %s2335_s6   ;;  %s2335_s6 = sphi %s3254_s6, %s1221_s6   ;;  %s2331_s29 = sphi %s3252_s29, %s3398_s29   ;;  %s2327_s27 = sphi %s3395_s27, %s3397_s27   ;;  %s2323_s26 = sphi %s3394_s26, %s3396_s26  }
 0x1fa   : >> { %1234 = vst [vmem:[%s2323_s26 + $0x18] sm:$0xff] %v1233_v13  ;;  %v1239_v16 = vld [vmem:[%s2327_s27 + $0x30] sm:$0xff]  ;;  %v1241_v17 = vld [vmem:[%s2327_s27 + $0x38] sm:$0xff]  ;;  %v1243_v18 = vld [vmem:[%s2327_s27 + $0x40] sm:$0xff]  ;;  %p1292_p7 = scmp.ge.s32.totalorder %s1291_s7, %s3243_s25  ;;  %p1220_p8 = scmp.ge.s32.totalorder %s1221_s6, %s3243_s25 }
 0x1fb   : >> { %1236 = vst [vmem:[%s2323_s26 + $0x20] sm:$0xff] %v1235_v14  ;;  %v1245_v19 = vld [vmem:[%s2327_s27 + $0x48] sm:$0xff]  ;;  %v1247_v20 = vld [vmem:[%s2327_s27 + $0x50] sm:$0xff]  ;;  %v1249_v21 = vld [vmem:[%s2327_s27 + $0x58] sm:$0xff] }
 0x1fc   : >> { %1238 = vst [vmem:[%s2323_s26 + $0x28] sm:$0xff] %v1237_v15  ;;  %s3415_s7 = smov (%p1292_p7, %s1291_s7), 0  ;;  %v1251_v22 = vld [vmem:[%s2327_s27 + $0x60] sm:$0xff]  ;;  %v1253_v23 = vld [vmem:[%s2327_s27 + $0x68] sm:$0xff]  ;;  %v1255_v24 = vld [vmem:[%s2327_s27 + $0x70] sm:$0xff] }
 0x1fd   : >> { %1240 = vst [vmem:[%s2323_s26 + $0x30] sm:$0xff] %v1239_v16  ;;  %s1830_s8 = sshll.u32 %s3415_s7, 7  ;;  %v1257_v25 = vld [vmem:[%s2327_s27 + $0x78] sm:$0xff]  ;;  %v1227_v54 = vld [vmem:[%s2327_s27] sm:$0xff]  ;;  %v1229_v26 = vld [vmem:[%s2327_s27 + $0x8] sm:$0xff]  ;;  %s3398_s29 = smov %s3415_s7 }
 0x1fe   : >> { %1242 = vst [vmem:[%s2323_s26 + $0x38] sm:$0xff] %v1241_v17  ;;  %s3290_s9 = scalar_lea.vmem %s3094_s17, %s1830_s8 [#allocation3]   ;;  %s3293_s10 = scalar_lea.vmem %s3107_s30, %s1830_s8   ;;  %v1231_v57 = vld [vmem:[%s2327_s27 + $0x10] sm:$0xff]  ;;  %v1287_v27 = vld [vmem:[%s2327_s27 + $0x80] sm:$0xff]  ;;  %v1289_v28 = vld [vmem:[%s2327_s27 + $0x88] sm:$0xff] }
 0x1ff   : >> { %1244 = vst [vmem:[%s2323_s26 + $0x40] sm:$0xff] %v1243_v18  ;;  %s3397_s27 = smov %s3290_s9 }
 0x200   : >> { %1246 = vst [vmem:[%s2323_s26 + $0x48] sm:$0xff] %v1245_v19 }
 0x201   : >> { %1248 = vst [vmem:[%s2323_s26 + $0x50] sm:$0xff] %v1247_v20 }
 0x202   : >> { %1250 = vst [vmem:[%s2323_s26 + $0x58] sm:$0xff] %v1249_v21 }
 0x203   : >> { %1252 = vst [vmem:[%s2323_s26 + $0x60] sm:$0xff] %v1251_v22 }
 0x204   : >> { %1254 = vst [vmem:[%s2323_s26 + $0x68] sm:$0xff] %v1253_v23 }
 0x205   : >> { %1256 = vst [vmem:[%s2323_s26 + $0x70] sm:$0xff] %v1255_v24 }
 0x206   : >> { %1258 = vst [vmem:[%s2323_s26 + $0x78] sm:$0xff] %v1257_v25 }
 0x207   : >> { %1228 = vst [vmem:[%s2323_s26] sm:$0xff] %v1227_v54 }
 0x208   : >> { %1230 = vst [vmem:[%s2323_s26 + $0x8] sm:$0xff] %v1229_v26 }
 0x209   : >> { %1232 = vst [vmem:[%s2323_s26 + $0x10] sm:$0xff] %v1231_v57 }
 0x20a   : >> { %1260 = vst [vmem:[%s2323_s26 + $0x1c] sm:$0xff] %v1231_v57 }
 0x20b   : >> { %1262 = vst [vmem:[%s2323_s26 + $0x24] sm:$0xff] %v1233_v13 }
 0x20c   : >> { %1264 = vst [vmem:[%s2323_s26 + $0x2c] sm:$0xff] %v1235_v14 }
 0x20d   : >> { %1266 = vst [vmem:[%s2323_s26 + $0x34] sm:$0xff] %v1237_v15 }
 0x20e   : >> { %1268 = vst [vmem:[%s2323_s26 + $0x3c] sm:$0xff] %v1239_v16 }
 0x20f   : >> { %1270 = vst [vmem:[%s2323_s26 + $0x44] sm:$0xff] %v1241_v17 }
 0x210   : >> { %1272 = vst [vmem:[%s2323_s26 + $0x4c] sm:$0xff] %v1243_v18 }
 0x211   : >> { %1274 = vst [vmem:[%s2323_s26 + $0x54] sm:$0xff] %v1245_v19 }
 0x212   : >> { %1276 = vst [vmem:[%s2323_s26 + $0x5c] sm:$0xff] %v1247_v20 }
 0x213   : >> { %1278 = vst [vmem:[%s2323_s26 + $0x64] sm:$0xff] %v1249_v21 }
 0x214   : >> { %1280 = vst [vmem:[%s2323_s26 + $0x6c] sm:$0xff] %v1251_v22 }
 0x215   : >> { %1282 = vst [vmem:[%s2323_s26 + $0x74] sm:$0xff] %v1253_v23  ;;  %1223 = sbr.rel (!%p1220_p8) target bundleno = 505 (0x1f9), region = 257 }
 0x216   : >> { %1284 = vst [vmem:[%s2323_s26 + $0x7c] sm:$0xff] %v1255_v24 }
 0x217   : >> { %1286 = vst [vmem:[%s2323_s26 + $0x84] sm:$0xff] %v1257_v25 }
 0x218   : >> { %1288 = vst [vmem:[%s2323_s26 + $0x8c] sm:$0xff] %v1287_v27 }
 0x219   : >> { %1290 = vst [vmem:[%s2323_s26 + $0x94] sm:$0xff] %v1289_v28  ;;  %s3396_s26 = smov %s3293_s10 }
 0x21a PF: > { %s3341_s11 = sand.u32 15, %s1216_s14   ;;  %s1913_s12 = sshll.u32 %s3243_s25, 7 }
 0x21b   : > { %s3345_s18 = scalar_lea.vmem %s3094_s17, %s1913_s12 [#allocation3]   ;;  %s1304_s5 = scalar_lea.vmem %s3107_s30, %s1913_s12  }
 0x21c   : > { %p1835_p9 = scmp.le.s32.totalorder %s3341_s11, 0 }
 0x21d   : > { %s2337_s21 = smov (!%p1835_p9), %s1304_s5   ;;  %s2341_s22 = smov (!%p1835_p9), %s3345_s18  }
 0x21e   : > { %1495 = sbr.rel (%p1835_p9) target bundleno = 555 (0x22b), region = 262  ;;  %s2345_s23 = smov (!%p1835_p9), 0  }
 0x21f   : > { %s2349_s15 = smov (!%p1835_p9), 0  }
 0x223 LB: >> { %v1314_v29 = vld [vmem:[%s2343_s22] sm:$0xff]  ;;  %v1316_v30 = vld [vmem:[%s2343_s22 + $0x10] sm:$0xff]  ;;  %s1318_s14 = sadd.s32 1, %s2347_s23  ;;  %s1308_s15 = sadd.s32 1, %s2351_s15   ;;  %s2351_s15 = sphi %s2349_s15, %s1308_s15   ;;  %s2347_s23 = sphi %s2345_s23, %s2346_s23   ;;  %s2343_s22 = sphi %s2341_s22, %s1323_s22   ;;  %s2339_s21 = sphi %s2337_s21, %s1324_s21  }
 0x224   : >> { %1315 = vst [vmem:[%s2339_s21] sm:$0xff] %v1314_v29  ;;  %p1319_p10 = scmp.ge.s32.totalorder %s1318_s14, %s3341_s11  ;;  %p1307_p11 = scmp.ge.s32.totalorder %s1308_s15, %s3341_s11 }
 0x225   : >> { %1317 = vst [vmem:[%s2339_s21 + $0x1c] sm:$0xff] %v1316_v30 }
 0x226   : >> { %s3417_s14 = smov (%p1319_p10, %s1318_s14), 0  ;;  %1310 = sbr.rel (!%p1307_p11) target bundleno = 547 (0x223), region = 268 }
 0x227   : >> { %s1836_s25 = sshll.u32 %s3417_s14, 3  ;;  %s2346_s23 = smov %s3417_s14  }
 0x228   : >> { %s1323_s22 = scalar_lea.vmem %s3345_s18, %s1836_s25 [#allocation3]   ;;  %s1324_s21 = scalar_lea.vmem %s1304_s5, %s1836_s25  }
 0x22b PF: > { %s2356_s26 = smov 1  }
 0x22c   : > { %s1325_s27 = sshll.u32 %s2356_s26, %s3113_s20 }
 0x22d   : > { %s1838_s29 = sadd.s32 4294967295, %s1325_s27 }
 0x22e   : > { %v1335_v31 = vld [vmem:[%s3236_s28] sm:%s1838_s29]  ;;  %v1337_v32 = vld [vmem:[%s3236_s28 + $0x10] sm:%s1838_s29] }
 0x22f   : > { %1336 = vst [vmem:[%s3239_s4] sm:%s1838_s29] %v1335_v31 }
 0x230   : > { %1338 = vst [vmem:[%s3239_s4 + $0x1c] sm:%s1838_s29] %v1337_v32 }
 0x231 PF: > { %p1839_p5 = scmp.ge.u32.totalorder %s3109_s24, 8 }
 0x232   : > { %s2357_s6 = smov (!%p1839_p5), 1  }
 0x233   : > { %1079 = sbr.rel (%p1839_p5) target bundleno = 571 (0x23b), region = 100  ;;  %s1080_s7 = sshll.u32 (!%p1839_p5), %s2357_s6, %s3109_s24 }
 0x234   : > { %s1840_s8 = sadd.s32 (!%p1839_p5), 4294967295, %s1080_s7 }
 0x238   : > { %v1090_v33 = vld [vmem:[%s3094_s17] sm:%s1840_s8]  ;;  %v1092_v34 = vld [vmem:[%s3094_s17 + $0x10] sm:%s1840_s8] }
 0x239   : > { %1091 = vst [vmem:[%s3107_s30] sm:%s1840_s8] %v1090_v33 }
 0x23a   : > { %1093 = vst [vmem:[%s3107_s30 + $0x1c] sm:%s1840_s8] %v1092_v34 }
 0x23b PF: > { %p10_p12 = scmp.ge.s32.totalorder %s2397_s16, 4   ;;  %s3399_s12 = smov %s2251_s13 }
 0x23c   : > { %s3400_s13 = smov %s2407_s19  ;;  %s3401_s14 = smov %s2397_s16 }
 0x23d   :  { %12 = sbr.rel (!%p10_p12) target bundleno = 2 (0x2), region = 279 }

// kernel: simple_cnn_forward.4
= control target key start
LH: loop header
LB: loop body
LE: loop exit
PB: predicated region body
PF: predicated region fallthrough
CT: control target
= control target key end

     0   :  { %vm342_vm0 = vcmask 1043456   ;;  %vm343_vm1 = vcmask 277508   ;;  %s809_s1 = inlined_call_operand.vmem [shape: bf16[256,162], index: 1, kind: input, shape index: {}]   ;;  %s810_s2 = inlined_call_operand.vmem [shape: f32[32,1], index: 2, kind: input, shape index: {}]   ;;  %s811_s0 = inlined_call_operand.vmem [shape: bf16[32,256], index: 0, kind: input, shape index: {}]   ;;  %s812_s3 = inlined_call_operand.vmem [shape: bf16[32,162], index: 3, kind: output, shape index: {}]  }
   0x1   :  { %v427_v0 = vld [vmem:[%s809_s1 + $0x70] sm:$0xf]  ;;  %v516_v1 = vld [vmem:[%s809_s1 + $0x74] sm:$0xf0]  ;;  %v515_v5 = vld [vmem:[%s809_s1 + $0x74] sm:$0xf] }
   0x2   :  { %v491_v2 = vld [vmem:[%s809_s1 + $0xf0] sm:$0xf]  ;;  %v428_v3 = vor.u32 %v516_v1, %v427_v0  ;;  %v532_v4 = vld [vmem:[%s809_s1 + $0xf4] sm:$0xf0]  ;;  %v429_v6 = vld [vmem:[%s809_s1 + $0x78] sm:$0xf0] }
   0x3   :  { %v492_v7 = vor.u32 %v532_v4, %v491_v2  ;;  %v432_v8 = vor.u32 %v515_v5, %v429_v6  ;;  %v531_v9 = vld [vmem:[%s809_s1 + $0xf4] sm:$0xf]  ;;  %v493_v10 = vld [vmem:[%s809_s1 + $0xf8] sm:$0xf0]  ;;  %v419_v11 = vld [vmem:[%s809_s1 + $0x60] sm:$0xf] }
   0x4   :  { %254 = vmatpush.bf16.msra.mxu0 %v428_v3  ;;  %v496_v12 = vor.u32 %v531_v9, %v493_v10  ;;  %v514_v13 = vld [vmem:[%s809_s1 + $0x64] sm:$0xf0]  ;;  %v483_v14 = vld [vmem:[%s809_s1 + $0xe0] sm:$0xf]  ;;  %v513_v18 = vld [vmem:[%s809_s1 + $0x64] sm:$0xf] }
   0x5   :  { %v530_v15 = vld [vmem:[%s809_s1 + $0xe4] sm:$0xf0]  ;;  %273 = vmatpush.bf16.msra.mxu1 %v492_v7  ;;  %292 = vmatpush.bf16.msra.mxu2 %v432_v8  ;;  %v420_v16 = vor.u32 %v514_v13, %v419_v11  ;;  %v421_v19 = vld [vmem:[%s809_s1 + $0x68] sm:$0xf0]  ;;  %v529_v20 = vld [vmem:[%s809_s1 + $0xe4] sm:$0xf] }
   0x6   :  { %v484_v17 = vor.u32 %v530_v15, %v483_v14  ;;  %311 = vmatpush.bf16.msra.mxu3 %v496_v12  ;;  %v424_v21 = vor.u32 %v513_v18, %v421_v19  ;;  %v485_v22 = vld [vmem:[%s809_s1 + $0xe8] sm:$0xf0]  ;;  %v411_v23 = vld [vmem:[%s809_s1 + $0x50] sm:$0xf]  ;;  %v512_v24 = vld [vmem:[%s809_s1 + $0x54] sm:$0xf0] }
   0x7   :  { %v488_v25 = vor.u32 %v529_v20, %v485_v22  ;;  %v475_v26 = vld [vmem:[%s809_s1 + $0xd0] sm:$0xf]  ;;  %v528_v27 = vld [vmem:[%s809_s1 + $0xd4] sm:$0xf0]  ;;  %v511_v28 = vld [vmem:[%s809_s1 + $0x54] sm:$0xf]  ;;  %v412_v29 = vor.u32 %v512_v24, %v411_v23 }
   0x8   :  { %255 = vmatpush.bf16.msra.mxu0 %v420_v16  ;;  %v413_v30 = vld [vmem:[%s809_s1 + $0x58] sm:$0xf0]  ;;  %v527_v31 = vld [vmem:[%s809_s1 + $0xd4] sm:$0xf]  ;;  %v476_v33 = vor.u32 %v528_v27, %v475_v26  ;;  %v403_v35 = vld [vmem:[%s809_s1 + $0x40] sm:$0xf] }
   0x9   :  { %v477_v32 = vld [vmem:[%s809_s1 + $0xd8] sm:$0xf0]  ;;  %274 = vmatpush.bf16.msra.mxu1 %v484_v17  ;;  %293 = vmatpush.bf16.msra.mxu2 %v424_v21  ;;  %v416_v34 = vor.u32 %v511_v28, %v413_v30  ;;  %v510_v36 = vld [vmem:[%s809_s1 + $0x44] sm:$0xf0]  ;;  %v467_v37 = vld [vmem:[%s809_s1 + $0xc0] sm:$0xf] }
   0xa   :  { %312 = vmatpush.bf16.msra.mxu3 %v488_v25  ;;  %v480_v38 = vor.u32 %v527_v31, %v477_v32  ;;  %v526_v39 = vld [vmem:[%s809_s1 + $0xc4] sm:$0xf0]  ;;  %v509_v40 = vld [vmem:[%s809_s1 + $0x44] sm:$0xf]  ;;  %v405_v41 = vld [vmem:[%s809_s1 + $0x48] sm:$0xf0]  ;;  %v404_v44 = vor.u32 %v510_v36, %v403_v35 }
   0xb   :  { %v525_v42 = vld [vmem:[%s809_s1 + $0xc4] sm:$0xf]  ;;  %v469_v43 = vld [vmem:[%s809_s1 + $0xc8] sm:$0xf0]  ;;  %v468_v45 = vor.u32 %v526_v39, %v467_v37  ;;  %v408_v46 = vor.u32 %v509_v40, %v405_v41  ;;  %v395_v47 = vld [vmem:[%s809_s1 + $0x30] sm:$0xf] }
   0xc   :  { %256 = vmatpush.bf16.msra.mxu0 %v412_v29  ;;  %v508_v48 = vld [vmem:[%s809_s1 + $0x34] sm:$0xf0]  ;;  %v459_v49 = vld [vmem:[%s809_s1 + $0xb0] sm:$0xf]  ;;  %v472_v50 = vor.u32 %v525_v42, %v469_v43  ;;  %v507_v52 = vld [vmem:[%s809_s1 + $0x34] sm:$0xf] }
   0xd   :  { %275 = vmatpush.bf16.msra.mxu1 %v476_v33  ;;  %294 = vmatpush.bf16.msra.mxu2 %v416_v34  ;;  %v524_v51 = vld [vmem:[%s809_s1 + $0xb4] sm:$0xf0]  ;;  %v397_v53 = vld [vmem:[%s809_s1 + $0x38] sm:$0xf0]  ;;  %v523_v54 = vld [vmem:[%s809_s1 + $0xb4] sm:$0xf]  ;;  %v396_v56 = vor.u32 %v508_v48, %v395_v47 }
   0xe   :  { %313 = vmatpush.bf16.msra.mxu3 %v480_v38  ;;  %v461_v55 = vld [vmem:[%s809_s1 + $0xb8] sm:$0xf0]  ;;  %v460_v57 = vor.u32 %v524_v51, %v459_v49  ;;  %v400_v58 = vor.u32 %v507_v52, %v397_v53  ;;  %v387_v59 = vld [vmem:[%s809_s1 + $0x20] sm:$0xf]  ;;  %v506_v60 = vld [vmem:[%s809_s1 + $0x24] sm:$0xf0] }
   0xf   :  { %v451_v61 = vld [vmem:[%s809_s1 + $0xa0] sm:$0xf]  ;;  %v464_v62 = vor.u32 %v523_v54, %v461_v55  ;;  %v522_v63 = vld [vmem:[%s809_s1 + $0xa4] sm:$0xf0]  ;;  %v505_v0 = vld [vmem:[%s809_s1 + $0x24] sm:$0xf]  ;;  %v388_v4 = vor.u32 %v506_v60, %v387_v59 }
  0x10   :  { %257 = vmatpush.bf16.msra.mxu0 %v404_v44  ;;  %v389_v1 = vld [vmem:[%s809_s1 + $0x28] sm:$0xf0]  ;;  %v521_v2 = vld [vmem:[%s809_s1 + $0xa4] sm:$0xf]  ;;  %v452_v5 = vor.u32 %v522_v63, %v451_v61  ;;  %v379_v7 = vld [vmem:[%s809_s1 + $0x10] sm:$0xf] }
  0x11   :  { %276 = vmatpush.bf16.msra.mxu1 %v468_v45  ;;  %295 = vmatpush.bf16.msra.mxu2 %v408_v46  ;;  %v453_v3 = vld [vmem:[%s809_s1 + $0xa8] sm:$0xf0]  ;;  %v392_v6 = vor.u32 %v505_v0, %v389_v1  ;;  %v504_v8 = vld [vmem:[%s809_s1 + $0x14] sm:$0xf0]  ;;  %v443_v9 = vld [vmem:[%s809_s1 + $0x90] sm:$0xf] }
  0x12   :  { %314 = vmatpush.bf16.msra.mxu3 %v472_v50  ;;  %v456_v10 = vor.u32 %v521_v2, %v453_v3  ;;  %v520_v11 = vld [vmem:[%s809_s1 + $0x94] sm:$0xf0]  ;;  %v503_v12 = vld [vmem:[%s809_s1 + $0x14] sm:$0xf]  ;;  %v381_v13 = vld [vmem:[%s809_s1 + $0x18] sm:$0xf0]  ;;  %v380_v17 = vor.u32 %v504_v8, %v379_v7 }
  0x13   :  { %v519_v14 = vld [vmem:[%s809_s1 + $0x94] sm:$0xf]  ;;  %v445_v15 = vld [vmem:[%s809_s1 + $0x98] sm:$0xf0]  ;;  %v50_v16 = vld [vmem:[%s810_s2] sm:$0xff]  ;;  %v536_v19 = vmov 0   ;;  %v444_v20 = vor.u32 %v520_v11, %v443_v9  ;;  %v384_v21 = vor.u32 %v503_v12, %v381_v13 }
  0x14   :  { %258 = vmatpush.bf16.msra.mxu0 %v396_v56  ;;  %v371_v18 = vld [vmem:[%s809_s1] sm:$0xf]  ;;  %534 = vset.pattern.permute.xlu0 %v536_v19  ;;  %v502_v22 = vld [vmem:[%s809_s1 + $0x4] sm:$0xf0]  ;;  %v52_v24 = vld [vmem:[%s810_s2 + $0x10] sm:$0xff]  ;;  %v448_v25 = vor.u32 %v519_v14, %v445_v15 }
  0x15   :  { %277 = vmatpush.bf16.msra.mxu1 %v460_v57  ;;  %296 = vmatpush.bf16.msra.mxu2 %v400_v58  ;;  %v435_v23 = vld [vmem:[%s809_s1 + $0x80] sm:$0xf]  ;;  %v518_v26 = vld [vmem:[%s809_s1 + $0x84] sm:$0xf0]  ;;  %v501_v27 = vld [vmem:[%s809_s1 + $0x4] sm:$0xf]  ;;  %v372_v31 = vor.u32 %v502_v22, %v371_v18 }
  0x16   :  { %315 = vmatpush.bf16.msra.mxu3 %v464_v62  ;;  %v373_v28 = vld [vmem:[%s809_s1 + $0x8] sm:$0xf0]  ;;  %56 = vperm.xlu0 %534, %v50_v16   ;;  %v517_v29 = vld [vmem:[%s809_s1 + $0x84] sm:$0xf]  ;;  %v355_v32 = vld [vmem:[%s811_s0] sm:$0xf]  ;;  %v436_v34 = vor.u32 %v518_v26, %v435_v23 }
  0x17   :  { %v437_v30 = vld [vmem:[%s809_s1 + $0x88] sm:$0xf0]  ;;  %535 = vset.pattern.permute.xlu1 %v536_v19  ;;  %v498_v33 = vld [vmem:[%s811_s0 + $0x4] sm:$0xf0]  ;;  %v376_v35 = vor.u32 %v501_v27, %v373_v28  ;;  %v497_v36 = vld [vmem:[%s811_s0 + $0x4] sm:$0xf] }
  0x18   :  { %259 = vmatpush.bf16.msra.mxu0 %v388_v4  ;;  %66 = vperm.xlu1 %535, %v52_v24   ;;  %v357_v37 = vld [vmem:[%s811_s0 + $0x8] sm:$0xf0]  ;;  %v440_v38 = vor.u32 %v517_v29, %v437_v30  ;;  %v356_v39 = vor.u32 %v498_v33, %v355_v32  ;;  %v53_v42 = vld [vmem:[%s810_s2 + $0x18] sm:$0xff]  ;;  %v363_v43 = vld [vmem:[%s811_s0 + $0x10] sm:$0xf] }
  0x19   :  { %278 = vmatpush.bf16.msra.mxu1 %v452_v5  ;;  %297 = vmatpush.bf16.msra.mxu2 %v392_v6  ;;  %v51_v40 = vld [vmem:[%s810_s2 + $0x8] sm:$0xff]  ;;  %v360_v41 = vor.u32 %v497_v36, %v357_v37  ;;  %v500_v44 = vld [vmem:[%s811_s0 + $0x14] sm:$0xf0]  ;;  %v499_v45 = vld [vmem:[%s811_s0 + $0x14] sm:$0xf] }
  0x1a   :  { %316 = vmatpush.bf16.msra.mxu3 %v456_v10  ;;  %v365_v46 = vld [vmem:[%s811_s0 + $0x18] sm:$0xf0]  ;;  %v364_v47 = vor.u32 %v500_v44, %v363_v43  ;;  %vm785_vm2 = vmor %vm343_vm1, %vm342_vm0 }
  0x1b   :  { %v368_v48 = vor.u32 %v499_v45, %v365_v46 }
  0x1c   :  { %260 = vmatpush.bf16.msra.mxu0 %v380_v17 }
  0x1d   :  { %279 = vmatpush.bf16.msra.mxu1 %v444_v20  ;;  %298 = vmatpush.bf16.msra.mxu2 %v384_v21 }
  0x1e   :  { %317 = vmatpush.bf16.msra.mxu3 %v448_v25  ;;  %61 = vperm.xlu0 %534, %v51_v40  }
  0x20   :  { %261 = vmatpush.bf16.msra.mxu0 %v372_v31  ;;  %71 = vperm.xlu1 %535, %v53_v42  }
  0x21   :  { %280 = vmatpush.bf16.msra.mxu1 %v436_v34  ;;  %299 = vmatpush.bf16.msra.mxu2 %v376_v35 }
  0x22   :  { %318 = vmatpush.bf16.msra.mxu3 %v440_v38 }
  0x23   :  { %262 = vmatmul.bf16.vlgmr.msra.gmra.mxu0 %v356_v39 }
  0x24   :  { %281 = vmatmul.bf16.vlgmr.msra.gmra.mxu1 %v360_v41  ;;  %300 = vmatmul.bf16.vlgmr.msra.gmra.mxu2 %v356_v39 }
  0x25   :  { %319 = vmatmul.bf16.vlgmr.msra.gmra.mxu3 %v360_v41 }
  0x33   :  { %267 = vmatmul.bf16.gmra.mxu0 %v364_v47 }
  0x34   :  { %286 = vmatmul.bf16.gmra.mxu1 %v368_v48  ;;  %305 = vmatmul.bf16.gmra.mxu2 %v364_v47 }
  0x35   :  { %324 = vmatmul.bf16.gmra.mxu3 %v368_v48 }
  0x88   :  { %v57_v49 = vpop.permute.xlu0 %56 }
  0x8a   :  { %v67_v7 = vpop.permute.xlu1 %66 }
  0x90   :  { %v62_v58 = vpop.permute.xlu0 %61 }
  0x92   :  { %v72_v21 = vpop.permute.xlu1 %71 }
  0xa0   :  { %v263_v50 = vpop.f32.mrf.mxu0 }
  0xa1   :  { %v282_v51 = vpop.f32.mrf.mxu1  ;;  %v264_v52 = vadd.f32 %v263_v50, %v57_v49 }
  0xa3   :  { %v283_v53 = vadd.f32 %v282_v51, %v264_v52 }
  0xa5   :  { %v330_v59 = vmax.f32 %v283_v53, 0.0 }
  0xa7   :  { %v301_v54 = vpop.f32.mrf.mxu2 }
  0xa8   :  { %v302_v55 = vadd.f32 %v301_v54, %v57_v49  ;;  %v320_v56 = vpop.f32.mrf.mxu3  ;;  %v265_v57 = vpop.f32.mrf.mxu0 }
  0xa9   :  { %v284_v61 = vpop.f32.mrf.mxu1  ;;  %v266_v63 = vadd.f32 %v265_v57, %v62_v58 }
  0xaa   :  { %v321_v60 = vadd.f32 %v320_v56, %v302_v55 }
  0xab   :  { %v285_v3 = vadd.f32 %v284_v61, %v266_v63 }
  0xac   :  { %v331_v62 = vmax.f32 %v321_v60, 0.0 }
  0xad   :  { %v332_v10 = vmax.f32 %v285_v3, 0.0 }
  0xae   :  { %v338_v1 = vpack.c.bf16 %v331_v62, %v330_v59 }
  0xaf   :  { %v303_v2 = vpop.f32.mrf.mxu2 }
  0xb0   :  { %345 = vst.msk [vmem:[%s812_s3] sm:$0xff] %vm785_vm2, %v338_v1  ;;  %v304_v4 = vadd.f32 %v303_v2, %v62_v58  ;;  %v322_v5 = vpop.f32.mrf.mxu3  ;;  %v268_v6 = vpop.f32.mrf.mxu0 }
  0xb1   :  { %v269_v9 = vadd.f32 %v268_v6, %v67_v7  ;;  %v287_v12 = vpop.f32.mrf.mxu1 }
  0xb2   :  { %v323_v8 = vadd.f32 %v322_v5, %v304_v4 }
  0xb3   :  { %v288_v14 = vadd.f32 %v287_v12, %v269_v9 }
  0xb4   :  { %v333_v11 = vmax.f32 %v323_v8, 0.0 }
  0xb5   :  { %v334_v19 = vmax.f32 %v288_v14, 0.0 }
  0xb6   :  { %v339_v13 = vpack.c.bf16 %v333_v11, %v332_v10 }
  0xb7   :  { %v306_v15 = vpop.f32.mrf.mxu2 }
  0xb8   :  { %346 = vst.msk [vmem:[%s812_s3 + $0x8] sm:$0xff] %vm785_vm2, %v339_v13  ;;  %v307_v16 = vadd.f32 %v306_v15, %v67_v7  ;;  %v325_v17 = vpop.f32.mrf.mxu3  ;;  %v270_v18 = vpop.f32.mrf.mxu0 }
  0xb9   :  { %v271_v23 = vadd.f32 %v270_v18, %v72_v21  ;;  %v289_v25 = vpop.f32.mrf.mxu1 }
  0xba   :  { %v326_v20 = vadd.f32 %v325_v17, %v307_v16 }
  0xbb   :  { %v290_v27 = vadd.f32 %v289_v25, %v271_v23 }
  0xbc   :  { %v335_v22 = vmax.f32 %v326_v20, 0.0 }
  0xbd   :  { %v336_v31 = vmax.f32 %v290_v27, 0.0 }
  0xbe   :  { %v340_v24 = vpack.c.bf16 %v335_v22, %v334_v19 }
  0xbf   :  { %v308_v26 = vpop.f32.mrf.mxu2 }
  0xc0   :  { %347 = vst.msk [vmem:[%s812_s3 + $0x10] sm:$0xff] %vm785_vm2, %v340_v24  ;;  %v309_v28 = vadd.f32 %v308_v26, %v72_v21  ;;  %v327_v29 = vpop.f32.mrf.mxu3 }
  0xc2   :  { %v328_v30 = vadd.f32 %v327_v29, %v309_v28 }
  0xc4   :  { %v337_v32 = vmax.f32 %v328_v30, 0.0 }
  0xc6   :  { %v341_v33 = vpack.c.bf16 %v337_v32, %v336_v31 }
  0xc8   :  { %348 = vst.msk [vmem:[%s812_s3 + $0x18] sm:$0xff] %vm785_vm2, %v341_v33 }

// kernel: simple_cnn_forward.5
= control target key start
LH: loop header
LB: loop body
LE: loop exit
PB: predicated region body
PF: predicated region fallthrough
CT: control target
= control target key end

     0   :  { %s6630_s0 = inlined_call_operand.vmem [shape: bf16[2,2592], index: 0, kind: input, shape index: {}]   ;;  %s6631_s1 = inlined_call_operand.vmem [shape: bf16[2592,256], index: 1, kind: input, shape index: {}]   ;;  %s6632_s2 = inlined_call_operand.vmem [shape: f32[1,256], index: 2, kind: input, shape index: {}]   ;;  %s6633_s3 = inlined_call_operand.vmem [shape: bf16[256,32], index: 3, kind: input, shape index: {}]   ;;  %s6634_s4 = inlined_call_operand.vmem [shape: f32[1,32], index: 4, kind: input, shape index: {}]   ;;  %s6635_s5 = inlined_call_operand.hbm [shape: f32[2,32], index: 5, kind: output, shape index: {}]  }
   0x1   :  { %v2809_v0 = vld [vmem:[%s6631_s1 + $0x70] sm:$0xf]  ;;  %v4128_v1 = vld [vmem:[%s6631_s1 + $0x74] sm:$0xf0]  ;;  %v2801_v11 = vld [vmem:[%s6631_s1 + $0x60] sm:$0xf] }
   0x2   :  { %v2873_v2 = vld [vmem:[%s6631_s1 + $0xf0] sm:$0xf]  ;;  %v2810_v3 = vor.u32 %v4128_v1, %v2809_v0  ;;  %v4144_v4 = vld [vmem:[%s6631_s1 + $0xf4] sm:$0xf0]  ;;  %v4126_v13 = vld [vmem:[%s6631_s1 + $0x64] sm:$0xf0] }
   0x3   :  { %v2937_v5 = vld [vmem:[%s6631_s1 + $0x170] sm:$0xf]  ;;  %v4160_v6 = vld [vmem:[%s6631_s1 + $0x174] sm:$0xf0]  ;;  %v2874_v7 = vor.u32 %v4144_v4, %v2873_v2  ;;  %v2865_v14 = vld [vmem:[%s6631_s1 + $0xe0] sm:$0xf]  ;;  %v2802_v16 = vor.u32 %v4126_v13, %v2801_v11 }
   0x4   :  { %v2938_v8 = vor.u32 %v4160_v6, %v2937_v5  ;;  %v3001_v9 = vld [vmem:[%s6631_s1 + $0x1f0] sm:$0xf]  ;;  %v4176_v10 = vld [vmem:[%s6631_s1 + $0x1f4] sm:$0xf0]  ;;  %2025 = vmatpush.bf16.msra.mxu0 %v2810_v3  ;;  %v4142_v15 = vld [vmem:[%s6631_s1 + $0xe4] sm:$0xf0] }
   0x5   :  { %v3002_v12 = vor.u32 %v4176_v10, %v3001_v9  ;;  %2038 = vmatpush.bf16.msra.mxu1 %v2874_v7  ;;  %v2866_v17 = vor.u32 %v4142_v15, %v2865_v14  ;;  %v2929_v18 = vld [vmem:[%s6631_s1 + $0x160] sm:$0xf]  ;;  %v4158_v19 = vld [vmem:[%s6631_s1 + $0x164] sm:$0xf0]  ;;  %v2793_v23 = vld [vmem:[%s6631_s1 + $0x50] sm:$0xf] }
   0x6   :  { %2051 = vmatpush.bf16.msra.mxu2 %v2938_v8  ;;  %v2993_v20 = vld [vmem:[%s6631_s1 + $0x1e0] sm:$0xf]  ;;  %v2930_v21 = vor.u32 %v4158_v19, %v2929_v18  ;;  %v4174_v22 = vld [vmem:[%s6631_s1 + $0x1e4] sm:$0xf0]  ;;  %v4124_v24 = vld [vmem:[%s6631_s1 + $0x54] sm:$0xf0] }
   0x7   :  { %2064 = vmatpush.bf16.msra.mxu3 %v3002_v12  ;;  %v2994_v25 = vor.u32 %v4174_v22, %v2993_v20  ;;  %v2857_v26 = vld [vmem:[%s6631_s1 + $0xd0] sm:$0xf]  ;;  %v4140_v27 = vld [vmem:[%s6631_s1 + $0xd4] sm:$0xf0]  ;;  %v2794_v29 = vor.u32 %v4124_v24, %v2793_v23  ;;  %v2785_v35 = vld [vmem:[%s6631_s1 + $0x40] sm:$0xf] }
   0x8   :  { %v2921_v28 = vld [vmem:[%s6631_s1 + $0x150] sm:$0xf]  ;;  %2026 = vmatpush.bf16.msra.mxu0 %v2802_v16  ;;  %v4156_v30 = vld [vmem:[%s6631_s1 + $0x154] sm:$0xf0]  ;;  %v2858_v33 = vor.u32 %v4140_v27, %v2857_v26  ;;  %v4122_v36 = vld [vmem:[%s6631_s1 + $0x44] sm:$0xf0] }
   0x9   :  { %v2985_v31 = vld [vmem:[%s6631_s1 + $0x1d0] sm:$0xf]  ;;  %v4172_v32 = vld [vmem:[%s6631_s1 + $0x1d4] sm:$0xf0]  ;;  %2039 = vmatpush.bf16.msra.mxu1 %v2866_v17  ;;  %v2922_v34 = vor.u32 %v4156_v30, %v2921_v28  ;;  %v2849_v37 = vld [vmem:[%s6631_s1 + $0xc0] sm:$0xf]  ;;  %v2786_v44 = vor.u32 %v4122_v36, %v2785_v35 }
   0xa   :  { %2052 = vmatpush.bf16.msra.mxu2 %v2930_v21  ;;  %v2986_v38 = vor.u32 %v4172_v32, %v2985_v31  ;;  %v4138_v39 = vld [vmem:[%s6631_s1 + $0xc4] sm:$0xf0]  ;;  %v2913_v40 = vld [vmem:[%s6631_s1 + $0x140] sm:$0xf]  ;;  %v2777_v47 = vld [vmem:[%s6631_s1 + $0x30] sm:$0xf] }
   0xb   :  { %2065 = vmatpush.bf16.msra.mxu3 %v2994_v25  ;;  %v4154_v41 = vld [vmem:[%s6631_s1 + $0x144] sm:$0xf0]  ;;  %v2977_v42 = vld [vmem:[%s6631_s1 + $0x1c0] sm:$0xf]  ;;  %v2850_v45 = vor.u32 %v4138_v39, %v2849_v37  ;;  %v4120_v48 = vld [vmem:[%s6631_s1 + $0x34] sm:$0xf0] }
   0xc   :  { %v4170_v43 = vld [vmem:[%s6631_s1 + $0x1c4] sm:$0xf0]  ;;  %2027 = vmatpush.bf16.msra.mxu0 %v2794_v29  ;;  %v2914_v46 = vor.u32 %v4154_v41, %v2913_v40  ;;  %v2841_v49 = vld [vmem:[%s6631_s1 + $0xb0] sm:$0xf]  ;;  %v4136_v51 = vld [vmem:[%s6631_s1 + $0xb4] sm:$0xf0]  ;;  %v2778_v56 = vor.u32 %v4120_v48, %v2777_v47 }
   0xd   :  { %2040 = vmatpush.bf16.msra.mxu1 %v2858_v33  ;;  %v2978_v50 = vor.u32 %v4170_v43, %v2977_v42  ;;  %v2905_v52 = vld [vmem:[%s6631_s1 + $0x130] sm:$0xf]  ;;  %v4152_v53 = vld [vmem:[%s6631_s1 + $0x134] sm:$0xf0]  ;;  %v2842_v57 = vor.u32 %v4136_v51, %v2841_v49  ;;  %v2769_v59 = vld [vmem:[%s6631_s1 + $0x20] sm:$0xf] }
   0xe   :  { %2053 = vmatpush.bf16.msra.mxu2 %v2922_v34  ;;  %v2969_v54 = vld [vmem:[%s6631_s1 + $0x1b0] sm:$0xf]  ;;  %v4168_v55 = vld [vmem:[%s6631_s1 + $0x1b4] sm:$0xf0]  ;;  %v2906_v58 = vor.u32 %v4152_v53, %v2905_v52  ;;  %v4118_v60 = vld [vmem:[%s6631_s1 + $0x24] sm:$0xf0] }
   0xf   :  { %2066 = vmatpush.bf16.msra.mxu3 %v2986_v38  ;;  %v2833_v61 = vld [vmem:[%s6631_s1 + $0xa0] sm:$0xf]  ;;  %v2970_v62 = vor.u32 %v4168_v55, %v2969_v54  ;;  %v4134_v63 = vld [vmem:[%s6631_s1 + $0xa4] sm:$0xf0]  ;;  %v2770_v4 = vor.u32 %v4118_v60, %v2769_v59  ;;  %v2761_v7 = vld [vmem:[%s6631_s1 + $0x10] sm:$0xf] }
  0x10   :  { %2028 = vmatpush.bf16.msra.mxu0 %v2786_v44  ;;  %v2897_v0 = vld [vmem:[%s6631_s1 + $0x120] sm:$0xf]  ;;  %v4150_v1 = vld [vmem:[%s6631_s1 + $0x124] sm:$0xf0]  ;;  %v2834_v5 = vor.u32 %v4134_v63, %v2833_v61  ;;  %v4116_v8 = vld [vmem:[%s6631_s1 + $0x14] sm:$0xf0] }
  0x11   :  { %2041 = vmatpush.bf16.msra.mxu1 %v2850_v45  ;;  %v2961_v2 = vld [vmem:[%s6631_s1 + $0x1a0] sm:$0xf]  ;;  %v4166_v3 = vld [vmem:[%s6631_s1 + $0x1a4] sm:$0xf0]  ;;  %v2898_v6 = vor.u32 %v4150_v1, %v2897_v0  ;;  %v2825_v9 = vld [vmem:[%s6631_s1 + $0x90] sm:$0xf]  ;;  %v2762_v16 = vor.u32 %v4116_v8, %v2761_v7 }
  0x12   :  { %2054 = vmatpush.bf16.msra.mxu2 %v2914_v46  ;;  %v2962_v10 = vor.u32 %v4166_v3, %v2961_v2  ;;  %v4132_v11 = vld [vmem:[%s6631_s1 + $0x94] sm:$0xf0]  ;;  %v2889_v12 = vld [vmem:[%s6631_s1 + $0x110] sm:$0xf]  ;;  %v2753_v17 = vld [vmem:[%s6631_s1] sm:$0xf] }
  0x13   :  { %2067 = vmatpush.bf16.msra.mxu3 %v2978_v50  ;;  %v4148_v13 = vld [vmem:[%s6631_s1 + $0x114] sm:$0xf0]  ;;  %v2953_v14 = vld [vmem:[%s6631_s1 + $0x190] sm:$0xf]  ;;  %v4114_v18 = vld [vmem:[%s6631_s1 + $0x4] sm:$0xf0]  ;;  %v2826_v19 = vor.u32 %v4132_v11, %v2825_v9 }
  0x14   :  { %2029 = vmatpush.bf16.msra.mxu0 %v2778_v56  ;;  %v4164_v15 = vld [vmem:[%s6631_s1 + $0x194] sm:$0xf0]  ;;  %v2890_v20 = vor.u32 %v4148_v13, %v2889_v12  ;;  %v2817_v21 = vld [vmem:[%s6631_s1 + $0x80] sm:$0xf]  ;;  %v4130_v22 = vld [vmem:[%s6631_s1 + $0x84] sm:$0xf0]  ;;  %v2754_v31 = vor.u32 %v4114_v18, %v2753_v17 }
  0x15   :  { %2042 = vmatpush.bf16.msra.mxu1 %v2842_v57  ;;  %v2881_v23 = vld [vmem:[%s6631_s1 + $0x100] sm:$0xf]  ;;  %v2954_v24 = vor.u32 %v4164_v15, %v2953_v14  ;;  %v4146_v25 = vld [vmem:[%s6631_s1 + $0x104] sm:$0xf0]  ;;  %v3065_v28 = vld [vmem:[%s6631_s1 + $0x270] sm:$0xf]  ;;  %v2818_v35 = vor.u32 %v4130_v22, %v2817_v21 }
  0x16   :  { %2055 = vmatpush.bf16.msra.mxu2 %v2906_v58  ;;  %v2945_v26 = vld [vmem:[%s6631_s1 + $0x180] sm:$0xf]  ;;  %v4162_v27 = vld [vmem:[%s6631_s1 + $0x184] sm:$0xf0]  ;;  %v4192_v29 = vld [vmem:[%s6631_s1 + $0x274] sm:$0xf0]  ;;  %v2882_v36 = vor.u32 %v4146_v25, %v2881_v23 }
  0x17   :  { %2068 = vmatpush.bf16.msra.mxu3 %v2970_v62  ;;  %v3129_v30 = vld [vmem:[%s6631_s1 + $0x2f0] sm:$0xf]  ;;  %v4208_v32 = vld [vmem:[%s6631_s1 + $0x2f4] sm:$0xf0]  ;;  %v2946_v39 = vor.u32 %v4162_v27, %v2945_v26  ;;  %v3066_v40 = vor.u32 %v4192_v29, %v3065_v28  ;;  %v3057_v43 = vld [vmem:[%s6631_s1 + $0x260] sm:$0xf] }
  0x18   :  { %2030 = vmatpush.bf16.msra.mxu0 %v2770_v4  ;;  %v3193_v33 = vld [vmem:[%s6631_s1 + $0x370] sm:$0xf]  ;;  %v4224_v34 = vld [vmem:[%s6631_s1 + $0x374] sm:$0xf0]  ;;  %v3130_v41 = vor.u32 %v4208_v32, %v3129_v30  ;;  %v4190_v44 = vld [vmem:[%s6631_s1 + $0x264] sm:$0xf0] }
  0x19   :  { %2043 = vmatpush.bf16.msra.mxu1 %v2834_v5  ;;  %v3257_v37 = vld [vmem:[%s6631_s1 + $0x3f0] sm:$0xf]  ;;  %v4240_v38 = vld [vmem:[%s6631_s1 + $0x3f4] sm:$0xf0]  ;;  %v3194_v42 = vor.u32 %v4224_v34, %v3193_v33  ;;  %v3121_v45 = vld [vmem:[%s6631_s1 + $0x2e0] sm:$0xf]  ;;  %v3058_v52 = vor.u32 %v4190_v44, %v3057_v43 }
  0x1a   :  { %2056 = vmatpush.bf16.msra.mxu2 %v2898_v6  ;;  %v3258_v46 = vor.u32 %v4240_v38, %v3257_v37  ;;  %v4206_v47 = vld [vmem:[%s6631_s1 + $0x2e4] sm:$0xf0]  ;;  %v3185_v48 = vld [vmem:[%s6631_s1 + $0x360] sm:$0xf]  ;;  %v3049_v53 = vld [vmem:[%s6631_s1 + $0x250] sm:$0xf] }
  0x1b   :  { %2069 = vmatpush.bf16.msra.mxu3 %v2962_v10  ;;  %v4222_v49 = vld [vmem:[%s6631_s1 + $0x364] sm:$0xf0]  ;;  %v3249_v50 = vld [vmem:[%s6631_s1 + $0x3e0] sm:$0xf]  ;;  %v4188_v54 = vld [vmem:[%s6631_s1 + $0x254] sm:$0xf0]  ;;  %v3122_v55 = vor.u32 %v4206_v47, %v3121_v45 }
  0x1c   :  { %2031 = vmatpush.bf16.msra.mxu0 %v2762_v16  ;;  %v4238_v51 = vld [vmem:[%s6631_s1 + $0x3e4] sm:$0xf0]  ;;  %v3186_v56 = vor.u32 %v4222_v49, %v3185_v48  ;;  %v3113_v57 = vld [vmem:[%s6631_s1 + $0x2d0] sm:$0xf]  ;;  %v4204_v58 = vld [vmem:[%s6631_s1 + $0x2d4] sm:$0xf0]  ;;  %v3050_v1 = vor.u32 %v4188_v54, %v3049_v53 }
  0x1d   :  { %2044 = vmatpush.bf16.msra.mxu1 %v2826_v19  ;;  %v22_v59 = vld [vmem:[%s6630_s0] sm:$0xff]  ;;  %v3250_v60 = vor.u32 %v4238_v51, %v3249_v50  ;;  %v3177_v61 = vld [vmem:[%s6631_s1 + $0x350] sm:$0xf]  ;;  %v4220_v62 = vld [vmem:[%s6631_s1 + $0x354] sm:$0xf0]  ;;  %v3114_v2 = vor.u32 %v4204_v58, %v3113_v57 }
  0x1e   :  { %2057 = vmatpush.bf16.msra.mxu2 %v2890_v20  ;;  %356 = vst [vmem:[#allocation1] ss:$9 sm:$0xff] %v22_v59  ;;  %v3241_v63 = vld [vmem:[%s6631_s1 + $0x3d0] sm:$0xf]  ;;  %v4236_v0 = vld [vmem:[%s6631_s1 + $0x3d4] sm:$0xf0]  ;;  %v3178_v3 = vor.u32 %v4220_v62, %v3177_v61 }
  0x1f   :  { %2070 = vmatpush.bf16.msra.mxu3 %v2954_v24  ;;  %v3041_v4 = vld [vmem:[%s6631_s1 + $0x240] sm:$0xf]  ;;  %v4186_v5 = vld [vmem:[%s6631_s1 + $0x244] sm:$0xf0]  ;;  %v3242_v7 = vor.u32 %v4236_v0, %v3241_v63  ;;  %v3033_v13 = vld [vmem:[%s6631_s1 + $0x230] sm:$0xf] }
  0x20   :  { %2032 = vmatpush.bf16.msra.mxu0 %v2754_v31  ;;  %v3105_v6 = vld [vmem:[%s6631_s1 + $0x2c0] sm:$0xf]  ;;  %v4202_v8 = vld [vmem:[%s6631_s1 + $0x2c4] sm:$0xf0]  ;;  %v3042_v14 = vor.u32 %v4186_v5, %v3041_v4  ;;  %v4184_v15 = vld [vmem:[%s6631_s1 + $0x234] sm:$0xf0] }
  0x21   :  { %2045 = vmatpush.bf16.msra.mxu1 %v2818_v35  ;;  %v3169_v9 = vld [vmem:[%s6631_s1 + $0x340] sm:$0xf]  ;;  %v4218_v10 = vld [vmem:[%s6631_s1 + $0x344] sm:$0xf0]  ;;  %v3097_v16 = vld [vmem:[%s6631_s1 + $0x2b0] sm:$0xf]  ;;  %v3106_v18 = vor.u32 %v4202_v8, %v3105_v6  ;;  %v3034_v29 = vor.u32 %v4184_v15, %v3033_v13 }
  0x22   :  { %2058 = vmatpush.bf16.msra.mxu2 %v2882_v36  ;;  %v3233_v11 = vld [vmem:[%s6631_s1 + $0x3c0] sm:$0xf]  ;;  %v4234_v12 = vld [vmem:[%s6631_s1 + $0x3c4] sm:$0xf0]  ;;  %v4200_v17 = vld [vmem:[%s6631_s1 + $0x2b4] sm:$0xf0]  ;;  %v3170_v19 = vor.u32 %v4218_v10, %v3169_v9 }
  0x23   :  { %2071 = vmatpush.bf16.msra.mxu3 %v2946_v39  ;;  %v3234_v23 = vor.u32 %v4234_v12, %v3233_v11  ;;  %v3161_v24 = vld [vmem:[%s6631_s1 + $0x330] sm:$0xf]  ;;  %v4216_v25 = vld [vmem:[%s6631_s1 + $0x334] sm:$0xf0]  ;;  %v3025_v30 = vld [vmem:[%s6631_s1 + $0x220] sm:$0xf]  ;;  %v3098_v31 = vor.u32 %v4200_v17, %v3097_v16 }
  0x24   :  { %2077 = vmatpush.bf16.msrb.mxu0 %v3066_v40  ;;  %v3225_v27 = vld [vmem:[%s6631_s1 + $0x3b0] sm:$0xf]  ;;  %v4232_v28 = vld [vmem:[%s6631_s1 + $0x3b4] sm:$0xf0]  ;;  %v3162_v32 = vor.u32 %v4216_v25, %v3161_v24  ;;  %v4182_v33 = vld [vmem:[%s6631_s1 + $0x224] sm:$0xf0] }
  0x25   :  { %2090 = vmatpush.bf16.msrb.mxu1 %v3130_v41  ;;  %v4821_v20 = vld [vmem:[#allocation1 + $0x12] sm:$0xff]  ;;  %v4823_v21 = vld [vmem:[#allocation1] sm:$0xff]  ;;  %v4834_v26 = vld [vmem:[#allocation1 + $0x9] sm:$0xff]  ;;  %v3226_v36 = vor.u32 %v4232_v28, %v3225_v27  ;;  %v3026_v43 = vor.u32 %v4182_v33, %v3025_v30 }
  0x26   :  { %2103 = vmatpush.bf16.msrb.mxu2 %v3194_v42  ;;  %v4825_v22 = vld [vmem:[#allocation1 + $0x1b] sm:$0xff]  ;;  %2033 = vmatmul.bf16.vlgmr.msra.gmra.mxu0 %v4823_v21  ;;  %v4198_v35 = vld [vmem:[%s6631_s1 + $0x2a4] sm:$0xf0]  ;;  %v3017_v41 = vld [vmem:[%s6631_s1 + $0x210] sm:$0xf] }
  0x27   :  { %2116 = vmatpush.bf16.msrb.mxu3 %v3258_v46  ;;  %2059 = vmatmul.bf16.vlgmr.msra.gmra.mxu2 %v4821_v20  ;;  %v3089_v34 = vld [vmem:[%s6631_s1 + $0x2a0] sm:$0xf]  ;;  %v4214_v38 = vld [vmem:[%s6631_s1 + $0x324] sm:$0xf0]  ;;  %v4180_v42 = vld [vmem:[%s6631_s1 + $0x214] sm:$0xf0] }
  0x28   :  { %2078 = vmatpush.bf16.msrb.mxu0 %v3058_v52  ;;  %2072 = vmatmul.bf16.vlgmr.msra.gmra.mxu3 %v4825_v22  ;;  %v3153_v37 = vld [vmem:[%s6631_s1 + $0x320] sm:$0xf]  ;;  %v4230_v40 = vld [vmem:[%s6631_s1 + $0x3a4] sm:$0xf0]  ;;  %v3081_v44 = vld [vmem:[%s6631_s1 + $0x290] sm:$0xf]  ;;  %v3090_v47 = vor.u32 %v4198_v35, %v3089_v34  ;;  %v3018_v58 = vor.u32 %v4180_v42, %v3017_v41 }
  0x29   :  { %2091 = vmatpush.bf16.msrb.mxu1 %v3122_v55  ;;  %v3217_v39 = vld [vmem:[%s6631_s1 + $0x3a0] sm:$0xf]  ;;  %v4196_v45 = vld [vmem:[%s6631_s1 + $0x294] sm:$0xf0]  ;;  %v3145_v46 = vld [vmem:[%s6631_s1 + $0x310] sm:$0xf]  ;;  %v3154_v48 = vor.u32 %v4214_v38, %v3153_v37 }
  0x2a   :  { %2104 = vmatpush.bf16.msrb.mxu2 %v3186_v56  ;;  %2046 = vmatmul.bf16.vlgmr.msra.gmra.mxu1 %v4834_v26  ;;  %v4212_v49 = vld [vmem:[%s6631_s1 + $0x314] sm:$0xf0]  ;;  %v4889_v51 = vld [vmem:[#allocation1 + $0x24] sm:$0xff]  ;;  %v3218_v52 = vor.u32 %v4230_v40, %v3217_v39  ;;  %v4896_v55 = vld [vmem:[#allocation1 + $0x2d] sm:$0xff]  ;;  %v3082_v61 = vor.u32 %v4196_v45, %v3081_v44 }
  0x2b   :  { %2117 = vmatpush.bf16.msrb.mxu3 %v3250_v60  ;;  %v4887_v50 = vld [vmem:[#allocation1 + $0x36] sm:$0xff]  ;;  %v4891_v53 = vld [vmem:[#allocation1 + $0x3f] sm:$0xff]  ;;  %v23_v54 = vld [vmem:[%s6630_s0 + $0x8] sm:$0xff]  ;;  %v3146_v62 = vor.u32 %v4212_v49, %v3145_v46 }
  0x2c   :  { %2079 = vmatpush.bf16.msrb.mxu0 %v3050_v1  ;;  %v3209_v56 = vld [vmem:[%s6631_s1 + $0x390] sm:$0xf]  ;;  %v4228_v57 = vld [vmem:[%s6631_s1 + $0x394] sm:$0xf0]  ;;  %366 = vst [vmem:[#allocation1] ss:$9 sm:$0xff] %v23_v54 }
  0x2d   :  { %2092 = vmatpush.bf16.msrb.mxu1 %v3114_v2  ;;  %v3009_v59 = vld [vmem:[%s6631_s1 + $0x200] sm:$0xf]  ;;  %v4178_v60 = vld [vmem:[%s6631_s1 + $0x204] sm:$0xf0]  ;;  %v3210_v2 = vor.u32 %v4228_v57, %v3209_v56  ;;  %v3321_v6 = vld [vmem:[%s6631_s1 + $0x470] sm:$0xf] }
  0x2e   :  { %2105 = vmatpush.bf16.msrb.mxu2 %v3178_v3  ;;  %v3073_v63 = vld [vmem:[%s6631_s1 + $0x280] sm:$0xf]  ;;  %v4194_v0 = vld [vmem:[%s6631_s1 + $0x284] sm:$0xf0]  ;;  %v3385_v8 = vld [vmem:[%s6631_s1 + $0x4f0] sm:$0xf]  ;;  %v3010_v9 = vor.u32 %v4178_v60, %v3009_v59 }
  0x2f   :  { %2118 = vmatpush.bf16.msrb.mxu3 %v3242_v7  ;;  %v3137_v1 = vld [vmem:[%s6631_s1 + $0x300] sm:$0xf]  ;;  %v4210_v3 = vld [vmem:[%s6631_s1 + $0x304] sm:$0xf0]  ;;  %v4256_v7 = vld [vmem:[%s6631_s1 + $0x474] sm:$0xf0]  ;;  %v3074_v13 = vor.u32 %v4194_v0, %v3073_v63 }
  0x30   :  { %2080 = vmatpush.bf16.msrb.mxu0 %v3042_v14  ;;  %v3201_v4 = vld [vmem:[%s6631_s1 + $0x380] sm:$0xf]  ;;  %v4226_v5 = vld [vmem:[%s6631_s1 + $0x384] sm:$0xf0]  ;;  %v4272_v10 = vld [vmem:[%s6631_s1 + $0x4f4] sm:$0xf0]  ;;  %v3138_v14 = vor.u32 %v4210_v3, %v3137_v1 }
  0x31   :  { %2093 = vmatpush.bf16.msrb.mxu1 %v3106_v18  ;;  %v3449_v11 = vld [vmem:[%s6631_s1 + $0x570] sm:$0xf]  ;;  %v4288_v12 = vld [vmem:[%s6631_s1 + $0x574] sm:$0xf0]  ;;  %v3202_v17 = vor.u32 %v4226_v5, %v3201_v4  ;;  %v3322_v18 = vor.u32 %v4256_v7, %v3321_v6  ;;  %v3313_v24 = vld [vmem:[%s6631_s1 + $0x460] sm:$0xf] }
  0x32   :  { %2106 = vmatpush.bf16.msrb.mxu2 %v3170_v19  ;;  %v3513_v15 = vld [vmem:[%s6631_s1 + $0x5f0] sm:$0xf]  ;;  %v4304_v16 = vld [vmem:[%s6631_s1 + $0x5f4] sm:$0xf0]  ;;  %v3386_v19 = vor.u32 %v4272_v10, %v3385_v8  ;;  %v4254_v25 = vld [vmem:[%s6631_s1 + $0x464] sm:$0xf0] }
  0x33   :  { %2119 = vmatpush.bf16.msrb.mxu3 %v3234_v23  ;;  %v3450_v23 = vor.u32 %v4288_v12, %v3449_v11  ;;  %v3377_v27 = vld [vmem:[%s6631_s1 + $0x4e0] sm:$0xf]  ;;  %v3514_v28 = vor.u32 %v4304_v16, %v3513_v15  ;;  %v4302_v33 = vld [vmem:[%s6631_s1 + $0x5e4] sm:$0xf0]  ;;  %v3314_v34 = vor.u32 %v4254_v25, %v3313_v24  ;;  %v3305_v37 = vld [vmem:[%s6631_s1 + $0x450] sm:$0xf] }
  0x34   :  { %2081 = vmatpush.bf16.msrb.mxu0 %v3034_v29  ;;  %v4270_v29 = vld [vmem:[%s6631_s1 + $0x4e4] sm:$0xf0]  ;;  %v3441_v30 = vld [vmem:[%s6631_s1 + $0x560] sm:$0xf]  ;;  %v4252_v38 = vld [vmem:[%s6631_s1 + $0x454] sm:$0xf0] }
  0x35   :  { %2094 = vmatpush.bf16.msrb.mxu1 %v3098_v31  ;;  %v4286_v31 = vld [vmem:[%s6631_s1 + $0x564] sm:$0xf0]  ;;  %v3378_v35 = vor.u32 %v4270_v29, %v3377_v27  ;;  %v3369_v39 = vld [vmem:[%s6631_s1 + $0x4d0] sm:$0xf]  ;;  %v4268_v41 = vld [vmem:[%s6631_s1 + $0x4d4] sm:$0xf0]  ;;  %v3306_v46 = vor.u32 %v4252_v38, %v3305_v37 }
  0x36   :  { %2107 = vmatpush.bf16.msrb.mxu2 %v3162_v32  ;;  %v3505_v32 = vld [vmem:[%s6631_s1 + $0x5e0] sm:$0xf]  ;;  %v3433_v42 = vld [vmem:[%s6631_s1 + $0x550] sm:$0xf]  ;;  %v4300_v45 = vld [vmem:[%s6631_s1 + $0x5d4] sm:$0xf0] }
  0x37   :  { %2120 = vmatpush.bf16.msrb.mxu3 %v3226_v36  ;;  %v3442_v36 = vor.u32 %v4286_v31, %v3441_v30  ;;  %v3506_v40 = vor.u32 %v4302_v33, %v3505_v32  ;;  %v3497_v44 = vld [vmem:[%s6631_s1 + $0x5d0] sm:$0xf]  ;;  %v3297_v49 = vld [vmem:[%s6631_s1 + $0x440] sm:$0xf]  ;;  %v4266_v57 = vld [vmem:[%s6631_s1 + $0x4c4] sm:$0xf0] }
  0x38   :  { %2082 = vmatpush.bf16.msrb.mxu0 %v3026_v43  ;;  %v4284_v43 = vld [vmem:[%s6631_s1 + $0x554] sm:$0xf0]  ;;  %v3361_v54 = vld [vmem:[%s6631_s1 + $0x4c0] sm:$0xf]  ;;  %v3498_v56 = vor.u32 %v4300_v45, %v3497_v44  ;;  %v4282_v59 = vld [vmem:[%s6631_s1 + $0x544] sm:$0xf0] }
  0x39   :  { %2095 = vmatpush.bf16.msrb.mxu1 %v3090_v47  ;;  %v3370_v47 = vor.u32 %v4268_v41, %v3369_v39  ;;  %v3489_v60 = vld [vmem:[%s6631_s1 + $0x5c0] sm:$0xf]  ;;  %v3362_v63 = vor.u32 %v4266_v57, %v3361_v54  ;;  %v3289_v1 = vld [vmem:[%s6631_s1 + $0x430] sm:$0xf]  ;;  %v4264_v5 = vld [vmem:[%s6631_s1 + $0x4b4] sm:$0xf0] }
  0x3a   :  { %2108 = vmatpush.bf16.msrb.mxu2 %v3154_v48  ;;  %v3434_v48 = vor.u32 %v4284_v43, %v3433_v42  ;;  %v3353_v3 = vld [vmem:[%s6631_s1 + $0x4b0] sm:$0xf]  ;;  %v4280_v7 = vld [vmem:[%s6631_s1 + $0x534] sm:$0xf0]  ;;  %v3345_v15 = vld [vmem:[%s6631_s1 + $0x4a0] sm:$0xf] }
  0x3b   :  { %2121 = vmatpush.bf16.msrb.mxu3 %v3218_v52  ;;  %v4250_v52 = vld [vmem:[%s6631_s1 + $0x444] sm:$0xf0]  ;;  %v3417_v6 = vld [vmem:[%s6631_s1 + $0x530] sm:$0xf]  ;;  %v3354_v11 = vor.u32 %v4264_v5, %v3353_v3  ;;  %v4244_v30 = vld [vmem:[%s6631_s1 + $0x414] sm:$0xf0] }
  0x3c   :  { %2083 = vmatpush.bf16.msrb.mxu0 %v3018_v58  ;;  %v3425_v58 = vld [vmem:[%s6631_s1 + $0x540] sm:$0xf]  ;;  %v3481_v8 = vld [vmem:[%s6631_s1 + $0x5b0] sm:$0xf]  ;;  %v3418_v12 = vor.u32 %v4280_v7, %v3417_v6  ;;  %v4294_v24 = vld [vmem:[%s6631_s1 + $0x5a4] sm:$0xf0] }
  0x3d   :  { %2096 = vmatpush.bf16.msrb.mxu1 %v3082_v61  ;;  %v4298_v61 = vld [vmem:[%s6631_s1 + $0x5c4] sm:$0xf0]  ;;  %v3426_v0 = vor.u32 %v4282_v59, %v3425_v58  ;;  %v3273_v29 = vld [vmem:[%s6631_s1 + $0x410] sm:$0xf]  ;;  %v4260_v33 = vld [vmem:[%s6631_s1 + $0x494] sm:$0xf0] }
  0x3e   :  { %2109 = vmatpush.bf16.msrb.mxu2 %v3146_v62  ;;  %v3298_v62 = vor.u32 %v4250_v52, %v3297_v49  ;;  %v3490_v4 = vor.u32 %v4298_v61, %v3489_v60  ;;  %v3337_v31 = vld [vmem:[%s6631_s1 + $0x490] sm:$0xf]  ;;  %v4292_v37 = vld [vmem:[%s6631_s1 + $0x594] sm:$0xf0]  ;;  %v3274_v38 = vor.u32 %v4244_v30, %v3273_v29  ;;  %v3265_v39 = vld [vmem:[%s6631_s1 + $0x400] sm:$0xf] }
  0x3f   :  { %2122 = vmatpush.bf16.msrb.mxu3 %v3210_v2  ;;  %v4248_v2 = vld [vmem:[%s6631_s1 + $0x434] sm:$0xf0]  ;;  %v3338_v41 = vor.u32 %v4260_v33, %v3337_v31  ;;  %v3329_v43 = vld [vmem:[%s6631_s1 + $0x480] sm:$0xf]  ;;  %v4258_v44 = vld [vmem:[%s6631_s1 + $0x484] sm:$0xf0] }
  0x40   :  { %2084 = vmatpush.bf16.msrb.mxu0 %v3010_v9  ;;  %v4296_v9 = vld [vmem:[%s6631_s1 + $0x5b4] sm:$0xf0]  ;;  %v3290_v10 = vor.u32 %v4248_v2, %v3289_v1  ;;  %v3393_v45 = vld [vmem:[%s6631_s1 + $0x500] sm:$0xf]  ;;  %v4290_v49 = vld [vmem:[%s6631_s1 + $0x584] sm:$0xf0]  ;;  %v3330_v61 = vor.u32 %v4258_v44, %v3329_v43 }
  0x41   :  { %2097 = vmatpush.bf16.msrb.mxu1 %v3074_v13  ;;  %v3281_v13 = vld [vmem:[%s6631_s1 + $0x420] sm:$0xf]  ;;  %v3482_v16 = vor.u32 %v4296_v9, %v3481_v8  ;;  %v3577_v52 = vld [vmem:[%s6631_s1 + $0x670] sm:$0xf]  ;;  %v4320_v54 = vld [vmem:[%s6631_s1 + $0x674] sm:$0xf0] }
  0x42   :  { %2110 = vmatpush.bf16.msrb.mxu2 %v3138_v14  ;;  %v4246_v14 = vld [vmem:[%s6631_s1 + $0x424] sm:$0xf0]  ;;  %v4336_v58 = vld [vmem:[%s6631_s1 + $0x6f4] sm:$0xf0]  ;;  %v3705_v59 = vld [vmem:[%s6631_s1 + $0x770] sm:$0xf]  ;;  %v3578_v2 = vor.u32 %v4320_v54, %v3577_v52 }
  0x43   :  { %2123 = vmatpush.bf16.msrb.mxu3 %v3202_v17  ;;  %2085 = vmatmul.bf16.vlgmr.msrb.gmra.mxu0 %v4889_v51  ;;  %v4262_v17 = vld [vmem:[%s6631_s1 + $0x4a4] sm:$0xf0]  ;;  %v3282_v25 = vor.u32 %v4246_v14, %v3281_v13  ;;  %v4352_v60 = vld [vmem:[%s6631_s1 + $0x774] sm:$0xf0]  ;;  %v3569_v5 = vld [vmem:[%s6631_s1 + $0x660] sm:$0xf] }
  0x44   :  { %2129 = vmatpush.bf16.msra.mxu0 %v3322_v18  ;;  %2098 = vmatmul.bf16.vlgmr.msrb.gmra.mxu1 %v4896_v55  ;;  %v3409_v18 = vld [vmem:[%s6631_s1 + $0x520] sm:$0xf]  ;;  %v3346_v27 = vor.u32 %v4262_v17, %v3345_v15  ;;  %v4318_v6 = vld [vmem:[%s6631_s1 + $0x664] sm:$0xf0]  ;;  %v5174_v15 = vld [vmem:[#allocation1 + $0x12] sm:$0xff] }
  0x45   :  { %2142 = vmatpush.bf16.msra.mxu1 %v3386_v19  ;;  %2111 = vmatmul.bf16.vlgmr.msrb.gmra.mxu2 %v4887_v50  ;;  %v4278_v19 = vld [vmem:[%s6631_s1 + $0x524] sm:$0xf0]  ;;  %v3633_v7 = vld [vmem:[%s6631_s1 + $0x6e0] sm:$0xf]  ;;  %v4332_v29 = vld [vmem:[%s6631_s1 + $0x6d4] sm:$0xf0] }
  0x46   :  { %2155 = vmatpush.bf16.msra.mxu2 %v3450_v23  ;;  %2124 = vmatmul.bf16.vlgmr.msrb.gmra.mxu3 %v4891_v53  ;;  %v3473_v23 = vld [vmem:[%s6631_s1 + $0x5a0] sm:$0xf]  ;;  %v4334_v9 = vld [vmem:[%s6631_s1 + $0x6e4] sm:$0xf0]  ;;  %v3689_v30 = vld [vmem:[%s6631_s1 + $0x750] sm:$0xf] }
  0x47   :  { %2168 = vmatpush.bf16.msra.mxu3 %v3514_v28  ;;  %v3410_v28 = vor.u32 %v4278_v19, %v3409_v18  ;;  %v3474_v32 = vor.u32 %v4294_v24, %v3473_v23  ;;  %v3761_v13 = vld [vmem:[%s6631_s1 + $0x7e0] sm:$0xf]  ;;  %v4366_v14 = vld [vmem:[%s6631_s1 + $0x7e4] sm:$0xf0]  ;;  %v3570_v18 = vor.u32 %v4318_v6, %v3569_v5  ;;  %v3634_v19 = vor.u32 %v4334_v9, %v3633_v7  ;;  %v3561_v24 = vld [vmem:[%s6631_s1 + $0x650] sm:$0xf] }
  0x48   :  { %2130 = vmatpush.bf16.msra.mxu0 %v3314_v34  ;;  %v3401_v34 = vld [vmem:[%s6631_s1 + $0x510] sm:$0xf]  ;;  %v5178_v17 = vld [vmem:[#allocation1 + $0x1b] sm:$0xff]  ;;  %v4346_v43 = vld [vmem:[%s6631_s1 + $0x744] sm:$0xf0] }
  0x49   :  { %2143 = vmatpush.bf16.msra.mxu1 %v3378_v35  ;;  %v4276_v35 = vld [vmem:[%s6631_s1 + $0x514] sm:$0xf0]  ;;  %v3745_v44 = vld [vmem:[%s6631_s1 + $0x7c0] sm:$0xf] }
  0x4a   :  { %2156 = vmatpush.bf16.msra.mxu2 %v3442_v36  ;;  %v3465_v36 = vld [vmem:[%s6631_s1 + $0x590] sm:$0xf]  ;;  %v3402_v42 = vor.u32 %v4276_v35, %v3401_v34  ;;  %v4348_v31 = vld [vmem:[%s6631_s1 + $0x754] sm:$0xf0]  ;;  %v3553_v35 = vld [vmem:[%s6631_s1 + $0x640] sm:$0xf] }
  0x4b   :  { %2169 = vmatpush.bf16.msra.mxu3 %v3506_v40  ;;  %v4242_v40 = vld [vmem:[%s6631_s1 + $0x404] sm:$0xf0]  ;;  %v4364_v33 = vld [vmem:[%s6631_s1 + $0x7d4] sm:$0xf0] }
  0x4c   :  { %2131 = vmatpush.bf16.msra.mxu0 %v3306_v46  ;;  %v3466_v46 = vor.u32 %v4292_v37, %v3465_v36  ;;  %v3266_v57 = vor.u32 %v4242_v40, %v3265_v39  ;;  %v3690_v37 = vor.u32 %v4348_v31, %v3689_v30  ;;  %v3617_v39 = vld [vmem:[%s6631_s1 + $0x6c0] sm:$0xf]  ;;  %v4330_v40 = vld [vmem:[%s6631_s1 + $0x6c4] sm:$0xf0] }
  0x4d   :  { %2144 = vmatpush.bf16.msra.mxu1 %v3370_v47  ;;  %v4274_v47 = vld [vmem:[%s6631_s1 + $0x504] sm:$0xf0] }
  0x4e   :  { %2157 = vmatpush.bf16.msra.mxu2 %v3434_v48  ;;  %v3457_v48 = vld [vmem:[%s6631_s1 + $0x580] sm:$0xf] }
  0x4f   :  { %2170 = vmatpush.bf16.msra.mxu3 %v3498_v56  ;;  %v3641_v56 = vld [vmem:[%s6631_s1 + $0x6f0] sm:$0xf]  ;;  %v3458_v1 = vor.u32 %v4290_v49, %v3457_v48 }
  0x50   :  { %2132 = vmatpush.bf16.msra.mxu0 %v3298_v62  ;;  %v3394_v62 = vor.u32 %v4274_v47, %v3393_v45  ;;  %v3642_v3 = vor.u32 %v4336_v58, %v3641_v56  ;;  %v4362_v45 = vld [vmem:[%s6631_s1 + $0x7c4] sm:$0xf0] }
  0x51   :  { %2145 = vmatpush.bf16.msra.mxu1 %v3362_v63  ;;  %v3769_v63 = vld [vmem:[%s6631_s1 + $0x7f0] sm:$0xf] }
  0x52   :  { %2158 = vmatpush.bf16.msra.mxu2 %v3426_v0  ;;  %v4368_v0 = vld [vmem:[%s6631_s1 + $0x7f4] sm:$0xf0] }
  0x53   :  { %2171 = vmatpush.bf16.msra.mxu3 %v3490_v4  ;;  %v3706_v4 = vor.u32 %v4352_v60, %v3705_v59  ;;  %v3770_v8 = vor.u32 %v4368_v0, %v3769_v63 }
  0x54   :  { %2133 = vmatpush.bf16.msra.mxu0 %v3290_v10  ;;  %v3697_v10 = vld [vmem:[%s6631_s1 + $0x760] sm:$0xf] }
  0x55   :  { %2146 = vmatpush.bf16.msra.mxu1 %v3354_v11  ;;  %v4350_v11 = vld [vmem:[%s6631_s1 + $0x764] sm:$0xf0] }
  0x56   :  { %2159 = vmatpush.bf16.msra.mxu2 %v3418_v12  ;;  %v5166_v12 = vld [vmem:[#allocation1] sm:$0xff]  ;;  %v3698_v23 = vor.u32 %v4350_v11, %v3697_v10 }
  0x57   :  { %2172 = vmatpush.bf16.msra.mxu3 %v3482_v16  ;;  %v5176_v16 = vld [vmem:[#allocation1 + $0x9] sm:$0xff] }
  0x58   :  { %2134 = vmatpush.bf16.msra.mxu0 %v3282_v25  ;;  %v4316_v25 = vld [vmem:[%s6631_s1 + $0x654] sm:$0xf0] }
  0x59   :  { %2147 = vmatpush.bf16.msra.mxu1 %v3346_v27  ;;  %v3625_v27 = vld [vmem:[%s6631_s1 + $0x6d0] sm:$0xf]  ;;  %v3562_v34 = vor.u32 %v4316_v25, %v3561_v24 }
  0x5a   :  { %2160 = vmatpush.bf16.msra.mxu2 %v3410_v28  ;;  %v3762_v28 = vor.u32 %v4366_v14, %v3761_v13  ;;  %v3626_v36 = vor.u32 %v4332_v29, %v3625_v27 }
  0x5b   :  { %2173 = vmatpush.bf16.msra.mxu3 %v3474_v32  ;;  %v3753_v32 = vld [vmem:[%s6631_s1 + $0x7d0] sm:$0xf] }
  0x5c   :  { %2135 = vmatpush.bf16.msra.mxu0 %v3274_v38  ;;  %v4314_v38 = vld [vmem:[%s6631_s1 + $0x644] sm:$0xf0] }
  0x5d   :  { %2148 = vmatpush.bf16.msra.mxu1 %v3338_v41  ;;  %v3754_v41 = vor.u32 %v4364_v33, %v3753_v32 }
  0x5e   :  { %2161 = vmatpush.bf16.msra.mxu2 %v3402_v42  ;;  %v3681_v42 = vld [vmem:[%s6631_s1 + $0x740] sm:$0xf] }
  0x5f   :  { %2174 = vmatpush.bf16.msra.mxu3 %v3466_v46 }
  0x60   :  { %2136 = vmatpush.bf16.msra.mxu0 %v3266_v57 }
  0x61   :  { %2149 = vmatpush.bf16.msra.mxu1 %v3330_v61 }
  0x62   :  { %2162 = vmatpush.bf16.msra.mxu2 %v3394_v62 }
  0x63   :  { %2175 = vmatpush.bf16.msra.mxu3 %v3458_v1  ;;  %2137 = vmatmul.bf16.vlgmr.msra.gmra.mxu0 %v5166_v12 }
  0x64   :  { %2181 = vmatpush.bf16.msrb.mxu0 %v3578_v2  ;;  %2150 = vmatmul.bf16.vlgmr.msra.gmra.mxu1 %v5176_v16 }
  0x65   :  { %2194 = vmatpush.bf16.msrb.mxu1 %v3642_v3  ;;  %2163 = vmatmul.bf16.vlgmr.msra.gmra.mxu2 %v5174_v15 }
  0x66   :  { %2207 = vmatpush.bf16.msrb.mxu2 %v3706_v4  ;;  %2176 = vmatmul.bf16.vlgmr.msra.gmra.mxu3 %v5178_v17 }
  0x67   :  { %2220 = vmatpush.bf16.msrb.mxu3 %v3770_v8 }
  0x68   :  { %2182 = vmatpush.bf16.msrb.mxu0 %v3570_v18 }
  0x69   :  { %2195 = vmatpush.bf16.msrb.mxu1 %v3634_v19 }
  0x6a   :  { %2208 = vmatpush.bf16.msrb.mxu2 %v3698_v23 }
  0x6b   :  { %2221 = vmatpush.bf16.msrb.mxu3 %v3762_v28 }
  0x6c   :  { %10 = vsyncpa [#allocation3], 0  ;;  %2183 = vmatpush.bf16.msrb.mxu0 %v3562_v34  ;;  %v3554_v46 = vor.u32 %v4314_v38, %v3553_v35  ;;  %v3618_v47 = vor.u32 %v4330_v40, %v3617_v39  ;;  %v3682_v48 = vor.u32 %v4346_v43, %v3681_v42  ;;  %v3545_v49 = vld [vmem:[%s6631_s1 + $0x630] sm:$0xf]  ;;  %v4312_v52 = vld [vmem:[%s6631_s1 + $0x634] sm:$0xf0]  ;;  %v3746_v56 = vor.u32 %v4362_v45, %v3745_v44 }
  0x6d   :  { %2196 = vmatpush.bf16.msrb.mxu1 %v3626_v36  ;;  %v3609_v54 = vld [vmem:[%s6631_s1 + $0x6b0] sm:$0xf]  ;;  %v4328_v57 = vld [vmem:[%s6631_s1 + $0x6b4] sm:$0xf0]  ;;  %v3546_v62 = vor.u32 %v4312_v52, %v3545_v49  ;;  %v3537_v1 = vld [vmem:[%s6631_s1 + $0x620] sm:$0xf] }
  0x6e   :  { %2209 = vmatpush.bf16.msrb.mxu2 %v3690_v37  ;;  %v3673_v58 = vld [vmem:[%s6631_s1 + $0x730] sm:$0xf]  ;;  %v4344_v59 = vld [vmem:[%s6631_s1 + $0x734] sm:$0xf0]  ;;  %v3610_v63 = vor.u32 %v4328_v57, %v3609_v54  ;;  %v4310_v2 = vld [vmem:[%s6631_s1 + $0x624] sm:$0xf0] }
  0x6f   :  { %2222 = vmatpush.bf16.msrb.mxu3 %v3754_v41  ;;  %v3737_v60 = vld [vmem:[%s6631_s1 + $0x7b0] sm:$0xf]  ;;  %v4360_v61 = vld [vmem:[%s6631_s1 + $0x7b4] sm:$0xf0]  ;;  %v3674_v0 = vor.u32 %v4344_v59, %v3673_v58  ;;  %v3601_v3 = vld [vmem:[%s6631_s1 + $0x6a0] sm:$0xf]  ;;  %v3538_v10 = vor.u32 %v4310_v2, %v3537_v1 }
  0x70   :  { %2184 = vmatpush.bf16.msrb.mxu0 %v3554_v46  ;;  %v3738_v4 = vor.u32 %v4360_v61, %v3737_v60  ;;  %v4326_v5 = vld [vmem:[%s6631_s1 + $0x6a4] sm:$0xf0]  ;;  %v3665_v6 = vld [vmem:[%s6631_s1 + $0x720] sm:$0xf]  ;;  %v3529_v11 = vld [vmem:[%s6631_s1 + $0x610] sm:$0xf] }
  0x71   :  { %2197 = vmatpush.bf16.msrb.mxu1 %v3618_v47  ;;  %v4342_v7 = vld [vmem:[%s6631_s1 + $0x724] sm:$0xf0]  ;;  %v3729_v8 = vld [vmem:[%s6631_s1 + $0x7a0] sm:$0xf]  ;;  %v3602_v13 = vor.u32 %v4326_v5, %v3601_v3  ;;  %v4308_v18 = vld [vmem:[%s6631_s1 + $0x614] sm:$0xf0] }
  0x72   :  { %2210 = vmatpush.bf16.msrb.mxu2 %v3682_v48  ;;  %v4358_v9 = vld [vmem:[%s6631_s1 + $0x7a4] sm:$0xf0]  ;;  %v3666_v14 = vor.u32 %v4342_v7, %v3665_v6  ;;  %v3593_v19 = vld [vmem:[%s6631_s1 + $0x690] sm:$0xf]  ;;  %v4324_v23 = vld [vmem:[%s6631_s1 + $0x694] sm:$0xf0]  ;;  %v3530_v32 = vor.u32 %v4308_v18, %v3529_v11 }
  0x73   :  { %2223 = vmatpush.bf16.msrb.mxu3 %v3746_v56  ;;  %v3730_v24 = vor.u32 %v4358_v9, %v3729_v8  ;;  %v3657_v25 = vld [vmem:[%s6631_s1 + $0x710] sm:$0xf]  ;;  %v4340_v27 = vld [vmem:[%s6631_s1 + $0x714] sm:$0xf0]  ;;  %v3521_v30 = vld [vmem:[%s6631_s1 + $0x600] sm:$0xf]  ;;  %v3594_v37 = vor.u32 %v4324_v23, %v3593_v19 }
  0x74   :  { %2185 = vmatpush.bf16.msrb.mxu0 %v3546_v62  ;;  %v3721_v28 = vld [vmem:[%s6631_s1 + $0x790] sm:$0xf]  ;;  %v4356_v29 = vld [vmem:[%s6631_s1 + $0x794] sm:$0xf0]  ;;  %v4306_v31 = vld [vmem:[%s6631_s1 + $0x604] sm:$0xf0]  ;;  %v3658_v38 = vor.u32 %v4340_v27, %v3657_v25 }
  0x75   :  { %2198 = vmatpush.bf16.msrb.mxu1 %v3610_v63  ;;  %v3585_v33 = vld [vmem:[%s6631_s1 + $0x680] sm:$0xf]  ;;  %v4322_v34 = vld [vmem:[%s6631_s1 + $0x684] sm:$0xf0]  ;;  %v3833_v41 = vld [vmem:[%s6631_s1 + $0x870] sm:$0xf]  ;;  %v3722_v43 = vor.u32 %v4356_v29, %v3721_v28  ;;  %v3522_v54 = vor.u32 %v4306_v31, %v3521_v30 }
  0x76   :  { %2211 = vmatpush.bf16.msrb.mxu2 %v3674_v0  ;;  %v3649_v35 = vld [vmem:[%s6631_s1 + $0x700] sm:$0xf]  ;;  %v4338_v36 = vld [vmem:[%s6631_s1 + $0x704] sm:$0xf0]  ;;  %v4384_v42 = vld [vmem:[%s6631_s1 + $0x874] sm:$0xf0]  ;;  %v3586_v58 = vor.u32 %v4322_v34, %v3585_v33 }
  0x77   :  { %2224 = vmatpush.bf16.msrb.mxu3 %v3738_v4  ;;  %v3713_v39 = vld [vmem:[%s6631_s1 + $0x780] sm:$0xf]  ;;  %v4354_v40 = vld [vmem:[%s6631_s1 + $0x784] sm:$0xf0]  ;;  %v3897_v44 = vld [vmem:[%s6631_s1 + $0x8f0] sm:$0xf]  ;;  %v3650_v59 = vor.u32 %v4338_v36, %v3649_v35  ;;  %v3834_v63 = vor.u32 %v4384_v42, %v3833_v41 }
  0x78   :  { %2186 = vmatpush.bf16.msrb.mxu0 %v3538_v10  ;;  %v4400_v45 = vld [vmem:[%s6631_s1 + $0x8f4] sm:$0xf0]  ;;  %v5340_v46 = vld [vmem:[#allocation1 + $0x24] sm:$0xff]  ;;  %v5344_v48 = vld [vmem:[#allocation1 + $0x2d] sm:$0xff]  ;;  %v3714_v62 = vor.u32 %v4354_v40, %v3713_v39  ;;  %vm2022_vm0 = vcmask 261120   ;;  %s4487_s23 = smov [#allocation2]  }
  0x79   :  { %2199 = vmatpush.bf16.msrb.mxu1 %v3602_v13  ;;  %v5342_v47 = vld [vmem:[#allocation1 + $0x36] sm:$0xff]  ;;  %v5346_v49 = vld [vmem:[#allocation1 + $0x3f] sm:$0xff]  ;;  %v24_v52 = vld [vmem:[%s6630_s0 + $0x10] sm:$0x1f]  ;;  %v3898_v0 = vor.u32 %v4400_v45, %v3897_v44  ;;  %s2740_s24 = sshll.u32 %s4487_s23, 4  ;;  %s2742_s26 = sshll.u32 %s6635_s5, 4  ;;  %s2741_s24 = int_to_ptr.vmem [resolvable:$true] %s2740_s24  ;;  %s2743_s26 = int_to_ptr.hbm [resolvable:$true] %s2742_s26 }
  0x7a   :  { %2212 = vmatpush.bf16.msrb.mxu2 %v3666_v14  ;;  %v3961_v56 = vld [vmem:[%s6631_s1 + $0x970] sm:$0xf]  ;;  %v4416_v57 = vld [vmem:[%s6631_s1 + $0x974] sm:$0xf0]  ;;  %376 = vst [vmem:[#allocation1] ss:$9 sm:$0xff] %v24_v52 }
  0x7b   :  { %2225 = vmatpush.bf16.msrb.mxu3 %v3730_v24  ;;  %v4025_v60 = vld [vmem:[%s6631_s1 + $0x9f0] sm:$0xf]  ;;  %v4432_v61 = vld [vmem:[%s6631_s1 + $0x9f4] sm:$0xf0]  ;;  %v3962_v1 = vor.u32 %v4416_v57, %v3961_v56  ;;  %v3825_v2 = vld [vmem:[%s6631_s1 + $0x860] sm:$0xf] }
  0x7c   :  { %2187 = vmatpush.bf16.msrb.mxu0 %v3530_v32  ;;  %v4382_v3 = vld [vmem:[%s6631_s1 + $0x864] sm:$0xf0]  ;;  %v3889_v4 = vld [vmem:[%s6631_s1 + $0x8e0] sm:$0xf]  ;;  %v4026_v5 = vor.u32 %v4432_v61, %v4025_v60  ;;  %v3817_v18 = vld [vmem:[%s6631_s1 + $0x850] sm:$0xf] }
  0x7d   :  { %2200 = vmatpush.bf16.msrb.mxu1 %v3594_v37  ;;  %v4398_v6 = vld [vmem:[%s6631_s1 + $0x8e4] sm:$0xf0]  ;;  %v3953_v7 = vld [vmem:[%s6631_s1 + $0x960] sm:$0xf]  ;;  %v3826_v11 = vor.u32 %v4382_v3, %v3825_v2  ;;  %v4380_v19 = vld [vmem:[%s6631_s1 + $0x854] sm:$0xf0] }
  0x7e   :  { %2213 = vmatpush.bf16.msrb.mxu2 %v3658_v38  ;;  %v4414_v8 = vld [vmem:[%s6631_s1 + $0x964] sm:$0xf0]  ;;  %v4017_v9 = vld [vmem:[%s6631_s1 + $0x9e0] sm:$0xf]  ;;  %v3890_v13 = vor.u32 %v4398_v6, %v3889_v4  ;;  %v3881_v23 = vld [vmem:[%s6631_s1 + $0x8d0] sm:$0xf]  ;;  %v3818_v31 = vor.u32 %v4380_v19, %v3817_v18 }
  0x7f   :  { %2226 = vmatpush.bf16.msrb.mxu3 %v3722_v43  ;;  %v4430_v10 = vld [vmem:[%s6631_s1 + $0x9e4] sm:$0xf0]  ;;  %v3954_v14 = vor.u32 %v4414_v8, %v3953_v7  ;;  %v4396_v25 = vld [vmem:[%s6631_s1 + $0x8d4] sm:$0xf0]  ;;  %v3945_v27 = vld [vmem:[%s6631_s1 + $0x950] sm:$0xf] }
  0x80   :  { %2188 = vmatpush.bf16.msrb.mxu0 %v3522_v54  ;;  %v4018_v24 = vor.u32 %v4430_v10, %v4017_v9  ;;  %v4412_v28 = vld [vmem:[%s6631_s1 + $0x954] sm:$0xf0]  ;;  %v4009_v29 = vld [vmem:[%s6631_s1 + $0x9d0] sm:$0xf]  ;;  %v3882_v32 = vor.u32 %v4396_v25, %v3881_v23  ;;  %v3809_v34 = vld [vmem:[%s6631_s1 + $0x840] sm:$0xf] }
  0x81   :  { %2201 = vmatpush.bf16.msrb.mxu1 %v3586_v58  ;;  %v4428_v30 = vld [vmem:[%s6631_s1 + $0x9d4] sm:$0xf0]  ;;  %v3946_v33 = vor.u32 %v4412_v28, %v3945_v27  ;;  %v4378_v35 = vld [vmem:[%s6631_s1 + $0x844] sm:$0xf0]  ;;  %v3873_v36 = vld [vmem:[%s6631_s1 + $0x8c0] sm:$0xf] }
  0x82   :  { %2214 = vmatpush.bf16.msrb.mxu2 %v3650_v59  ;;  %v4010_v37 = vor.u32 %v4428_v30, %v4009_v29  ;;  %v4394_v38 = vld [vmem:[%s6631_s1 + $0x8c4] sm:$0xf0]  ;;  %v3937_v39 = vld [vmem:[%s6631_s1 + $0x940] sm:$0xf]  ;;  %v3810_v43 = vor.u32 %v4378_v35, %v3809_v34  ;;  %v3801_v52 = vld [vmem:[%s6631_s1 + $0x830] sm:$0xf] }
  0x83   :  { %2227 = vmatpush.bf16.msrb.mxu3 %v3714_v62  ;;  %2189 = vmatmul.bf16.vlgmr.msrb.gmra.mxu0 %v5340_v46  ;;  %v4410_v40 = vld [vmem:[%s6631_s1 + $0x944] sm:$0xf0]  ;;  %v4001_v41 = vld [vmem:[%s6631_s1 + $0x9c0] sm:$0xf]  ;;  %v3874_v44 = vor.u32 %v4394_v38, %v3873_v36  ;;  %v4376_v54 = vld [vmem:[%s6631_s1 + $0x834] sm:$0xf0] }
  0x84   :  { %2233 = vmatpush.bf16.msra.mxu0 %v3834_v63  ;;  %2202 = vmatmul.bf16.vlgmr.msrb.gmra.mxu1 %v5344_v48  ;;  %v4426_v42 = vld [vmem:[%s6631_s1 + $0x9c4] sm:$0xf0]  ;;  %v3938_v45 = vor.u32 %v4410_v40, %v3937_v39  ;;  %v3865_v56 = vld [vmem:[%s6631_s1 + $0x8b0] sm:$0xf]  ;;  %v4392_v58 = vld [vmem:[%s6631_s1 + $0x8b4] sm:$0xf0]  ;;  %v3802_v63 = vor.u32 %v4376_v54, %v3801_v52 }
  0x85   :  { %2246 = vmatpush.bf16.msra.mxu1 %v3898_v0  ;;  %2215 = vmatmul.bf16.vlgmr.msrb.gmra.mxu2 %v5342_v47  ;;  %v4002_v57 = vor.u32 %v4426_v42, %v4001_v41  ;;  %v3929_v59 = vld [vmem:[%s6631_s1 + $0x930] sm:$0xf]  ;;  %v4408_v60 = vld [vmem:[%s6631_s1 + $0x934] sm:$0xf0]  ;;  %v3866_v0 = vor.u32 %v4392_v58, %v3865_v56  ;;  %v3793_v2 = vld [vmem:[%s6631_s1 + $0x820] sm:$0xf] }
  0x86   :  { %2259 = vmatpush.bf16.msra.mxu2 %v3962_v1  ;;  %2228 = vmatmul.bf16.vlgmr.msrb.gmra.mxu3 %v5346_v49  ;;  %v3993_v61 = vld [vmem:[%s6631_s1 + $0x9b0] sm:$0xf]  ;;  %v4424_v62 = vld [vmem:[%s6631_s1 + $0x9b4] sm:$0xf0]  ;;  %v3930_v1 = vor.u32 %v4408_v60, %v3929_v59  ;;  %v4374_v3 = vld [vmem:[%s6631_s1 + $0x824] sm:$0xf0] }
  0x87   :  { %2272 = vmatpush.bf16.msra.mxu3 %v4026_v5  ;;  %v3857_v4 = vld [vmem:[%s6631_s1 + $0x8a0] sm:$0xf]  ;;  %v3994_v5 = vor.u32 %v4424_v62, %v3993_v61  ;;  %v4390_v6 = vld [vmem:[%s6631_s1 + $0x8a4] sm:$0xf0]  ;;  %v3785_v18 = vld [vmem:[%s6631_s1 + $0x810] sm:$0xf] }
  0x88   :  { %2234 = vmatpush.bf16.msra.mxu0 %v3826_v11  ;;  %v3921_v7 = vld [vmem:[%s6631_s1 + $0x920] sm:$0xf]  ;;  %v4406_v8 = vld [vmem:[%s6631_s1 + $0x924] sm:$0xf0]  ;;  %v3794_v11 = vor.u32 %v4374_v3, %v3793_v2  ;;  %v4372_v19 = vld [vmem:[%s6631_s1 + $0x814] sm:$0xf0] }
  0x89   :  { %2247 = vmatpush.bf16.msra.mxu1 %v3890_v13  ;;  %v3985_v9 = vld [vmem:[%s6631_s1 + $0x9a0] sm:$0xf]  ;;  %v4422_v10 = vld [vmem:[%s6631_s1 + $0x9a4] sm:$0xf0]  ;;  %v3858_v13 = vor.u32 %v4390_v6, %v3857_v4  ;;  %v3849_v23 = vld [vmem:[%s6631_s1 + $0x890] sm:$0xf] }
  0x8a   :  { %2260 = vmatpush.bf16.msra.mxu2 %v3954_v14  ;;  %v3922_v14 = vor.u32 %v4406_v8, %v3921_v7  ;;  %v4388_v25 = vld [vmem:[%s6631_s1 + $0x894] sm:$0xf0]  ;;  %v3913_v27 = vld [vmem:[%s6631_s1 + $0x910] sm:$0xf]  ;;  %v3841_v36 = vld [vmem:[%s6631_s1 + $0x880] sm:$0xf] }
  0x8b   :  { %2273 = vmatpush.bf16.msra.mxu3 %v4018_v24  ;;  %v3986_v24 = vor.u32 %v4422_v10, %v3985_v9  ;;  %v4404_v28 = vld [vmem:[%s6631_s1 + $0x914] sm:$0xf0]  ;;  %v3977_v29 = vld [vmem:[%s6631_s1 + $0x990] sm:$0xf]  ;;  %v3850_v34 = vor.u32 %v4388_v25, %v3849_v23  ;;  %v3905_v38 = vld [vmem:[%s6631_s1 + $0x900] sm:$0xf] }
  0x8c   :  { %2235 = vmatpush.bf16.msra.mxu0 %v3818_v31  ;;  %v4420_v30 = vld [vmem:[%s6631_s1 + $0x994] sm:$0xf0]  ;;  %v3786_v31 = vor.u32 %v4372_v19, %v3785_v18  ;;  %v3914_v35 = vor.u32 %v4404_v28, %v3913_v27  ;;  %v4402_v40 = vld [vmem:[%s6631_s1 + $0x904] sm:$0xf0]  ;;  %v3969_v41 = vld [vmem:[%s6631_s1 + $0x980] sm:$0xf] }
  0x8d   :  { %2248 = vmatpush.bf16.msra.mxu1 %v3882_v32  ;;  %v3777_v32 = vld [vmem:[%s6631_s1 + $0x800] sm:$0xf]  ;;  %v3978_v39 = vor.u32 %v4420_v30, %v3977_v29  ;;  %v4418_v42 = vld [vmem:[%s6631_s1 + $0x984] sm:$0xf0]  ;;  %v2875_v54 = vld [vmem:[%s6631_s1 + $0xf8] sm:$0xf0]  ;;  %v3906_v59 = vor.u32 %v4402_v40, %v3905_v38 }
  0x8e   :  { %2261 = vmatpush.bf16.msra.mxu2 %v3946_v33  ;;  %v4370_v33 = vld [vmem:[%s6631_s1 + $0x804] sm:$0xf0]  ;;  %v4159_v56 = vld [vmem:[%s6631_s1 + $0x174] sm:$0xf]  ;;  %v4041_v60 = vld [vmem:[%s6631_s1 + $0xa10] sm:$0xf]  ;;  %v3970_v62 = vor.u32 %v4418_v42, %v3969_v41 }
  0x8f   :  { %2274 = vmatpush.bf16.msra.mxu3 %v4010_v37  ;;  %v4386_v37 = vld [vmem:[%s6631_s1 + $0x884] sm:$0xf0]  ;;  %v3778_v52 = vor.u32 %v4370_v33, %v3777_v32  ;;  %v4436_v61 = vld [vmem:[%s6631_s1 + $0xa14] sm:$0xf0]  ;;  %v2803_v4 = vld [vmem:[%s6631_s1 + $0x68] sm:$0xf0] }
  0x90   :  { %2236 = vmatpush.bf16.msra.mxu0 %v3810_v43  ;;  %v4127_v43 = vld [vmem:[%s6631_s1 + $0x74] sm:$0xf]  ;;  %v3842_v58 = vor.u32 %v4386_v37, %v3841_v36  ;;  %v4042_v6 = vor.u32 %v4436_v61, %v4041_v60  ;;  %v377_v7 = vld [vmem:[#allocation1] sm:$0xff]  ;;  %v2867_v8 = vld [vmem:[%s6631_s1 + $0xe8] sm:$0xf0]  ;;  %vm2733_vm1 = vcmask 254976  }
  0x91   :  { %2249 = vmatpush.bf16.msra.mxu1 %v3874_v44  ;;  %v2811_v44 = vld [vmem:[%s6631_s1 + $0x78] sm:$0xf0]  ;;  %v379_v3 = vld [vmem:[#allocation1 + $0x12] sm:$0xff]  ;;  %v4157_v9 = vld [vmem:[%s6631_s1 + $0x164] sm:$0xf] }
  0x92   :  { %2262 = vmatpush.bf16.msra.mxu2 %v3938_v45  ;;  %v4143_v45 = vld [vmem:[%s6631_s1 + $0xf4] sm:$0xf]  ;;  %v2931_v10 = vld [vmem:[%s6631_s1 + $0x168] sm:$0xf0]  ;;  %v380_v18 = vld [vmem:[#allocation1 + $0x1b] sm:$0xff] }
  0x93   :  { %2275 = vmatpush.bf16.msra.mxu3 %v4002_v57  ;;  %v2939_v57 = vld [vmem:[%s6631_s1 + $0x178] sm:$0xf0]  ;;  %v4175_v23 = vld [vmem:[%s6631_s1 + $0x1f4] sm:$0xf]  ;;  %v2934_v27 = vor.u32 %v4157_v9, %v2931_v10  ;;  %v4173_v37 = vld [vmem:[%s6631_s1 + $0x1e4] sm:$0xf] }
  0x94   :  { %2237 = vmatpush.bf16.msra.mxu0 %v3802_v63  ;;  %v2814_v63 = vor.u32 %v4127_v43, %v2811_v44  ;;  %v2942_v2 = vor.u32 %v4159_v56, %v2939_v57  ;;  %v4123_v28 = vld [vmem:[%s6631_s1 + $0x54] sm:$0xf]  ;;  %v2795_v29 = vld [vmem:[%s6631_s1 + $0x58] sm:$0xf0]  ;;  %v2995_v38 = vld [vmem:[%s6631_s1 + $0x1e8] sm:$0xf0] }
  0x95   :  { %2250 = vmatpush.bf16.msra.mxu1 %v3866_v0  ;;  %v4125_v0 = vld [vmem:[%s6631_s1 + $0x64] sm:$0xf]  ;;  %v4139_v30 = vld [vmem:[%s6631_s1 + $0xd4] sm:$0xf]  ;;  %v2859_v32 = vld [vmem:[%s6631_s1 + $0xd8] sm:$0xf0]  ;;  %v2798_v36 = vor.u32 %v4123_v28, %v2795_v29 }
  0x96   :  { %2263 = vmatpush.bf16.msra.mxu2 %v3930_v1  ;;  %v2878_v1 = vor.u32 %v4143_v45, %v2875_v54  ;;  %v2806_v19 = vor.u32 %v4125_v0, %v2803_v4  ;;  %v4155_v33 = vld [vmem:[%s6631_s1 + $0x154] sm:$0xf]  ;;  %v4121_v41 = vld [vmem:[%s6631_s1 + $0x44] sm:$0xf]  ;;  %v2787_v42 = vld [vmem:[%s6631_s1 + $0x48] sm:$0xf0]  ;;  %v2998_v54 = vor.u32 %v4173_v37, %v2995_v38 }
  0x97   :  { %2276 = vmatpush.bf16.msra.mxu3 %v3994_v5  ;;  %v4141_v5 = vld [vmem:[%s6631_s1 + $0xe4] sm:$0xf]  ;;  %v2851_v44 = vld [vmem:[%s6631_s1 + $0xc8] sm:$0xf0]  ;;  %v2790_v56 = vor.u32 %v4121_v41, %v2787_v42  ;;  %v4171_v57 = vld [vmem:[%s6631_s1 + $0x1d4] sm:$0xf] }
  0x98   :  { %2238 = vmatpush.bf16.msra.mxu0 %v3794_v11  ;;  %v378_v11 = vld [vmem:[#allocation1 + $0x9] sm:$0xff]  ;;  %v2870_v25 = vor.u32 %v4141_v5, %v2867_v8  ;;  %v4137_v43 = vld [vmem:[%s6631_s1 + $0xc4] sm:$0xf]  ;;  %v2843_v0 = vld [vmem:[%s6631_s1 + $0xb8] sm:$0xf0] }
  0x99   :  { %2251 = vmatpush.bf16.msra.mxu1 %v3858_v13  ;;  %v4033_v13 = vld [vmem:[%s6631_s1 + $0xa00] sm:$0xf]  ;;  %v4153_v45 = vld [vmem:[%s6631_s1 + $0x144] sm:$0xf]  ;;  %v2854_v60 = vor.u32 %v4137_v43, %v2851_v44  ;;  %v4167_v28 = vld [vmem:[%s6631_s1 + $0x1b4] sm:$0xf] }
  0x9a   :  { %2264 = vmatpush.bf16.msra.mxu2 %v3922_v14  ;;  %v4434_v14 = vld [vmem:[%s6631_s1 + $0xa04] sm:$0xf0]  ;;  %v4117_v8 = vld [vmem:[%s6631_s1 + $0x24] sm:$0xf]  ;;  %v2971_v29 = vld [vmem:[%s6631_s1 + $0x1b8] sm:$0xf0] }
  0x9b   :  { %2277 = vmatpush.bf16.msra.mxu3 %v3986_v24  ;;  %v3003_v24 = vld [vmem:[%s6631_s1 + $0x1f8] sm:$0xf0]  ;;  %v2974_v42 = vor.u32 %v4167_v28, %v2971_v29  ;;  %v4165_v44 = vld [vmem:[%s6631_s1 + $0x1a4] sm:$0xf]  ;;  %v3059_v28 = vld [vmem:[%s6631_s1 + $0x268] sm:$0xf0] }
  0x9c   :  { %2239 = vmatpush.bf16.msra.mxu0 %v3786_v31  ;;  %v4034_v31 = vor.u32 %v4434_v14, %v4033_v13  ;;  %v4133_v13 = vld [vmem:[%s6631_s1 + $0xa4] sm:$0xf]  ;;  %v2827_v38 = vld [vmem:[%s6631_s1 + $0x98] sm:$0xf0] }
  0x9d   :  { %2252 = vmatpush.bf16.msra.mxu1 %v3850_v34  ;;  %v2923_v34 = vld [vmem:[%s6631_s1 + $0x158] sm:$0xf0]  ;;  %v4205_v29 = vld [vmem:[%s6631_s1 + $0x2e4] sm:$0xf] }
  0x9e   :  { %2265 = vmatpush.bf16.msra.mxu2 %v3914_v35  ;;  %v3006_v35 = vor.u32 %v4175_v23, %v3003_v24  ;;  %v2926_v40 = vor.u32 %v4155_v33, %v2923_v34  ;;  %v2899_v23 = vld [vmem:[%s6631_s1 + $0x128] sm:$0xf0]  ;;  %v381_v24 = vld [vmem:[#allocation1 + $0x24] sm:$0xff]  ;;  %v4115_v33 = vld [vmem:[%s6631_s1 + $0x14] sm:$0xf] }
  0x9f   :  { %2278 = vmatpush.bf16.msra.mxu3 %v3978_v39  ;;  %v2862_v39 = vor.u32 %v4139_v30, %v2859_v32  ;;  %v2763_v34 = vld [vmem:[%s6631_s1 + $0x18] sm:$0xf0] }
  0xa0   :  { %2240 = vmatpush.bf16.msra.mxu0 %v3778_v52  ;;  %v2915_v52 = vld [vmem:[%s6631_s1 + $0x148] sm:$0xf0]  ;;  %v2766_v43 = vor.u32 %v4115_v33, %v2763_v34  ;;  %v4161_v34 = vld [vmem:[%s6631_s1 + $0x184] sm:$0xf] }
  0xa1   :  { %2253 = vmatpush.bf16.msra.mxu1 %v3842_v58  ;;  %v2987_v58 = vld [vmem:[%s6631_s1 + $0x1d8] sm:$0xf0]  ;;  %v2918_v61 = vor.u32 %v4153_v45, %v2915_v52  ;;  %v2963_v45 = vld [vmem:[%s6631_s1 + $0x1a8] sm:$0xf0]  ;;  %v4113_v52 = vld [vmem:[%s6631_s1 + $0x4] sm:$0xf] }
  0xa2   :  { %2266 = vmatpush.bf16.msra.mxu2 %v3906_v59  ;;  %v4119_v59 = vld [vmem:[%s6631_s1 + $0x34] sm:$0xf]  ;;  %v2990_v4 = vor.u32 %v4171_v57, %v2987_v58  ;;  %v2755_v57 = vld [vmem:[%s6631_s1 + $0x8] sm:$0xf0]  ;;  %v4129_v58 = vld [vmem:[%s6631_s1 + $0x84] sm:$0xf] }
  0xa3   :  { %2279 = vmatpush.bf16.msra.mxu3 %v3970_v62  ;;  %2241 = vmatmul.bf16.vlgmr.msra.gmra.mxu0 %v377_v7  ;;  %v2779_v62 = vld [vmem:[%s6631_s1 + $0x38] sm:$0xf0]  ;;  %v2979_v7 = vld [vmem:[%s6631_s1 + $0x1c8] sm:$0xf0]  ;;  %v2034_v30 = vpop.f32.mrf.mxu0 }
  0xa4   :  { %2291 = vmatpush.bf16.msrb.mxu0 %v4042_v6  ;;  %2254 = vmatmul.bf16.vlgmr.msra.gmra.mxu1 %v378_v11  ;;  %v2782_v5 = vor.u32 %v4119_v59, %v2779_v62  ;;  %v4169_v6 = vld [vmem:[%s6631_s1 + $0x1c4] sm:$0xf]  ;;  %v2771_v11 = vld [vmem:[%s6631_s1 + $0x28] sm:$0xf0] }
  0xa5   :  { %2298 = vmatpush.bf16.msrb.mxu1 %v2814_v63  ;;  %2267 = vmatmul.bf16.vlgmr.msra.gmra.mxu2 %v379_v3  ;;  %v4135_v63 = vld [vmem:[%s6631_s1 + $0xb4] sm:$0xf]  ;;  %v349_v3 = vld [vmem:[%s6632_s2] sm:$0x3]  ;;  %v2819_v59 = vld [vmem:[%s6631_s1 + $0x88] sm:$0xf0] }
  0xa6   :  { %2311 = vmatpush.bf16.msrb.mxu2 %v2878_v1  ;;  %2280 = vmatmul.bf16.vlgmr.msra.gmra.mxu3 %v380_v18  ;;  %v4151_v1 = vld [vmem:[%s6631_s1 + $0x134] sm:$0xf]  ;;  %v2846_v9 = vor.u32 %v4135_v63, %v2843_v0  ;;  %v351_v14 = vperm.slane %v349_v3, 0  ;;  %v2835_v18 = vld [vmem:[%s6631_s1 + $0xa8] sm:$0xf0] }
  0xa7   :  { %2324 = vmatpush.bf16.msrb.mxu3 %v2942_v2  ;;  %v2907_v2 = vld [vmem:[%s6631_s1 + $0x138] sm:$0xf0]  ;;  %v2047_v37 = vpop.f32.mrf.mxu1  ;;  %v2883_v62 = vld [vmem:[%s6631_s1 + $0x108] sm:$0xf0]  ;;  %v4191_v63 = vld [vmem:[%s6631_s1 + $0x274] sm:$0xf] }
  0xa8   :  { %2292 = vmatpush.bf16.msrb.mxu0 %v4034_v31  ;;  %v2910_v10 = vor.u32 %v4151_v1, %v2907_v2  ;;  %v2838_v31 = vor.u32 %v4133_v13, %v2835_v18  ;;  %v3067_v2 = vld [vmem:[%s6631_s1 + $0x278] sm:$0xf0]  ;;  %v4207_v3 = vld [vmem:[%s6631_s1 + $0x2f4] sm:$0xf]  ;;  %v3187_v33 = vld [vmem:[%s6631_s1 + $0x368] sm:$0xf0] }
  0xa9   :  { %2299 = vmatpush.bf16.msrb.mxu1 %v2806_v19  ;;  %v4149_v19 = vld [vmem:[%s6631_s1 + $0x124] sm:$0xf]  ;;  %v2955_v18 = vld [vmem:[%s6631_s1 + $0x198] sm:$0xf0] }
  0xaa   :  { %2312 = vmatpush.bf16.msrb.mxu2 %v2870_v25  ;;  %v2982_v25 = vor.u32 %v4169_v6, %v2979_v7  ;;  %v2902_v32 = vor.u32 %v4149_v19, %v2899_v23  ;;  %v2758_v6 = vor.u32 %v4113_v52, %v2755_v57  ;;  %v4223_v7 = vld [vmem:[%s6631_s1 + $0x374] sm:$0xf]  ;;  %v3070_v23 = vor.u32 %v4191_v63, %v3067_v2  ;;  %v3115_v52 = vld [vmem:[%s6631_s1 + $0x2d8] sm:$0xf0]  ;;  %v4201_v63 = vld [vmem:[%s6631_s1 + $0x2c4] sm:$0xf] }
  0xab   :  { %2325 = vmatpush.bf16.msrb.mxu3 %v2934_v27  ;;  %v2774_v27 = vor.u32 %v4117_v8, %v2771_v11  ;;  %v2073_v1 = vpop.f32.mrf.mxu3  ;;  %v3195_v8 = vld [vmem:[%s6631_s1 + $0x378] sm:$0xf0]  ;;  %v2822_v11 = vor.u32 %v4129_v58, %v2819_v59  ;;  %v3171_v2 = vld [vmem:[%s6631_s1 + $0x348] sm:$0xf0] }
  0xac   :  { %2337 = vmatpush.bf16.msra.mxu0 %v3006_v35  ;;  %v4131_v35 = vld [vmem:[%s6631_s1 + $0x94] sm:$0xf]  ;;  %v3179_v57 = vld [vmem:[%s6631_s1 + $0x358] sm:$0xf0] }
  0xad   :  { %2300 = vmatpush.bf16.msrb.mxu1 %v2798_v36  ;;  %v2035_v36 = vadd.f32 %v2034_v30, %v351_v14  ;;  %v4163_v14 = vld [vmem:[%s6631_s1 + $0x194] sm:$0xf]  ;;  %v3123_v30 = vld [vmem:[%s6631_s1 + $0x2e8] sm:$0xf0] }
  0xae   :  { %2313 = vmatpush.bf16.msrb.mxu2 %v2862_v39  ;;  %v4147_v39 = vld [vmem:[%s6631_s1 + $0x114] sm:$0xf] }
  0xaf   :  { %2326 = vmatpush.bf16.msrb.mxu3 %v2926_v40  ;;  %v2891_v40 = vld [vmem:[%s6631_s1 + $0x118] sm:$0xf0]  ;;  %v2048_v41 = vadd.f32 %v2047_v37, %v2035_v36  ;;  %v2049_v19 = vpop.f32.mrf.mxu1 }
  0xb0   :  { %2338 = vmatpush.bf16.msra.mxu0 %v2998_v54  ;;  %v2830_v54 = vor.u32 %v4131_v35, %v2827_v38  ;;  %v2947_v35 = vld [vmem:[%s6631_s1 + $0x188] sm:$0xf0]  ;;  %v3126_v38 = vor.u32 %v4205_v29, %v3123_v30  ;;  %v3099_v19 = vld [vmem:[%s6631_s1 + $0x2b8] sm:$0xf0]  ;;  %v4233_v30 = vld [vmem:[%s6631_s1 + $0x3c4] sm:$0xf] }
  0xb1   :  { %2301 = vmatpush.bf16.msrb.mxu1 %v2790_v56  ;;  %v2894_v56 = vor.u32 %v4147_v39, %v2891_v40  ;;  %v4239_v39 = vld [vmem:[%s6631_s1 + $0x3f4] sm:$0xf]  ;;  %v3259_v40 = vld [vmem:[%s6631_s1 + $0x3f8] sm:$0xf0] }
  0xb2   :  { %2314 = vmatpush.bf16.msrb.mxu2 %v2854_v60  ;;  %v2060_v60 = vpop.f32.mrf.mxu2  ;;  %v3262_v58 = vor.u32 %v4239_v39, %v3259_v40  ;;  %v3155_v39 = vld [vmem:[%s6631_s1 + $0x328] sm:$0xf0] }
  0xb3   :  { %2327 = vmatpush.bf16.msrb.mxu3 %v2918_v61  ;;  %4047 = vmatmul.msk.bf16.vlgmr.msrb.gmra.mxu0 %vm2022_vm0, %v381_v24  ;;  %v4145_v61 = vld [vmem:[%s6631_s1 + $0x104] sm:$0xf]  ;;  %v2061_v0 = vadd.f32 %v2060_v60, %v2048_v41  ;;  %v4187_v41 = vld [vmem:[%s6631_s1 + $0x254] sm:$0xf] }
  0xb4   :  { %2339 = vmatpush.bf16.msra.mxu0 %v2990_v4  ;;  %v3131_v4 = vld [vmem:[%s6631_s1 + $0x2f8] sm:$0xf0]  ;;  %v2886_v13 = vor.u32 %v4145_v61, %v2883_v62  ;;  %v3251_v61 = vld [vmem:[%s6631_s1 + $0x3e8] sm:$0xf0]  ;;  %v4185_v62 = vld [vmem:[%s6631_s1 + $0x244] sm:$0xf] }
  0xb5   :  { %2302 = vmatpush.bf16.msrb.mxu1 %v2782_v5  ;;  %v2966_v5 = vor.u32 %v4165_v44, %v2963_v45  ;;  %v3134_v24 = vor.u32 %v4207_v3, %v3131_v4  ;;  %v3051_v44 = vld [vmem:[%s6631_s1 + $0x258] sm:$0xf0]  ;;  %v4203_v45 = vld [vmem:[%s6631_s1 + $0x2d4] sm:$0xf] }
  0xb6   :  { %2315 = vmatpush.bf16.msrb.mxu2 %v2846_v9  ;;  %v5749_v9 = vadd.f32 %v2073_v1, %v2061_v0  ;;  %v3054_v59 = vor.u32 %v4187_v41, %v3051_v44  ;;  %v3118_v60 = vor.u32 %v4203_v45, %v3115_v52  ;;  %v3107_v0 = vld [vmem:[%s6631_s1 + $0x2c8] sm:$0xf0]  ;;  %v4217_v1 = vld [vmem:[%s6631_s1 + $0x344] sm:$0xf]  ;;  %v4231_v45 = vld [vmem:[%s6631_s1 + $0x3b4] sm:$0xf] }
  0xb7   :  { %2328 = vmatpush.bf16.msrb.mxu3 %v2910_v10  ;;  %v2036_v10 = vpop.f32.mrf.mxu0  ;;  %v3227_v52 = vld [vmem:[%s6631_s1 + $0x3b8] sm:$0xf0] }
  0xb8   :  { %2340 = vmatpush.bf16.msra.mxu0 %v2982_v25  ;;  %v4189_v25 = vld [vmem:[%s6631_s1 + $0x264] sm:$0xf]  ;;  %v4183_v10 = vld [vmem:[%s6631_s1 + $0x234] sm:$0xf] }
  0xb9   :  { %2303 = vmatpush.bf16.msrb.mxu1 %v2774_v27  ;;  %v3198_v27 = vor.u32 %v4223_v7, %v3195_v8  ;;  %v3062_v37 = vor.u32 %v4189_v25, %v3059_v28  ;;  %v3243_v7 = vld [vmem:[%s6631_s1 + $0x3d8] sm:$0xf0] }
  0xba   :  { %2316 = vmatpush.bf16.msrb.mxu2 %v2838_v31  ;;  %v2958_v31 = vor.u32 %v4163_v14, %v2955_v18  ;;  %v2062_v36 = vpop.f32.mrf.mxu2  ;;  %v3035_v14 = vld [vmem:[%s6631_s1 + $0x238] sm:$0xf0]  ;;  %v4199_v18 = vld [vmem:[%s6631_s1 + $0x2b4] sm:$0xf] }
  0xbb   :  { %2329 = vmatpush.bf16.msrb.mxu3 %v2902_v32  ;;  %v4221_v32 = vld [vmem:[%s6631_s1 + $0x364] sm:$0xf]  ;;  %v3038_v28 = vor.u32 %v4183_v10, %v3035_v14  ;;  %v3102_v29 = vor.u32 %v4199_v18, %v3099_v19  ;;  %v3091_v36 = vld [vmem:[%s6631_s1 + $0x2a8] sm:$0xf0]  ;;  %v4271_v14 = vld [vmem:[%s6631_s1 + $0x4f4] sm:$0xf] }
  0xbc   :  { %2341 = vmatpush.bf16.msra.mxu0 %v2974_v42  ;;  %v2075_v42 = vpop.f32.mrf.mxu3 }
  0xbd   :  { %2304 = vmatpush.bf16.msrb.mxu1 %v2766_v43  ;;  %v3190_v43 = vor.u32 %v4221_v32, %v3187_v33 }
  0xbe   :  { %2317 = vmatpush.bf16.msrb.mxu2 %v2830_v54  ;;  %v2950_v54 = vor.u32 %v4161_v34, %v2947_v35  ;;  %v3027_v34 = vld [vmem:[%s6631_s1 + $0x228] sm:$0xf0]  ;;  %v4197_v35 = vld [vmem:[%s6631_s1 + $0x2a4] sm:$0xf] }
  0xbf   :  { %2330 = vmatpush.bf16.msrb.mxu3 %v2894_v56  ;;  %v4219_v56 = vld [vmem:[%s6631_s1 + $0x354] sm:$0xf] }
  0xc0   :  { %2342 = vmatpush.bf16.msra.mxu0 %v2966_v5  ;;  %v3110_v5 = vor.u32 %v4201_v63, %v3107_v0  ;;  %v2086_v8 = vpop.f32.mrf.mxu0  ;;  %v3219_v63 = vld [vmem:[%s6631_s1 + $0x3a8] sm:$0xf0] }
  0xc1   :  { %2305 = vmatpush.bf16.msrb.mxu1 %v2758_v6  ;;  %v4235_v6 = vld [vmem:[%s6631_s1 + $0x3d4] sm:$0xf] }
  0xc2   :  { %2318 = vmatpush.bf16.msrb.mxu2 %v2822_v11  ;;  %v3174_v11 = vor.u32 %v4217_v1, %v3171_v2  ;;  %v3246_v25 = vor.u32 %v4235_v6, %v3243_v7  ;;  %v4177_v2 = vld [vmem:[%s6631_s1 + $0x204] sm:$0xf]  ;;  %v3075_v6 = vld [vmem:[%s6631_s1 + $0x288] sm:$0xf0] }
  0xc3   :  { %2331 = vmatpush.bf16.msrb.mxu3 %v2886_v13  ;;  %v2087_v13 = vadd.f32 %v2086_v8, %v5749_v9  ;;  %v3163_v9 = vld [vmem:[%s6631_s1 + $0x338] sm:$0xf0]  ;;  %v4209_v7 = vld [vmem:[%s6631_s1 + $0x304] sm:$0xf]  ;;  %v3139_v8 = vld [vmem:[%s6631_s1 + $0x308] sm:$0xf0] }
  0xc4   :  { %2306 = vmatmul.bf16.vlgmr.msrb.gmra.mxu1 %v4823_v21  ;;  %2343 = vmatpush.bf16.msra.mxu0 %v2958_v31  ;;  %v4237_v21 = vld [vmem:[%s6631_s1 + $0x3e4] sm:$0xf] }
  0xc5   :  { %2350 = vmatpush.bf16.msra.mxu1 %v3070_v23  ;;  %2319 = vmatmul.bf16.vlgmr.msrb.gmra.mxu2 %v4834_v26  ;;  %v3182_v26 = vor.u32 %v4219_v56, %v3179_v57  ;;  %v3254_v3 = vor.u32 %v4237_v21, %v3251_v61  ;;  %v2099_v23 = vpop.f32.mrf.mxu1  ;;  %v4181_v31 = vld [vmem:[%s6631_s1 + $0x224] sm:$0xf]  ;;  %v4211_v61 = vld [vmem:[%s6631_s1 + $0x314] sm:$0xf] }
  0xc6   :  { %2363 = vmatpush.bf16.msra.mxu2 %v3134_v24  ;;  %2332 = vmatmul.bf16.vlgmr.msrb.gmra.mxu3 %v4821_v20  ;;  %v3043_v20 = vld [vmem:[%s6631_s1 + $0x248] sm:$0xf0]  ;;  %v4215_v24 = vld [vmem:[%s6631_s1 + $0x334] sm:$0xf]  ;;  %v3030_v42 = vor.u32 %v4181_v31, %v3027_v34 }
  0xc7   :  { %2376 = vmatpush.bf16.msra.mxu3 %v3198_v27  ;;  %v3046_v4 = vor.u32 %v4185_v62, %v3043_v20  ;;  %v2100_v27 = vadd.f32 %v2099_v23, %v2087_v13  ;;  %v3166_v32 = vor.u32 %v4215_v24, %v3163_v9  ;;  %v3147_v62 = vld [vmem:[%s6631_s1 + $0x318] sm:$0xf0]  ;;  %v4229_v20 = vld [vmem:[%s6631_s1 + $0x3a4] sm:$0xf]  ;;  %v4287_v24 = vld [vmem:[%s6631_s1 + $0x574] sm:$0xf] }
  0xc8   :  { %2344 = vmatpush.bf16.msra.mxu0 %v2950_v54  ;;  %v2112_v33 = vpop.f32.mrf.mxu2  ;;  %v4179_v54 = vld [vmem:[%s6631_s1 + $0x214] sm:$0xf]  ;;  %v2088_v56 = vpop.f32.mrf.mxu0  ;;  %v3323_v13 = vld [vmem:[%s6631_s1 + $0x478] sm:$0xf0]  ;;  %v3222_v19 = vor.u32 %v4229_v20, %v3219_v63  ;;  %v3315_v34 = vld [vmem:[%s6631_s1 + $0x468] sm:$0xf0] }
  0xc9   :  { %2351 = vmatpush.bf16.msra.mxu1 %v3062_v37  ;;  %v2113_v37 = vadd.f32 %v2112_v33, %v2100_v27  ;;  %v2125_v40 = vpop.f32.mrf.mxu3  ;;  %v3387_v23 = vld [vmem:[%s6631_s1 + $0x4f8] sm:$0xf0]  ;;  %v4253_v33 = vld [vmem:[%s6631_s1 + $0x464] sm:$0xf]  ;;  %v4251_v56 = vld [vmem:[%s6631_s1 + $0x454] sm:$0xf] }
  0xca   :  { %2364 = vmatpush.bf16.msra.mxu2 %v3126_v38  ;;  %v4213_v38 = vld [vmem:[%s6631_s1 + $0x324] sm:$0xf]  ;;  %v3451_v9 = vld [vmem:[%s6631_s1 + $0x578] sm:$0xf0]  ;;  %v3390_v31 = vor.u32 %v4271_v14, %v3387_v23  ;;  %v3507_v20 = vld [vmem:[%s6631_s1 + $0x5e8] sm:$0xf0] }
  0xcb   :  { %2377 = vmatpush.bf16.msra.mxu3 %v3190_v43  ;;  %2345 = vmatmul.bf16.vlgmr.msra.gmra.mxu0 %v4825_v22  ;;  %v3235_v22 = vld [vmem:[%s6631_s1 + $0x3c8] sm:$0xf0]  ;;  %v3094_v43 = vor.u32 %v4197_v35, %v3091_v36  ;;  %v5882_v44 = vadd.f32 %v2125_v40, %v2113_v37  ;;  %v3158_v57 = vor.u32 %v4213_v38, %v3155_v39  ;;  %v4269_v35 = vld [vmem:[%s6631_s1 + $0x4e4] sm:$0xf]  ;;  %v3291_v23 = vld [vmem:[%s6631_s1 + $0x438] sm:$0xf0] }
  0xcc   :  { %2389 = vmatpush.bf16.msrb.mxu0 %v3262_v58  ;;  %v3238_v41 = vor.u32 %v4233_v30, %v3235_v22  ;;  %v3019_v58 = vld [vmem:[%s6631_s1 + $0x218] sm:$0xf0]  ;;  %v3142_v30 = vor.u32 %v4209_v7, %v3139_v8  ;;  %v3379_v37 = vld [vmem:[%s6631_s1 + $0x4e8] sm:$0xf0]  ;;  %v4285_v38 = vld [vmem:[%s6631_s1 + $0x564] sm:$0xf] }
  0xcd   :  { %2352 = vmatpush.bf16.msra.mxu1 %v3054_v59  ;;  %v4195_v59 = vld [vmem:[%s6631_s1 + $0x294] sm:$0xf]  ;;  %v2101_v21 = vpop.f32.mrf.mxu1  ;;  %v3022_v0 = vor.u32 %v4179_v54, %v3019_v58  ;;  %v3443_v39 = vld [vmem:[%s6631_s1 + $0x568] sm:$0xf0]  ;;  %v4225_v40 = vld [vmem:[%s6631_s1 + $0x384] sm:$0xf] }
  0xce   :  { %2365 = vmatpush.bf16.msra.mxu2 %v3118_v60  ;;  %v3083_v60 = vld [vmem:[%s6631_s1 + $0x298] sm:$0xf0]  ;;  %v3446_v54 = vor.u32 %v4285_v38, %v3443_v39  ;;  %v4267_v58 = vld [vmem:[%s6631_s1 + $0x4d4] sm:$0xf] }
  0xcf   :  { %2378 = vmatpush.bf16.msra.mxu3 %v3182_v26  ;;  %v3230_v26 = vor.u32 %v4231_v45, %v3227_v52  ;;  %v3086_v1 = vor.u32 %v4195_v59, %v3083_v60  ;;  %v3515_v45 = vld [vmem:[%s6631_s1 + $0x5f8] sm:$0xf0]  ;;  %v3382_v52 = vor.u32 %v4269_v35, %v3379_v37  ;;  %v4283_v21 = vld [vmem:[%s6631_s1 + $0x554] sm:$0xf]  ;;  %v3347_v35 = vld [vmem:[%s6631_s1 + $0x4a8] sm:$0xf0] }
  0xd0   :  { %2390 = vmatpush.bf16.msrb.mxu0 %v3254_v3  ;;  %v3011_v3 = vld [vmem:[%s6631_s1 + $0x208] sm:$0xf0]  ;;  %v2114_v10 = vpop.f32.mrf.mxu2  ;;  %v3371_v60 = vld [vmem:[%s6631_s1 + $0x4d8] sm:$0xf0]  ;;  %v4299_v8 = vld [vmem:[%s6631_s1 + $0x5d4] sm:$0xf] }
  0xd1   :  { %2353 = vmatpush.bf16.msra.mxu1 %v3046_v4  ;;  %v4193_v4 = vld [vmem:[%s6631_s1 + $0x284] sm:$0xf]  ;;  %v2127_v18 = vpop.f32.mrf.mxu3  ;;  %v3374_v63 = vor.u32 %v4267_v58, %v3371_v60  ;;  %v3499_v10 = vld [vmem:[%s6631_s1 + $0x5d8] sm:$0xf0]  ;;  %v3411_v37 = vld [vmem:[%s6631_s1 + $0x528] sm:$0xf0] }
  0xd2   :  { %2366 = vmatpush.bf16.msra.mxu2 %v3110_v5  ;;  %v3150_v5 = vor.u32 %v4211_v61, %v3147_v62  ;;  %v3078_v27 = vor.u32 %v4193_v4, %v3075_v6  ;;  %v3435_v61 = vld [vmem:[%s6631_s1 + $0x558] sm:$0xf0]  ;;  %v3427_v4 = vld [vmem:[%s6631_s1 + $0x548] sm:$0xf0] }
  0xd3   :  { %2379 = vmatpush.bf16.msra.mxu3 %v3174_v11  ;;  %v4255_v11 = vld [vmem:[%s6631_s1 + $0x474] sm:$0xf]  ;;  %v3275_v58 = vld [vmem:[%s6631_s1 + $0x418] sm:$0xf0] }
  0xd4   :  { %2391 = vmatpush.bf16.msrb.mxu0 %v3246_v25  ;;  %v3014_v25 = vor.u32 %v4177_v2, %v3011_v3  ;;  %v3326_v22 = vor.u32 %v4255_v11, %v3323_v13  ;;  %v3363_v2 = vld [vmem:[%s6631_s1 + $0x4c8] sm:$0xf0]  ;;  %v4281_v3 = vld [vmem:[%s6631_s1 + $0x544] sm:$0xf] }
  0xd5   :  { %2354 = vmatpush.bf16.msra.mxu1 %v3038_v28  ;;  %v4227_v28 = vld [vmem:[%s6631_s1 + $0x394] sm:$0xf]  ;;  %v3430_v14 = vor.u32 %v4281_v3, %v3427_v4  ;;  %v4257_v3 = vld [vmem:[%s6631_s1 + $0x484] sm:$0xf]  ;;  %v3331_v4 = vld [vmem:[%s6631_s1 + $0x488] sm:$0xf0] }
  0xd6   :  { %2367 = vmatpush.bf16.msra.mxu2 %v3102_v29  ;;  %v3211_v29 = vld [vmem:[%s6631_s1 + $0x398] sm:$0xf0] }
  0xd7   :  { %2380 = vmatpush.bf16.msra.mxu3 %v3166_v32  ;;  %v3454_v32 = vor.u32 %v4287_v24, %v3451_v9  ;;  %v3214_v36 = vor.u32 %v4227_v28, %v3211_v29  ;;  %v4263_v24 = vld [vmem:[%s6631_s1 + $0x4b4] sm:$0xf]  ;;  %v3502_v28 = vor.u32 %v4299_v8, %v3499_v10  ;;  %v3579_v8 = vld [vmem:[%s6631_s1 + $0x678] sm:$0xf0] }
  0xd8   :  { %2392 = vmatpush.bf16.msrb.mxu0 %v3238_v41  ;;  %v3203_v41 = vld [vmem:[%s6631_s1 + $0x388] sm:$0xf0]  ;;  %v4279_v9 = vld [vmem:[%s6631_s1 + $0x534] sm:$0xf] }
  0xd9   :  { %2355 = vmatpush.bf16.msra.mxu1 %v3030_v42  ;;  %v3318_v42 = vor.u32 %v4253_v33, %v3315_v34  ;;  %v3206_v59 = vor.u32 %v4225_v40, %v3203_v41  ;;  %v3283_v33 = vld [vmem:[%s6631_s1 + $0x428] sm:$0xf0]  ;;  %v4261_v34 = vld [vmem:[%s6631_s1 + $0x4a4] sm:$0xf] }
  0xda   :  { %2368 = vmatpush.bf16.msra.mxu2 %v3094_v43  ;;  %v4303_v43 = vld [vmem:[%s6631_s1 + $0x5f4] sm:$0xf] }
  0xdb   :  { %2381 = vmatpush.bf16.msra.mxu3 %v3158_v57  ;;  %v3307_v57 = vld [vmem:[%s6631_s1 + $0x458] sm:$0xf0]  ;;  %v3518_v62 = vor.u32 %v4303_v43, %v3515_v45  ;;  %v4295_v43 = vld [vmem:[%s6631_s1 + $0x5b4] sm:$0xf] }
  0xdc   :  { %2393 = vmatpush.bf16.msrb.mxu0 %v3230_v26  ;;  %v4301_v26 = vld [vmem:[%s6631_s1 + $0x5e4] sm:$0xf]  ;;  %v3483_v45 = vld [vmem:[%s6631_s1 + $0x5b8] sm:$0xf0] }
  0xdd   :  { %2356 = vmatpush.bf16.msra.mxu1 %v3022_v0  ;;  %v3438_v0 = vor.u32 %v4283_v21, %v3435_v61  ;;  %v3339_v61 = vld [vmem:[%s6631_s1 + $0x498] sm:$0xf0] }
  0xde   :  { %2369 = vmatpush.bf16.msra.mxu2 %v3086_v1  ;;  %v4265_v1 = vld [vmem:[%s6631_s1 + $0x4c4] sm:$0xf] }
  0xdf   :  { %2382 = vmatpush.bf16.msra.mxu3 %v3150_v5  ;;  %v3510_v5 = vor.u32 %v4301_v26, %v3507_v20  ;;  %v3366_v13 = vor.u32 %v4265_v1, %v3363_v2  ;;  %v3486_v26 = vor.u32 %v4295_v43, %v3483_v45  ;;  %v4293_v20 = vld [vmem:[%s6631_s1 + $0x5a4] sm:$0xf] }
  0xe0   :  { %2394 = vmatpush.bf16.msrb.mxu0 %v3222_v19  ;;  %v2138_v6 = vpop.f32.mrf.mxu0  ;;  %v4247_v19 = vld [vmem:[%s6631_s1 + $0x434] sm:$0xf] }
  0xe1   :  { %2357 = vmatpush.bf16.msra.mxu1 %v3014_v25  ;;  %v2139_v11 = vadd.f32 %v2138_v6, %v5882_v44  ;;  %v2151_v18 = vpop.f32.mrf.mxu1  ;;  %v3355_v44 = vld [vmem:[%s6631_s1 + $0x4b8] sm:$0xf0]  ;;  %v3294_v29 = vor.u32 %v4247_v19, %v3291_v23  ;;  %v3395_v6 = vld [vmem:[%s6631_s1 + $0x508] sm:$0xf0] }
  0xe2   :  { %2370 = vmatpush.bf16.msra.mxu2 %v3078_v27  ;;  %v3419_v25 = vld [vmem:[%s6631_s1 + $0x538] sm:$0xf0] }
  0xe3   :  { %2383 = vmatpush.bf16.msra.mxu3 %v3142_v30  ;;  %v2152_v27 = vadd.f32 %v2151_v18, %v2139_v11  ;;  %v3491_v30 = vld [vmem:[%s6631_s1 + $0x5c8] sm:$0xf0]  ;;  %v4335_v11 = vld [vmem:[%s6631_s1 + $0x6f4] sm:$0xf]  ;;  %v3707_v23 = vld [vmem:[%s6631_s1 + $0x778] sm:$0xf0] }
  0xe4   :  { %2395 = vmatpush.bf16.msrb.mxu0 %v3214_v36  ;;  %2358 = vmatmul.bf16.vlgmr.msra.gmra.mxu1 %v4889_v51  ;;  %v3299_v51 = vld [vmem:[%s6631_s1 + $0x448] sm:$0xf0]  ;;  %v4277_v36 = vld [vmem:[%s6631_s1 + $0x524] sm:$0xf] }
  0xe5   :  { %2402 = vmatpush.bf16.msrb.mxu1 %v3326_v22  ;;  %2371 = vmatmul.bf16.vlgmr.msra.gmra.mxu2 %v4896_v55  ;;  %v3310_v55 = vor.u32 %v4251_v56, %v3307_v57  ;;  %v3358_v22 = vor.u32 %v4263_v24, %v3355_v44  ;;  %v3414_v56 = vor.u32 %v4277_v36, %v3411_v37  ;;  %v4243_v57 = vld [vmem:[%s6631_s1 + $0x414] sm:$0xf]  ;;  %v3467_v44 = vld [vmem:[%s6631_s1 + $0x598] sm:$0xf0]  ;;  %v4289_v36 = vld [vmem:[%s6631_s1 + $0x584] sm:$0xf] }
  0xe6   :  { %2415 = vmatpush.bf16.msrb.mxu2 %v3390_v31  ;;  %2384 = vmatmul.bf16.vlgmr.msra.gmra.mxu3 %v4887_v50  ;;  %v4249_v50 = vld [vmem:[%s6631_s1 + $0x444] sm:$0xf]  ;;  %v3422_v31 = vor.u32 %v4279_v9, %v3419_v25  ;;  %v4291_v24 = vld [vmem:[%s6631_s1 + $0x594] sm:$0xf]  ;;  %v3334_v25 = vor.u32 %v4257_v3, %v3331_v4  ;;  %v3459_v37 = vld [vmem:[%s6631_s1 + $0x588] sm:$0xf0] }
  0xe7   :  { %2428 = vmatpush.bf16.msrb.mxu3 %v3454_v32  ;;  %v3302_v7 = vor.u32 %v4249_v50, %v3299_v51  ;;  %v4245_v32 = vld [vmem:[%s6631_s1 + $0x424] sm:$0xf]  ;;  %v3267_v51 = vld [vmem:[%s6631_s1 + $0x408] sm:$0xf0]  ;;  %v3462_v45 = vor.u32 %v4289_v36, %v3459_v37  ;;  %v4307_v36 = vld [vmem:[%s6631_s1 + $0x614] sm:$0xf] }
  0xe8   :  { %2396 = vmatpush.bf16.msrb.mxu0 %v3206_v59  ;;  %v2164_v38 = vpop.f32.mrf.mxu2  ;;  %v4259_v59 = vld [vmem:[%s6631_s1 + $0x494] sm:$0xf]  ;;  %v4241_v50 = vld [vmem:[%s6631_s1 + $0x404] sm:$0xf] }
  0xe9   :  { %2403 = vmatpush.bf16.msrb.mxu1 %v3318_v42  ;;  %v2165_v40 = vadd.f32 %v2164_v38, %v2152_v27  ;;  %v2177_v41 = vpop.f32.mrf.mxu3  ;;  %v3286_v42 = vor.u32 %v4245_v32, %v3283_v33  ;;  %v2153_v60 = vpop.f32.mrf.mxu1  ;;  %v3342_v1 = vor.u32 %v4259_v59, %v3339_v61  ;;  %v3270_v19 = vor.u32 %v4241_v50, %v3267_v51  ;;  %v4333_v32 = vld [vmem:[%s6631_s1 + $0x6e4] sm:$0xf]  ;;  %v3635_v33 = vld [vmem:[%s6631_s1 + $0x6e8] sm:$0xf0]  ;;  %v4367_v38 = vld [vmem:[%s6631_s1 + $0x7f4] sm:$0xf] }
  0xea   :  { %2416 = vmatpush.bf16.msrb.mxu2 %v3382_v52  ;;  %v2140_v52 = vpop.f32.mrf.mxu0  ;;  %v3691_v59 = vld [vmem:[%s6631_s1 + $0x758] sm:$0xf0]  ;;  %v4365_v60 = vld [vmem:[%s6631_s1 + $0x7e4] sm:$0xf]  ;;  %v3683_v50 = vld [vmem:[%s6631_s1 + $0x748] sm:$0xf0] }
  0xeb   :  { %2429 = vmatpush.bf16.msrb.mxu3 %v3446_v54  ;;  %2397 = vmatmul.bf16.vlgmr.msrb.gmra.mxu0 %v4891_v53  ;;  %v4297_v53 = vld [vmem:[%s6631_s1 + $0x5c4] sm:$0xf]  ;;  %v3350_v54 = vor.u32 %v4261_v34, %v3347_v35  ;;  %v6096_v21 = vadd.f32 %v2177_v41, %v2165_v40  ;;  %v3699_v35 = vld [vmem:[%s6631_s1 + $0x768] sm:$0xf0]  ;;  %v3638_v41 = vor.u32 %v4333_v32, %v3635_v33  ;;  %v3563_v52 = vld [vmem:[%s6631_s1 + $0x658] sm:$0xf0] }
  0xec   :  { %2441 = vmatpush.bf16.msra.mxu0 %v3518_v62  ;;  %v3494_v39 = vor.u32 %v4297_v53, %v3491_v30  ;;  %v4275_v62 = vld [vmem:[%s6631_s1 + $0x514] sm:$0xf]  ;;  %v4317_v53 = vld [vmem:[%s6631_s1 + $0x664] sm:$0xf]  ;;  %v3571_v30 = vld [vmem:[%s6631_s1 + $0x668] sm:$0xf0] }
  0xed   :  { %2404 = vmatpush.bf16.msrb.mxu1 %v3310_v55  ;;  %v3403_v55 = vld [vmem:[%s6631_s1 + $0x518] sm:$0xf0]  ;;  %v4349_v34 = vld [vmem:[%s6631_s1 + $0x764] sm:$0xf]  ;;  %v3574_v40 = vor.u32 %v4317_v53, %v3571_v30  ;;  %v4363_v51 = vld [vmem:[%s6631_s1 + $0x7d4] sm:$0xf] }
  0xee   :  { %2417 = vmatpush.bf16.msrb.mxu2 %v3374_v63  ;;  %v3278_v63 = vor.u32 %v4243_v57, %v3275_v58  ;;  %v3406_v2 = vor.u32 %v4275_v62, %v3403_v55  ;;  %v3702_v43 = vor.u32 %v4349_v34, %v3699_v35  ;;  %v4347_v58 = vld [vmem:[%s6631_s1 + $0x754] sm:$0xf]  ;;  %v4313_v62 = vld [vmem:[%s6631_s1 + $0x644] sm:$0xf]  ;;  %v3667_v30 = vld [vmem:[%s6631_s1 + $0x728] sm:$0xf0] }
  0xef   :  { %2430 = vmatpush.bf16.msrb.mxu3 %v3438_v0  ;;  %v3475_v0 = vld [vmem:[%s6631_s1 + $0x5a8] sm:$0xf0]  ;;  %v3694_v55 = vor.u32 %v4347_v58, %v3691_v59  ;;  %v4341_v53 = vld [vmem:[%s6631_s1 + $0x724] sm:$0xf]  ;;  %v3739_v32 = vld [vmem:[%s6631_s1 + $0x7b8] sm:$0xf0] }
  0xf0   :  { %2442 = vmatpush.bf16.msra.mxu0 %v3510_v5  ;;  %v4273_v5 = vld [vmem:[%s6631_s1 + $0x504] sm:$0xf]  ;;  %v3478_v10 = vor.u32 %v4293_v20, %v3475_v0  ;;  %v2166_v18 = vpop.f32.mrf.mxu2  ;;  %v3619_v20 = vld [vmem:[%s6631_s1 + $0x6c8] sm:$0xf0] }
  0xf1   :  { %2405 = vmatpush.bf16.msrb.mxu1 %v3302_v7  ;;  %v4319_v7 = vld [vmem:[%s6631_s1 + $0x674] sm:$0xf]  ;;  %v2179_v9 = vpop.f32.mrf.mxu3  ;;  %v3398_v27 = vor.u32 %v4273_v5, %v3395_v6  ;;  %v4345_v0 = vld [vmem:[%s6631_s1 + $0x744] sm:$0xf] }
  0xf2   :  { %2418 = vmatpush.bf16.msrb.mxu2 %v3366_v13  ;;  %v3643_v13 = vld [vmem:[%s6631_s1 + $0x6f8] sm:$0xf0]  ;;  %v4311_v5 = vld [vmem:[%s6631_s1 + $0x634] sm:$0xf]  ;;  %v3686_v6 = vor.u32 %v4345_v0, %v3683_v50  ;;  %v4361_v18 = vld [vmem:[%s6631_s1 + $0x7c4] sm:$0xf] }
  0xf3   :  { %2431 = vmatpush.bf16.msrb.mxu3 %v3430_v14  ;;  %v4351_v14 = vld [vmem:[%s6631_s1 + $0x774] sm:$0xf]  ;;  %v4305_v59 = vld [vmem:[%s6631_s1 + $0x604] sm:$0xf]  ;;  %v3899_v0 = vld [vmem:[%s6631_s1 + $0x8f8] sm:$0xf0] }
  0xf4   :  { %2443 = vmatpush.bf16.msra.mxu0 %v3502_v28  ;;  %v3582_v28 = vor.u32 %v4319_v7, %v3579_v8  ;;  %v3547_v8 = vld [vmem:[%s6631_s1 + $0x638] sm:$0xf0]  ;;  %v4415_v50 = vld [vmem:[%s6631_s1 + $0x974] sm:$0xf] }
  0xf5   :  { %2406 = vmatpush.bf16.msrb.mxu1 %v3294_v29  ;;  %v3646_v29 = vor.u32 %v4335_v11, %v3643_v13  ;;  %v3611_v11 = vld [vmem:[%s6631_s1 + $0x6b8] sm:$0xf0] }
  0xf6   :  { %2419 = vmatpush.bf16.msrb.mxu2 %v3358_v22  ;;  %v3710_v22 = vor.u32 %v4351_v14, %v3707_v23  ;;  %v3675_v14 = vld [vmem:[%s6631_s1 + $0x738] sm:$0xf0]  ;;  %v3550_v23 = vor.u32 %v4311_v5, %v3547_v8  ;;  %v4355_v5 = vld [vmem:[%s6631_s1 + $0x794] sm:$0xf] }
  0xf7   :  { %2432 = vmatpush.bf16.msrb.mxu3 %v3422_v31  ;;  %v3470_v31 = vor.u32 %v4291_v24, %v3467_v44  ;;  %v4309_v44 = vld [vmem:[%s6631_s1 + $0x624] sm:$0xf] }
  0xf8   :  { %2444 = vmatpush.bf16.msra.mxu0 %v3494_v39  ;;  %v3771_v39 = vld [vmem:[%s6631_s1 + $0x7f8] sm:$0xf0] }
  0xf9   :  { %2407 = vmatpush.bf16.msrb.mxu1 %v3286_v42  ;;  %v4315_v42 = vld [vmem:[%s6631_s1 + $0x654] sm:$0xf]  ;;  %v3774_v57 = vor.u32 %v4367_v38, %v3771_v39  ;;  %v3670_v38 = vor.u32 %v4341_v53, %v3667_v30  ;;  %v3531_v39 = vld [vmem:[%s6631_s1 + $0x618] sm:$0xf0] }
  0xfa   :  { %2420 = vmatpush.bf16.msrb.mxu2 %v3350_v54  ;;  %v4331_v54 = vld [vmem:[%s6631_s1 + $0x6d4] sm:$0xf]  ;;  %v4027_v53 = vld [vmem:[%s6631_s1 + $0x9f8] sm:$0xf0] }
  0xfb   :  { %2433 = vmatpush.bf16.msrb.mxu3 %v3414_v56  ;;  %v3627_v56 = vld [vmem:[%s6631_s1 + $0x6d8] sm:$0xf0] }
  0xfc   :  { %2445 = vmatpush.bf16.msra.mxu0 %v3486_v26  ;;  %v3630_v61 = vor.u32 %v4331_v54, %v3627_v56  ;;  %v4329_v26 = vld [vmem:[%s6631_s1 + $0x6c4] sm:$0xf]  ;;  %v3731_v56 = vld [vmem:[%s6631_s1 + $0x7a8] sm:$0xf0] }
  0xfd   :  { %2408 = vmatpush.bf16.msrb.mxu1 %v3278_v63  ;;  %v3622_v4 = vor.u32 %v4329_v26, %v3619_v20  ;;  %v4357_v54 = vld [vmem:[%s6631_s1 + $0x7a4] sm:$0xf]  ;;  %v4383_v26 = vld [vmem:[%s6631_s1 + $0x874] sm:$0xf]  ;;  %v3835_v20 = vld [vmem:[%s6631_s1 + $0x878] sm:$0xf0] }
  0xfe   :  { %2421 = vmatpush.bf16.msrb.mxu2 %v3342_v1  ;;  %v3755_v1 = vld [vmem:[%s6631_s1 + $0x7d8] sm:$0xf0] }
  0xff   :  { %2434 = vmatpush.bf16.msrb.mxu3 %v3406_v2  ;;  %v3758_v13 = vor.u32 %v4363_v51, %v3755_v1  ;;  %v3963_v51 = vld [vmem:[%s6631_s1 + $0x978] sm:$0xf0] }
 0x100   :  { %2446 = vmatpush.bf16.msra.mxu0 %v3478_v10  ;;  %v6236_v2 = vpop.f32.mrf.mxu0  ;;  %v4327_v10 = vld [vmem:[%s6631_s1 + $0x6b4] sm:$0xf] }
 0x101   :  { %2409 = vmatpush.bf16.msrb.mxu1 %v3270_v19  ;;  %v6242_v7 = vpop.f32.mrf.mxu1  ;;  %v3747_v19 = vld [vmem:[%s6631_s1 + $0x7c8] sm:$0xf0]  ;;  %v3614_v24 = vor.u32 %v4327_v10, %v3611_v11  ;;  %v3838_v11 = vor.u32 %v4383_v26, %v3835_v20 }
 0x102   :  { %2422 = vmatpush.bf16.msrb.mxu2 %v3334_v25  ;;  %v3539_v25 = vld [vmem:[%s6631_s1 + $0x628] sm:$0xf0] }
 0x103   :  { %2435 = vmatpush.bf16.msrb.mxu3 %v3398_v27  ;;  %v4325_v27 = vld [vmem:[%s6631_s1 + $0x6a4] sm:$0xf]  ;;  %v3542_v34 = vor.u32 %v4309_v44, %v3539_v25 }
 0x104   :  { %2447 = vmatpush.bf16.msra.mxu0 %v3470_v31  ;;  %2410 = vmatmul.bf16.vlgmr.msrb.gmra.mxu1 %v5166_v12  ;;  %v3763_v12 = vld [vmem:[%s6631_s1 + $0x7e8] sm:$0xf0]  ;;  %v4359_v31 = vld [vmem:[%s6631_s1 + $0x7b4] sm:$0xf]  ;;  %v4413_v44 = vld [vmem:[%s6631_s1 + $0x964] sm:$0xf] }
 0x105   :  { %2454 = vmatpush.bf16.msra.mxu1 %v3582_v28  ;;  %2423 = vmatmul.bf16.vlgmr.msrb.gmra.mxu2 %v5176_v16  ;;  %v3566_v16 = vor.u32 %v4315_v42, %v3563_v52  ;;  %v3766_v63 = vor.u32 %v4365_v60, %v3763_v12  ;;  %v3603_v28 = vld [vmem:[%s6631_s1 + $0x6a8] sm:$0xf0]  ;;  %v3659_v52 = vld [vmem:[%s6631_s1 + $0x718] sm:$0xf0]  ;;  %v4321_v12 = vld [vmem:[%s6631_s1 + $0x684] sm:$0xf] }
 0x106   :  { %2467 = vmatpush.bf16.msra.mxu2 %v3646_v29  ;;  %2436 = vmatmul.bf16.vlgmr.msrb.gmra.mxu3 %v5174_v15  ;;  %v3555_v15 = vld [vmem:[%s6631_s1 + $0x648] sm:$0xf0]  ;;  %v3750_v29 = vor.u32 %v4361_v18, %v3747_v19  ;;  %v3606_v35 = vor.u32 %v4325_v27, %v3603_v28  ;;  %v4397_v19 = vld [vmem:[%s6631_s1 + $0x8e4] sm:$0xf] }
 0x107   :  { %2480 = vmatpush.bf16.msra.mxu3 %v3710_v22  ;;  %v3558_v3 = vor.u32 %v4313_v62, %v3555_v15  ;;  %v3523_v60 = vld [vmem:[%s6631_s1 + $0x608] sm:$0xf0]  ;;  %v4337_v62 = vld [vmem:[%s6631_s1 + $0x704] sm:$0xf]  ;;  %v3734_v15 = vor.u32 %v4357_v54, %v3731_v56 }
 0x108   :  { %2448 = vmatpush.bf16.msra.mxu0 %v3462_v45  ;;  %v6283_v22 = vpop.f32.mrf.mxu2  ;;  %v2192_v37 = vpop.f32.mrf.mxu0  ;;  %v4339_v45 = vld [vmem:[%s6631_s1 + $0x714] sm:$0xf]  ;;  %v3827_v18 = vld [vmem:[%s6631_s1 + $0x868] sm:$0xf0]  ;;  %v4353_v25 = vld [vmem:[%s6631_s1 + $0x784] sm:$0xf] }
 0x109   :  { %2455 = vmatpush.bf16.msra.mxu1 %v3574_v40  ;;  %v6291_v33 = vpop.f32.mrf.mxu3  ;;  %v4323_v40 = vld [vmem:[%s6631_s1 + $0x694] sm:$0xf]  ;;  %v2205_v42 = vpop.f32.mrf.mxu1  ;;  %v3715_v27 = vld [vmem:[%s6631_s1 + $0x788] sm:$0xf0]  ;;  %v3883_v37 = vld [vmem:[%s6631_s1 + $0x8d8] sm:$0xf0] }
 0x10a   :  { %2468 = vmatpush.bf16.msra.mxu2 %v3638_v41  ;;  %v3595_v41 = vld [vmem:[%s6631_s1 + $0x698] sm:$0xf0]  ;;  %v4019_v42 = vld [vmem:[%s6631_s1 + $0x9e8] sm:$0xf0]  ;;  %v4409_v56 = vld [vmem:[%s6631_s1 + $0x944] sm:$0xf] }
 0x10b   :  { %2481 = vmatpush.bf16.msra.mxu3 %v3702_v43  ;;  %2449 = vmatmul.bf16.vlgmr.msra.gmra.mxu0 %v5178_v17  ;;  %v4343_v17 = vld [vmem:[%s6631_s1 + $0x734] sm:$0xf]  ;;  %v3742_v43 = vor.u32 %v4359_v31, %v3739_v32  ;;  %v3598_v58 = vor.u32 %v4323_v40, %v3595_v41  ;;  %v4429_v41 = vld [vmem:[%s6631_s1 + $0x9e4] sm:$0xf]  ;;  %v3875_v54 = vld [vmem:[%s6631_s1 + $0x8c8] sm:$0xf0] }
 0x10c   :  { %2493 = vmatpush.bf16.msrb.mxu0 %v3774_v57  ;;  %v3678_v9 = vor.u32 %v4343_v17, %v3675_v14  ;;  %v3534_v57 = vor.u32 %v4307_v36, %v3531_v39  ;;  %v3966_v17 = vor.u32 %v4415_v50, %v3963_v51  ;;  %v4381_v14 = vld [vmem:[%s6631_s1 + $0x864] sm:$0xf]  ;;  %v4379_v32 = vld [vmem:[%s6631_s1 + $0x854] sm:$0xf]  ;;  %v3718_v36 = vor.u32 %v4353_v25, %v3715_v27  ;;  %v3947_v39 = vld [vmem:[%s6631_s1 + $0x958] sm:$0xf0] }
 0x10d   :  { %2456 = vmatpush.bf16.msra.mxu1 %v3566_v16  ;;  %v3662_v16 = vor.u32 %v4339_v45, %v3659_v52  ;;  %v3830_v28 = vor.u32 %v4381_v14, %v3827_v18  ;;  %v4393_v52 = vld [vmem:[%s6631_s1 + $0x8c4] sm:$0xf]  ;;  %v3931_v50 = vld [vmem:[%s6631_s1 + $0x938] sm:$0xf0]  ;;  %v4371_v27 = vld [vmem:[%s6631_s1 + $0x814] sm:$0xf] }
 0x10e   :  { %2469 = vmatpush.bf16.msra.mxu2 %v3630_v61  ;;  %v3587_v61 = vld [vmem:[%s6631_s1 + $0x688] sm:$0xf0] }
 0x10f   :  { %2482 = vmatpush.bf16.msra.mxu3 %v3694_v55  ;;  %v3651_v55 = vld [vmem:[%s6631_s1 + $0x708] sm:$0xf0] }
 0x110   :  { %2494 = vmatpush.bf16.msrb.mxu0 %v3766_v63  ;;  %v4399_v63 = vld [vmem:[%s6631_s1 + $0x8f4] sm:$0xf]  ;;  %v2218_v1 = vpop.f32.mrf.mxu2  ;;  %v3654_v10 = vor.u32 %v4337_v62, %v3651_v55  ;;  %v3803_v55 = vld [vmem:[%s6631_s1 + $0x838] sm:$0xf0] }
 0x111   :  { %2457 = vmatpush.bf16.msra.mxu1 %v3558_v3  ;;  %v3526_v3 = vor.u32 %v4305_v59, %v3523_v60  ;;  %v2231_v8 = vpop.f32.mrf.mxu3  ;;  %v4427_v60 = vld [vmem:[%s6631_s1 + $0x9d4] sm:$0xf] }
 0x112   :  { %2470 = vmatpush.bf16.msra.mxu2 %v3622_v4  ;;  %v3590_v4 = vor.u32 %v4321_v12, %v3587_v61  ;;  %v4011_v12 = vld [vmem:[%s6631_s1 + $0x9d8] sm:$0xf0]  ;;  %v4375_v62 = vld [vmem:[%s6631_s1 + $0x834] sm:$0xf]  ;;  %v3795_v8 = vld [vmem:[%s6631_s1 + $0x828] sm:$0xf0] }
 0x113   :  { %2483 = vmatpush.bf16.msra.mxu3 %v3686_v6  ;;  %v3723_v6 = vld [vmem:[%s6631_s1 + $0x798] sm:$0xf0]  ;;  %v4014_v51 = vor.u32 %v4427_v60, %v4011_v12  ;;  %v3806_v1 = vor.u32 %v4375_v62, %v3803_v55 }
 0x114   :  { %2495 = vmatpush.bf16.msrb.mxu0 %v3758_v13  ;;  %v3902_v13 = vor.u32 %v4399_v63, %v3899_v0  ;;  %v3867_v63 = vld [vmem:[%s6631_s1 + $0x8b8] sm:$0xf0]  ;;  %v4407_v0 = vld [vmem:[%s6631_s1 + $0x934] sm:$0xf] }
 0x115   :  { %2458 = vmatpush.bf16.msra.mxu1 %v3550_v23  ;;  %v3726_v23 = vor.u32 %v4355_v5, %v3723_v6  ;;  %v3934_v5 = vor.u32 %v4407_v0, %v3931_v50  ;;  %v4373_v6 = vld [vmem:[%s6631_s1 + $0x824] sm:$0xf]  ;;  %v4444_v62 = vld [vmem:[%s6633_s3 + $0x38] sm:$0xff]  ;;  %v4035_v50 = vld [vmem:[%s6631_s1 + $0xa08] sm:$0xf0] }
 0x116   :  { %2471 = vmatpush.bf16.msra.mxu2 %v3614_v24  ;;  %v3891_v24 = vld [vmem:[%s6631_s1 + $0x8e8] sm:$0xf0]  ;;  %v4433_v0 = vld [vmem:[%s6631_s1 + $0xa04] sm:$0xf] }
 0x117   :  { %2484 = vmatpush.bf16.msra.mxu3 %v3678_v9  ;;  %v3955_v9 = vld [vmem:[%s6631_s1 + $0x968] sm:$0xf0]  ;;  %v3894_v30 = vor.u32 %v4397_v19, %v3891_v24  ;;  %v3798_v19 = vor.u32 %v4373_v6, %v3795_v8  ;;  %v3995_v24 = vld [vmem:[%s6631_s1 + $0x9b8] sm:$0xf0]  ;;  %v4457_v6 = vld [vmem:[#allocation1 + $0x12] sm:$0xff] }
 0x118   :  { %2496 = vmatpush.bf16.msrb.mxu0 %v3750_v29  ;;  %v4431_v29 = vld [vmem:[%s6631_s1 + $0x9f4] sm:$0xf]  ;;  %v3958_v31 = vor.u32 %v4413_v44, %v3955_v9 }
 0x119   :  { %2459 = vmatpush.bf16.msra.mxu1 %v3542_v34  ;;  %v3819_v34 = vld [vmem:[%s6631_s1 + $0x858] sm:$0xf0]  ;;  %v4030_v40 = vor.u32 %v4431_v29, %v4027_v53  ;;  %v4387_v29 = vld [vmem:[%s6631_s1 + $0x894] sm:$0xf] }
 0x11a   :  { %2472 = vmatpush.bf16.msra.mxu2 %v3606_v35  ;;  %v4395_v35 = vld [vmem:[%s6631_s1 + $0x8d4] sm:$0xf] }
 0x11b   :  { %2485 = vmatpush.bf16.msra.mxu3 %v3670_v38  ;;  %v4411_v38 = vld [vmem:[%s6631_s1 + $0x954] sm:$0xf] }
 0x11c   :  { %2497 = vmatpush.bf16.msrb.mxu0 %v3742_v43  ;;  %v3886_v43 = vor.u32 %v4395_v35, %v3883_v37  ;;  %v3950_v45 = vor.u32 %v4411_v38, %v3947_v39  ;;  %v4421_v37 = vld [vmem:[%s6631_s1 + $0x9a4] sm:$0xf]  ;;  %v3987_v38 = vld [vmem:[%s6631_s1 + $0x9a8] sm:$0xf0] }
 0x11d   :  { %2460 = vmatpush.bf16.msra.mxu1 %v3534_v57  ;;  %v3939_v57 = vld [vmem:[%s6631_s1 + $0x948] sm:$0xf0] }
 0x11e   :  { %2473 = vmatpush.bf16.msra.mxu2 %v3598_v58  ;;  %v4022_v58 = vor.u32 %v4429_v41, %v4019_v42  ;;  %v3942_v61 = vor.u32 %v4409_v56, %v3939_v57  ;;  %v3779_v41 = vld [vmem:[%s6631_s1 + $0x808] sm:$0xf0]  ;;  %v4385_v42 = vld [vmem:[%s6631_s1 + $0x884] sm:$0xf] }
 0x11f   :  { %2486 = vmatpush.bf16.msra.mxu3 %v3662_v16  ;;  %v3878_v16 = vor.u32 %v4393_v52, %v3875_v54  ;;  %v4435_v52 = vld [vmem:[%s6631_s1 + $0xa14] sm:$0xf]  ;;  %v4043_v54 = vld [vmem:[%s6631_s1 + $0xa18] sm:$0xf0] }
 0x120   :  { %2498 = vmatpush.bf16.msrb.mxu0 %v3734_v15  ;;  %v4391_v15 = vld [vmem:[%s6631_s1 + $0x8b4] sm:$0xf]  ;;  %v6449_v26 = vpop.f32.mrf.mxu0  ;;  %v4046_v55 = vor.u32 %v4435_v52, %v4043_v54 }
 0x121   :  { %2461 = vmatpush.bf16.msra.mxu1 %v3526_v3  ;;  %v6452_v20 = vpop.f32.mrf.mxu1  ;;  %v4003_v3 = vld [vmem:[%s6631_s1 + $0x9c8] sm:$0xf0] }
 0x122   :  { %2474 = vmatpush.bf16.msra.mxu2 %v3590_v4  ;;  %v3870_v4 = vor.u32 %v4391_v15, %v3867_v63  ;;  %v2191_v15 = vadd.f32 %v6236_v2, %v6096_v21  ;;  %v4443_v21 = vld [vmem:[%s6633_s3 + $0x30] sm:$0xff]  ;;  %v4038_v2 = vor.u32 %v4433_v0, %v4035_v50  ;;  %v4450_v50 = vld [vmem:[%s6633_s3 + $0x68] sm:$0xff] }
 0x123   :  { %2487 = vmatpush.bf16.msra.mxu3 %v3654_v10  ;;  %v4389_v10 = vld [vmem:[%s6631_s1 + $0x8a4] sm:$0xf] }
 0x124   :  { %2499 = vmatpush.bf16.msrb.mxu0 %v3726_v23  ;;  %2462 = vmatmul.bf16.vlgmr.msra.gmra.mxu1 %v5340_v46  ;;  %v3822_v46 = vor.u32 %v4379_v32, %v3819_v34  ;;  %v4423_v23 = vld [vmem:[%s6631_s1 + $0x9b4] sm:$0xf]  ;;  %v3915_v32 = vld [vmem:[%s6631_s1 + $0x918] sm:$0xf0] }
 0x125   :  { %2506 = vmatpush.bf16.msrb.mxu1 %v3838_v11  ;;  %2475 = vmatmul.bf16.vlgmr.msra.gmra.mxu2 %v5344_v48  ;;  %v4377_v48 = vld [vmem:[%s6631_s1 + $0x844] sm:$0xf]  ;;  %v3859_v11 = vld [vmem:[%s6631_s1 + $0x8a8] sm:$0xf0]  ;;  %v3998_v35 = vor.u32 %v4423_v23, %v3995_v24 }
 0x126   :  { %2519 = vmatpush.bf16.msrb.mxu2 %v3902_v13  ;;  %2488 = vmatmul.bf16.vlgmr.msra.gmra.mxu3 %v5342_v47  ;;  %v3811_v47 = vld [vmem:[%s6631_s1 + $0x848] sm:$0xf0]  ;;  %v4405_v13 = vld [vmem:[%s6631_s1 + $0x924] sm:$0xf]  ;;  %v3862_v9 = vor.u32 %v4389_v10, %v3859_v11 }
 0x127   :  { %2532 = vmatpush.bf16.msrb.mxu3 %v3966_v17  ;;  %v3814_v59 = vor.u32 %v4377_v48, %v3811_v47  ;;  %v3923_v17 = vld [vmem:[%s6631_s1 + $0x928] sm:$0xf0]  ;;  %v3990_v47 = vor.u32 %v4421_v37, %v3987_v38  ;;  %v4437_v37 = vld [vmem:[%s6633_s3] sm:$0xff] }
 0x128   :  { %2500 = vmatpush.bf16.msrb.mxu0 %v3718_v36  ;;  %v6487_v14 = vpop.f32.mrf.mxu2  ;;  %v3926_v25 = vor.u32 %v4405_v13, %v3923_v17  ;;  %v2244_v53 = vpop.f32.mrf.mxu0  ;;  %v3907_v48 = vld [vmem:[%s6631_s1 + $0x908] sm:$0xf0]  ;;  %v4458_v13 = vld [vmem:[#allocation1 + $0x1b] sm:$0xff] }
 0x129   :  { %2507 = vmatpush.bf16.msrb.mxu1 %v3830_v28  ;;  %v6495_v44 = vpop.f32.mrf.mxu3  ;;  %v3787_v28 = vld [vmem:[%s6631_s1 + $0x818] sm:$0xf0]  ;;  %v2257_v34 = vpop.f32.mrf.mxu1  ;;  %v4442_v10 = vld [vmem:[%s6633_s3 + $0x28] sm:$0xff]  ;;  %v4441_v17 = vld [vmem:[%s6633_s3 + $0x20] sm:$0xff] }
 0x12a   :  { %2520 = vmatpush.bf16.msrb.mxu2 %v3894_v30  ;;  %v3851_v30 = vld [vmem:[%s6631_s1 + $0x898] sm:$0xf0]  ;;  %v3790_v36 = vor.u32 %v4371_v27, %v3787_v28  ;;  %v4439_v28 = vld [vmem:[%s6633_s3 + $0x10] sm:$0xff] }
 0x12b   :  { %2533 = vmatpush.bf16.msrb.mxu3 %v3958_v31  ;;  %2501 = vmatmul.bf16.vlgmr.msrb.gmra.mxu0 %v5346_v49  ;;  %v4425_v49 = vld [vmem:[%s6631_s1 + $0x9c4] sm:$0xf]  ;;  %v4403_v31 = vld [vmem:[%s6631_s1 + $0x914] sm:$0xf]  ;;  %v3854_v39 = vor.u32 %v4387_v29, %v3851_v30 }
 0x12c   :  { %2545 = vmatpush.bf16.msra.mxu0 %v4030_v40  ;;  %v4006_v18 = vor.u32 %v4425_v49, %v4003_v3  ;;  %v3918_v40 = vor.u32 %v4403_v31, %v3915_v32  ;;  %v2204_v49 = vadd.f32 %v6242_v7, %v2191_v15  ;;  %v4455_v3 = vld [vmem:[#allocation1] sm:$0xff] }
 0x12d   :  { %2508 = vmatpush.bf16.msrb.mxu1 %v3822_v46  ;;  %v4369_v46 = vld [vmem:[%s6631_s1 + $0x804] sm:$0xf] }
 0x12e   :  { %2521 = vmatpush.bf16.msrb.mxu2 %v3886_v43  ;;  %v3843_v43 = vld [vmem:[%s6631_s1 + $0x888] sm:$0xf0]  ;;  %v3782_v57 = vor.u32 %v4369_v46, %v3779_v41  ;;  %v2217_v8 = vadd.f32 %v6283_v22, %v2204_v49  ;;  %v4459_v22 = vld [vmem:[%s6632_s2] sm:$0x3] }
 0x12f   :  { %2534 = vmatpush.bf16.msrb.mxu3 %v3950_v45  ;;  %v4401_v45 = vld [vmem:[%s6631_s1 + $0x904] sm:$0xf]  ;;  %v3846_v60 = vor.u32 %v4385_v42, %v3843_v43 }
 0x130   :  { %2546 = vmatpush.bf16.msra.mxu0 %v4022_v58  ;;  %v2270_v56 = vpop.f32.mrf.mxu2  ;;  %v4419_v58 = vld [vmem:[%s6631_s1 + $0x994] sm:$0xf]  ;;  %v3910_v12 = vor.u32 %v4401_v45, %v3907_v48  ;;  %v2230_v7 = vadd.f32 %v6291_v33, %v2217_v8  ;;  %v4440_v33 = vld [vmem:[%s6633_s3 + $0x18] sm:$0xff] }
 0x131   :  { %2509 = vmatpush.bf16.msrb.mxu1 %v3814_v59  ;;  %v3979_v59 = vld [vmem:[%s6631_s1 + $0x998] sm:$0xf0] }
 0x132   :  { %2522 = vmatpush.bf16.msrb.mxu2 %v3878_v16  ;;  %v2283_v16 = vpop.f32.mrf.mxu3  ;;  %v3982_v63 = vor.u32 %v4419_v58, %v3979_v59  ;;  %v2243_v23 = vadd.f32 %v6449_v26, %v2230_v7  ;;  %v4460_v26 = vld [vmem:[#allocation1 + $0x24] sm:$0xff] }
 0x133   :  { %2535 = vmatpush.bf16.msrb.mxu3 %v3942_v61  ;;  %v2294_v61 = vpop.f32.mrf.mxu0 }
 0x134   :  { %2547 = vmatpush.bf16.msra.mxu0 %v4014_v51  ;;  %v4417_v51 = vld [vmem:[%s6631_s1 + $0x984] sm:$0xf] }
 0x135   :  { %2510 = vmatpush.bf16.msrb.mxu1 %v3806_v1  ;;  %v3971_v1 = vld [vmem:[%s6631_s1 + $0x988] sm:$0xf0] }
 0x136   :  { %2523 = vmatpush.bf16.msrb.mxu2 %v3870_v4  ;;  %v3974_v4 = vor.u32 %v4417_v51, %v3971_v1  ;;  %v4449_v51 = vld [vmem:[%s6633_s3 + $0x60] sm:$0xff] }
 0x137   :  { %2536 = vmatpush.bf16.msrb.mxu3 %v3934_v5  ;;  %v4456_v5 = vld [vmem:[#allocation1 + $0x9] sm:$0xff] }
 0x138   :  { %2548 = vmatpush.bf16.msra.mxu0 %v4006_v18  ;;  %v352_v18 = vperm.slane %v4459_v22, 1  ;;  %v4445_v22 = vld [vmem:[%s6633_s3 + $0x40] sm:$0xff] }
 0x139   :  { %2511 = vmatpush.bf16.msrb.mxu1 %v3798_v19 }
 0x13a   :  { %2524 = vmatpush.bf16.msrb.mxu2 %v3862_v9  ;;  %v2256_v9 = vadd.f32 %v6452_v20, %v2243_v23  ;;  %v4438_v20 = vld [vmem:[%s6633_s3 + $0x8] sm:$0xff] }
 0x13b   :  { %2537 = vmatpush.bf16.msrb.mxu3 %v3926_v25  ;;  %v2296_v11 = vpop.f32.mrf.mxu0 }
 0x13c   :  { %2549 = vmatpush.bf16.msra.mxu0 %v3998_v35  ;;  %v2269_v25 = vadd.f32 %v6487_v14, %v2256_v9 }
 0x13d   :  { %2512 = vmatpush.bf16.msrb.mxu1 %v3790_v36 }
 0x13e   :  { %2525 = vmatpush.bf16.msrb.mxu2 %v3854_v39  ;;  %v2282_v34 = vadd.f32 %v6495_v44, %v2269_v25 }
 0x13f   :  { %2538 = vmatpush.bf16.msrb.mxu3 %v3918_v40 }
 0x140   :  { %2550 = vmatpush.bf16.msra.mxu0 %v3990_v47  ;;  %v2295_v35 = vadd.f32 %v2294_v61, %v2282_v34 }
 0x141   :  { %2513 = vmatpush.bf16.msrb.mxu1 %v3782_v57  ;;  %v2307_v19 = vpop.f32.mrf.mxu1 }
 0x142   :  { %2526 = vmatpush.bf16.msrb.mxu2 %v3846_v60  ;;  %v2308_v24 = vadd.f32 %v2307_v19, %v352_v18  ;;  %v2571_v40 = vmax.f32 %v2295_v35, 0.0 }
 0x143   :  { %2539 = vmatpush.bf16.msrb.mxu3 %v3910_v12 }
 0x144   :  { %2551 = vmatpush.bf16.msra.mxu0 %v3982_v63  ;;  %2514 = vmatmul.bf16.vlgmr.msrb.gmra.mxu1 %v4455_v3  ;;  %v2573_v46 = vpack.c.bf16 %v2571_v40, %v2571_v40 }
 0x145   :  { %2564 = vmatpush.bf16.msra.mxu1 %v4046_v55  ;;  %2527 = vmatmul.bf16.vlgmr.msrb.gmra.mxu2 %v4456_v5  ;;  %v4451_v55 = vld [vmem:[%s6633_s3 + $0x70] sm:$0xff] }
 0x146   :  { %2707 = vmatpush.bf16.msra.mxu2 %v4444_v62  ;;  %2540 = vmatmul.bf16.vlgmr.msrb.gmra.mxu3 %v4457_v6  ;;  %v4452_v62 = vld [vmem:[%s6633_s3 + $0x78] sm:$0xff]  ;;  %v4447_v5 = vld [vmem:[%s6633_s3 + $0x50] sm:$0xff] }
 0x147   :  { %2720 = vmatpush.bf16.msra.mxu3 %v4452_v62 }
 0x148   :  { %2552 = vmatpush.bf16.msra.mxu0 %v3974_v4  ;;  %v2320_v27 = vpop.f32.mrf.mxu2  ;;  %v2346_v30 = vpop.f32.mrf.mxu0 }
 0x149   :  { %2565 = vmatpush.bf16.msra.mxu1 %v4038_v2  ;;  %v2321_v29 = vadd.f32 %v2320_v27, %v2308_v24  ;;  %v2333_v53 = vpop.f32.mrf.mxu3  ;;  %v2309_v31 = vpop.f32.mrf.mxu1 }
 0x14a   :  { %2708 = vmatpush.bf16.msra.mxu2 %v4443_v21  ;;  %v4448_v21 = vld [vmem:[%s6633_s3 + $0x58] sm:$0xff] }
 0x14b   :  { %2553 = vmatmul.bf16.vlgmr.msra.gmra.mxu0 %v4458_v13  ;;  %v2334_v32 = vadd.f32 %v2333_v53, %v2321_v29  ;;  %2721 = vmatpush.bf16.msra.mxu3 %v4451_v55 }
 0x14d   :  { %v2347_v14 = vadd.f32 %v2346_v30, %v2334_v32 }
 0x14e   :  { %2709 = vmatpush.bf16.msra.mxu2 %v4442_v10  ;;  %v4446_v10 = vld [vmem:[%s6633_s3 + $0x48] sm:$0xff] }
 0x14f   :  { %2722 = vmatpush.bf16.msra.mxu3 %v4450_v50 }
 0x150   :  { %v2322_v36 = vpop.f32.mrf.mxu2  ;;  %v2348_v39 = vpop.f32.mrf.mxu0 }
 0x151   :  { %v2335_v38 = vpop.f32.mrf.mxu3 }
 0x152   :  { %2710 = vmatpush.bf16.msra.mxu2 %v4441_v17 }
 0x153   :  { %2723 = vmatpush.bf16.msra.mxu3 %v4449_v51 }
 0x154   :  { %4048 = vmatmul.msk.bf16.vlgmr.msra.gmra.mxu1 %vm2022_vm0, %v4460_v26 }
 0x156   :  { %2711 = vmatpush.bf16.msra.mxu2 %v4440_v33 }
 0x157   :  { %2724 = vmatpush.bf16.msra.mxu3 %v4448_v21 }
 0x15a   :  { %2712 = vmatpush.bf16.msra.mxu2 %v4439_v28 }
 0x15b   :  { %2725 = vmatpush.bf16.msra.mxu3 %v4447_v5 }
 0x15e   :  { %2713 = vmatpush.bf16.msra.mxu2 %v4438_v20 }
 0x15f   :  { %2726 = vmatpush.bf16.msra.mxu3 %v4446_v10 }
 0x161   :  { %v2359_v44 = vpop.f32.mrf.mxu1 }
 0x162   :  { %2714 = vmatpush.bf16.msra.mxu2 %v4437_v37  ;;  %v2360_v41 = vadd.f32 %v2359_v44, %v2347_v14 }
 0x163   :  { %2727 = vmatpush.bf16.msra.mxu3 %v4445_v22 }
 0x165   :  { %2715 = vmatmul.bf16.vlgmr.msra.gmra.mxu2 %v2573_v46  ;;  %v4454_v46 = vld [vmem:[%s6634_s4] ss:$0 sm:$0xff] }
 0x168   :  { %v2372_v42 = vpop.f32.mrf.mxu2  ;;  %v2398_v48 = vpop.f32.mrf.mxu0 }
 0x169   :  { %v2373_v43 = vadd.f32 %v2372_v42, %v2360_v41  ;;  %v2385_v45 = vpop.f32.mrf.mxu3  ;;  %v2361_v52 = vpop.f32.mrf.mxu1 }
 0x16b   :  { %v2386_v47 = vadd.f32 %v2385_v45, %v2373_v43 }
 0x16d   :  { %v2399_v54 = vadd.f32 %v2398_v48, %v2386_v47 }
 0x170   :  { %v2374_v56 = vpop.f32.mrf.mxu2  ;;  %v2400_v58 = vpop.f32.mrf.mxu0 }
 0x171   :  { %v2387_v57 = vpop.f32.mrf.mxu3 }
 0x181   :  { %v2411_v59 = vpop.f32.mrf.mxu1 }
 0x182   :  { %v2412_v6 = vadd.f32 %v2411_v59, %v2399_v54 }
 0x188   :  { %v2424_v60 = vpop.f32.mrf.mxu2  ;;  %v2450_v16 = vpop.f32.mrf.mxu0 }
 0x189   :  { %v2437_v12 = vpop.f32.mrf.mxu3  ;;  %v2413_v61 = vpop.f32.mrf.mxu1  ;;  %v2425_v8 = vadd.f32 %v2424_v60, %v2412_v6 }
 0x18b   :  { %v2438_v17 = vadd.f32 %v2437_v12, %v2425_v8 }
 0x18d   :  { %v2451_v18 = vadd.f32 %v2450_v16, %v2438_v17 }
 0x190   :  { %v2426_v15 = vpop.f32.mrf.mxu2  ;;  %v2452_v0 = vpop.f32.mrf.mxu0 }
 0x191   :  { %v2439_v63 = vpop.f32.mrf.mxu3 }
 0x1a1   :  { %v2463_v1 = vpop.f32.mrf.mxu1 }
 0x1a2   :  { %v2464_v19 = vadd.f32 %v2463_v1, %v2451_v18 }
 0x1a8   :  { %v2476_v2 = vpop.f32.mrf.mxu2  ;;  %v2502_v3 = vpop.f32.mrf.mxu0 }
 0x1a9   :  { %v2489_v49 = vpop.f32.mrf.mxu3  ;;  %v2465_v4 = vpop.f32.mrf.mxu1  ;;  %v2477_v23 = vadd.f32 %v2476_v2, %v2464_v19 }
 0x1ab   :  { %v2490_v33 = vadd.f32 %v2489_v49, %v2477_v23 }
 0x1ad   :  { %v2503_v9 = vadd.f32 %v2502_v3, %v2490_v33 }
 0x1b0   :  { %v2478_v11 = vpop.f32.mrf.mxu2  ;;  %v2504_v13 = vpop.f32.mrf.mxu0 }
 0x1b1   :  { %v2491_v7 = vpop.f32.mrf.mxu3 }
 0x1c1   :  { %v2515_v24 = vpop.f32.mrf.mxu1 }
 0x1c2   :  { %v2516_v25 = vadd.f32 %v2515_v24, %v2503_v9 }
 0x1c8   :  { %v2528_v27 = vpop.f32.mrf.mxu2  ;;  %v2554_v53 = vpop.f32.mrf.mxu0 }
 0x1c9   :  { %v2541_v28 = vpop.f32.mrf.mxu3  ;;  %v2529_v29 = vadd.f32 %v2528_v27, %v2516_v25  ;;  %v2517_v30 = vpop.f32.mrf.mxu1 }
 0x1cb   :  { %v2542_v26 = vadd.f32 %v2541_v28, %v2529_v29 }
 0x1cd   :  { %v2555_v31 = vadd.f32 %v2554_v53, %v2542_v26 }
 0x1d0   :  { %v2530_v32 = vpop.f32.mrf.mxu2  ;;  %v2556_v20 = vpop.f32.mrf.mxu0 }
 0x1d1   :  { %v2543_v34 = vpop.f32.mrf.mxu3  ;;  %v2567_v14 = vpop.f32.mrf.mxu1 }
 0x1d2   :  { %v2568_v35 = vadd.f32 %v2567_v14, %v2555_v31 }
 0x1d4   :  { %v2572_v36 = vmax.f32 %v2568_v35, 0.0 }
 0x1d6   :  { %v2574_v37 = vpack.c.bf16 %v2572_v36, %v2572_v36 }
 0x1d8   :  { %2728 = vmatmul.bf16.vlgmr.msra.gmra.mxu3 %v2574_v37 }
 0x1d9   :  { %v2569_v38 = vpop.f32.mrf.mxu1 }
 0x1e8   :  { %v2716_v39 = vpop.f32.mrf.mxu2 }
 0x1e9   :  { %v2717_v44 = vadd.f32 %v4454_v46, %v2716_v39 }
 0x1f0   :  { %v2718_v40 = vpop.f32.mrf.mxu2 }
 0x25b   :  { %v2729_v41 = vpop.f32.mrf.mxu3 }
 0x25c   :  { %v2730_v42 = vadd.f32 %v2729_v41, %v2717_v44 }
 0x25e   :  { %2734 = vst.msk [vmem:[#allocation2] sm:$0x3] %vm2733_vm1, %v2730_v42 }
 0x25f   :  { %2745 = dma.vmem_to_hbm [thread:$0]  %s2741_s24, 32, %s2743_s26, [#allocation3]  }
 0x263   :  { %v2731_v43 = vpop.f32.mrf.mxu3 }
 0x264   :  { %4485 = dma.done.wait [#allocation3], 32  }
 0x265   :  { %4486 = vsyncadd [#allocation3], 4294967264 }
 0x266   :  { %2750 = vsyncpa [#allocation3], 1 }

</bundles_post_ra>
